<compile_context>
chip_gen: v7x
topology: tpu7x:2x2x1
jax: 0.10.0
libtpu: 0.0.40
codegen_flags: <defaults>
</compile_context>

<pallas_src>
import functools

import jax
import jax.numpy as jnp
from jax.experimental import pallas as pl
from jax.experimental.pallas import tpu as pltpu

SCALE = float(2 ** 8)
INV_SCALE = 1.0 / SCALE          # power of two -> multiply is bit-exact vs divide
QMIN = -2.0 ** 15
QMAX = 2.0 ** 15 - 1.0
LN_EPS = 1e-5
MAX_ROW_TILE = 1024              # token-tile target (feedback: 512-1024 rows)


# ---------------------------------------------------------------------------
# shared math helpers (pure jnp: used both inside the kernels and in the reference)
# ---------------------------------------------------------------------------
def _fpq(x):
    """round(x*scale).clamp(-2^15, 2^15-1) / scale  (jnp.round == torch.round, half-to-even)."""
    return jnp.clip(jnp.round(x * SCALE), QMIN, QMAX) * INV_SCALE


def _layernorm(x, gamma, beta):
    mean = jnp.mean(x, axis=-1, keepdims=True)
    xc = x - mean
    var = jnp.mean(xc * xc, axis=-1, keepdims=True)
    return xc * jax.lax.rsqrt(var + LN_EPS) * gamma + beta


def _softmax_lastdim(s):
    m = jnp.max(s, axis=-1, keepdims=True)
    e = jnp.exp(s - m)
    return e / jnp.sum(e, axis=-1, keepdims=True)


# ---------------------------------------------------------------------------
# tiling / compiler-parameter helpers
# ---------------------------------------------------------------------------
def _round_up(n, m):
    return ((n + m - 1) // m) * m


def _tile_rows(n, target=MAX_ROW_TILE):
    """Pick a row tile (multiple of 8) and a padded row count that is a multiple of it.

    Guarantees >= 2 grid steps whenever n > 8, so software pipelining and
    dimension_semantics=("parallel",) sharding across TensorCores stay effective,
    and a single monolithic block can never blow the VMEM limit for large n.
    """
    if n >= 2 * target:
        tm = target
    else:
        tm = max(8, _round_up((n + 1) // 2, 8))
    return tm, _round_up(n, tm)


def _vmem_limit_bytes():
    # Generation-aware scoped-VMEM budget: ~48 MiB on v7x (64 MiB physical VMEM),
    # ~96-112 MiB on v5e / v6e (128 MiB physical VMEM).
    try:
        cap = int(pltpu.get_tpu_info().vmem_capacity_bytes)
    except Exception:
        cap = 64 * 1024 * 1024
    return min((cap * 3) // 4, 112 * 1024 * 1024)


def _cparams():
    return pltpu.CompilerParams(dimension_semantics=("parallel",),
                                vmem_limit_bytes=_vmem_limit_bytes())


# ---------------------------------------------------------------------------
# kernels
# ---------------------------------------------------------------------------
def _ln_qkv_kernel(x_ref, g_ref, b_ref, wqkv_ref, bqkv_ref, o_ref):
    xn = _layernorm(x_ref[...], g_ref[...], b_ref[...])
    qkv = jnp.dot(xn, wqkv_ref[...], preferred_element_type=jnp.float32) + bqkv_ref[...]
    o_ref[...] = _fpq(qkv)


def _attention_kernel(q_ref, k_ref, v_ref, o_ref, *, num_heads):
    """One batch element: q/k/v are lane-dense [S, E] column slices of qkv.

    Heads are handled with in-kernel 32-wide column slices and plain 2-D MXU matmuls;
    the merged context is written straight into a lane-dense [S, E] output block, so no
    wrapper-side head split/merge relayouts and no 32-lane masked output stores remain.
    """
    S, E = q_ref.shape
    dh = E // num_heads
    inv_sqrt_dh = float(dh) ** -0.5

    # Fold 1/sqrt(Dh) into q: scales S*E elements instead of H*S*S score elements.
    q = q_ref[...] * inv_sqrt_dh
    k = k_ref[...]
    v = v_ref[...]

    nt_dims = (((1,), (1,)), ((), ()))        # contract last dims: q @ k^T without transpose
    for h in range(num_heads):                # static unroll; per-head 2-D MXU matmuls
        lo = h * dh
        qh = q[:, lo:lo + dh]
        kh = k[:, lo:lo + dh]
        vh = v[:, lo:lo + dh]
        s = jax.lax.dot_general(qh, kh, nt_dims,
                                preferred_element_type=jnp.float32)      # [S, S]
        m = jnp.max(s, axis=-1, keepdims=True)
        e = jnp.exp(s - m)
        denom = jnp.sum(e, axis=-1, keepdims=True)
        # one reciprocal per row + broadcast multiply instead of per-element divide
        p = _fpq(e * pl.reciprocal(denom, approx=False))
        o_ref[:, lo:lo + dh] = jnp.dot(p, vh, preferred_element_type=jnp.float32)


def _proj_residual_mlp_kernel(ctx_ref, x_ref, wout_ref, bout_ref,
                              g2_ref, bln2_ref, w1_ref, bfc1_ref,
                              w2_ref, bfc2_ref, o_ref):
    attn = _fpq(jnp.dot(ctx_ref[...], wout_ref[...],
                        preferred_element_type=jnp.float32) + bout_ref[...])
    # NOTE: the encoder-level re-quantize of `attn` is exactly idempotent on the 1/256
    # grid (values already representable in f32), so it is elided (pure VPU filler).
    x1 = _fpq(x_ref[...] + attn)
    xn2 = _layernorm(x1, g2_ref[...], bln2_ref[...])
    h = _fpq(jnp.dot(xn2, w1_ref[...],
                     preferred_element_type=jnp.float32) + bfc1_ref[...])
    h = jnp.maximum(h, 0.0)
    m = _fpq(jnp.dot(h, w2_ref[...],
                     preferred_element_type=jnp.float32) + bfc2_ref[...])
    # encoder-level re-quantize of the MLP output likewise elided (idempotent)
    o_ref[...] = _fpq(x1 + m)


# ---------------------------------------------------------------------------
# wrappers
# ---------------------------------------------------------------------------
def _ln_qkv(x2d, g, b, wqkv, bqkv):
    N, E = x2d.shape
    E3 = wqkv.shape[1]
    tm, n_pad = _tile_rows(N)
    if n_pad != N:
        x2d = jnp.pad(x2d, ((0, n_pad - N), (0, 0)))
    cost = pl.CostEstimate(
        flops=2 * n_pad * E * E3 + 8 * n_pad * E,
        transcendentals=n_pad,
        bytes_accessed=4 * (n_pad * E + 2 * E + E * E3 + E3 + n_pad * E3))
    out = pl.pallas_call(
        _ln_qkv_kernel,
        out_shape=jax.ShapeDtypeStruct((n_pad, E3), jnp.float32),
        grid=(n_pad // tm,),
        in_specs=[
            pl.BlockSpec((tm, E), lambda i: (i, 0)),
            pl.BlockSpec((1, E), lambda i: (0, 0)),
            pl.BlockSpec((1, E), lambda i: (0, 0)),
            pl.BlockSpec((E, E3), lambda i: (0, 0)),
            pl.BlockSpec((1, E3), lambda i: (0, 0)),
        ],
        out_specs=pl.BlockSpec((tm, E3), lambda i: (i, 0)),
        compiler_params=_cparams(),
        cost_estimate=cost,
    )(x2d, g, b, wqkv, bqkv)
    return out[:N] if n_pad != N else out


def _attention(qkv, num_heads):
    """qkv: [B, S, 3E] -> context [B, S, E]; heads are fused inside the kernel."""
    B, S, E3 = qkv.shape
    E = E3 // 3
    Dh = E // num_heads
    cost = pl.CostEstimate(
        flops=4 * B * num_heads * S * S * Dh,
        transcendentals=B * num_heads * S * S,
        bytes_accessed=4 * (B * S * E3 + B * S * E))
    kernel = functools.partial(_attention_kernel, num_heads=num_heads)
    # q / k / v are 512-wide column blocks (block col 0, 1, 2) of the same qkv tensor.
    return pl.pallas_call(
        kernel,
        out_shape=jax.ShapeDtypeStruct((B, S, E), jnp.float32),
        grid=(B,),
        in_specs=[
            pl.BlockSpec((None, S, E), lambda b: (b, 0, 0)),   # q: columns [0, E)
            pl.BlockSpec((None, S, E), lambda b: (b, 0, 1)),   # k: columns [E, 2E)
            pl.BlockSpec((None, S, E), lambda b: (b, 0, 2)),   # v: columns [2E, 3E)
        ],
        out_specs=pl.BlockSpec((None, S, E), lambda b: (b, 0, 0)),
        compiler_params=_cparams(),
        cost_estimate=cost,
    )(qkv, qkv, qkv)


def _proj_residual_mlp(ctx2d, x2d, wout, bout, g2, b2, w1, bfc1, w2, bfc2):
    N, E = x2d.shape
    HID = w1.shape[1]
    tm, n_pad = _tile_rows(N)
    if n_pad != N:
        pad = ((0, n_pad - N), (0, 0))
        ctx2d = jnp.pad(ctx2d, pad)
        x2d = jnp.pad(x2d, pad)
    cost = pl.CostEstimate(
        flops=2 * n_pad * (E * E + E * HID + HID * E) + 16 * n_pad * E,
        transcendentals=n_pad,
        bytes_accessed=4 * (3 * n_pad * E + E * E + E * HID + HID * E + 5 * E + HID))

    def w_spec(shape):
        return pl.BlockSpec(shape, lambda i: (0, 0))

    out = pl.pallas_call(
        _proj_residual_mlp_kernel,
        out_shape=jax.ShapeDtypeStruct((n_pad, E), jnp.float32),
        grid=(n_pad // tm,),
        in_specs=[
            pl.BlockSpec((tm, E), lambda i: (i, 0)),     # attention context
            pl.BlockSpec((tm, E), lambda i: (i, 0)),     # residual input x
            w_spec((E, E)), w_spec((1, E)),              # out_proj
            w_spec((1, E)), w_spec((1, E)),              # norm2 gamma / beta
            w_spec((E, HID)), w_spec((1, HID)),          # fc1
            w_spec((HID, E)), w_spec((1, E)),            # fc2
        ],
        out_specs=pl.BlockSpec((tm, E), lambda i: (i, 0)),
        compiler_params=_cparams(),
        cost_estimate=cost,
    )(ctx2d, x2d, wout, bout, g2, b2, w1, bfc1, w2, bfc2)
    return out[:N] if n_pad != N else out


def fixed_point_encoder_layer(x, params, num_heads):
    """x: [B, S, E] -> [B, S, E], full FixedPointTransformerEncoderLayer forward."""
    B, S, E = x.shape
    N = B * S
    x2d = x.reshape(N, E)

    # Kernel A: LayerNorm1 + QKV projection + quantize
    qkv2d = _ln_qkv(x2d, params["ln1_g"], params["ln1_b"],
                    params["wqkv"], params["bqkv"])              # [N, 3E]
    qkv = qkv2d.reshape(B, S, 3 * E)                             # contiguous, no relayout

    # Kernel B: per-batch multi-head attention (heads fused in-kernel, lane-dense output)
    ctx = _attention(qkv, num_heads)                             # [B, S, E]
    ctx2d = ctx.reshape(N, E)                                    # contiguous, no relayout

    # Kernel C: out_proj + residual + LayerNorm2 + MLP + residual (all quantized)
    out = _proj_residual_mlp(ctx2d, x2d,
                             params["wout"], params["bout"],
                             params["ln2_g"], params["ln2_b"],
                             params["w1"], params["bfc1"],
                             params["w2"], params["bfc2"])
    return out.reshape(B, S, E)


# ---------------------------------------------------------------------------
# pure-JAX reference (mirrors the PyTorch module exactly)
# ---------------------------------------------------------------------------
def reference_encoder_layer(x, params, num_heads):
    HI = jax.lax.Precision.HIGHEST
    B, S, E = x.shape
    Dh = E // num_heads

    xn = _layernorm(x, params["ln1_g"], params["ln1_b"])
    qkv = _fpq(jnp.einsum("bse,ef->bsf", xn, params["wqkv"], precision=HI)
               + params["bqkv"])
    q, k, v = qkv[..., :E], qkv[..., E:2 * E], qkv[..., 2 * E:]
    q = q.reshape(B, S, num_heads, Dh).transpose(0, 2, 1, 3)
    k = k.reshape(B, S, num_heads, Dh).transpose(0, 2, 1, 3)
    v = v.reshape(B, S, num_heads, Dh).transpose(0, 2, 1, 3)
    scores = jnp.einsum("bhqd,bhkd->bhqk", q, k, precision=HI) * (float(Dh) ** -0.5)
    p = _fpq(_softmax_lastdim(scores))
    ctx = jnp.einsum("bhqk,bhkd->bhqd", p, v, precision=HI)
    ctx = ctx.transpose(0, 2, 1, 3).reshape(B, S, E)
    attn = _fpq(jnp.einsum("bse,ef->bsf", ctx, params["wout"], precision=HI)
                + params["bout"])
    attn = _fpq(attn)
    x1 = _fpq(x + attn)
    xn2 = _layernorm(x1, params["ln2_g"], params["ln2_b"])
    h = _fpq(jnp.einsum("bse,eh->bsh", xn2, params["w1"], precision=HI)
             + params["bfc1"])
    h = jnp.maximum(h, 0.0)
    m = _fpq(jnp.einsum("bsh,he->bse", h, params["w2"], precision=HI)
             + params["bfc2"])
    m = _fpq(m)
    return _fpq(x1 + m)


if __name__ == "__main__":
    # Small demo shapes, consistent with the module constants
    # (embed_dim=512, num_heads=16, hidden_dim=256) but tiny batch/sequence.
    batch, seq_len = 2, 8
    embed_dim, num_heads, hidden_dim = 512, 16, 256

    key = jax.random.PRNGKey(0)
    keys = jax.random.split(key, 12)

    def nrm(k, shape, std):
        return std * jax.random.normal(k, shape, dtype=jnp.float32)

    x = nrm(keys[0], (batch, seq_len, embed_dim), 1.0)

    params = {
        "ln1_g": 1.0 + nrm(keys[1], (1, embed_dim), 0.05),
        "ln1_b": nrm(keys[2], (1, embed_dim), 0.05),
        # weights stored as [in, out] (transposed vs nn.Linear) for direct x @ W on MXU
        "wqkv": nrm(keys[3], (embed_dim, 3 * embed_dim), 0.03),
        "bqkv": nrm(keys[4], (1, 3 * embed_dim), 0.03),
        "wout": nrm(keys[5], (embed_dim, embed_dim), 0.03),
        "bout": nrm(keys[6], (1, embed_dim), 0.03),
        "ln2_g": 1.0 + nrm(keys[7], (1, embed_dim), 0.05),
        "ln2_b": nrm(keys[8], (1, embed_dim), 0.05),
        "w1": nrm(keys[9], (embed_dim, hidden_dim), 0.03),
        "bfc1": nrm(keys[10], (1, hidden_dim), 0.03),
        "w2": nrm(keys[11], (hidden_dim, embed_dim), 0.03),
        "bfc2": jnp.zeros((1, embed_dim), dtype=jnp.float32),
    }

    out = fixed_point_encoder_layer(x, params, num_heads)
    out = jax.block_until_ready(out)

    ref = reference_encoder_layer(x, params, num_heads)
    ref = jax.block_until_ready(ref)

    assert out.shape == (batch, seq_len, embed_dim)
    assert bool(jnp.all(jnp.isfinite(out)))

    max_err = float(jnp.max(jnp.abs(out - ref)))
    mean_err = float(jnp.mean(jnp.abs(out - ref)))
    # Allow a few fixed-point steps (1/256) of slack: MXU vs XLA f32 accumulation order
    # (plus folding 1/sqrt(Dh) into q) can flip an occasional round() boundary; real bugs
    # produce errors orders of magnitude larger.
    assert max_err <= 16.0 / SCALE, f"max |err| {max_err} too large"
    assert mean_err <= 3.0 / SCALE, f"mean |err| {mean_err} too large"

    print("KERNEL_OK")
</pallas_src>

<mosaic_0001>
module attributes {stable_mosaic.version = 11 : i64} {
  func.func @_ln_qkv_kernel(%arg0: i32, %arg1: memref<8x512xf32, #tpu.memory_space<vmem>>, %arg2: memref<1x512xf32, #tpu.memory_space<vmem>>, %arg3: memref<1x512xf32, #tpu.memory_space<vmem>>, %arg4: memref<512x1536xf32, #tpu.memory_space<vmem>>, %arg5: memref<1x1536xf32, #tpu.memory_space<vmem>>, %arg6: memref<8x1536xf32, #tpu.memory_space<vmem>>) attributes {dimension_semantics = [#tpu.dimension_semantics<parallel>], iteration_bounds = array<i64: 2>, scalar_prefetch = 0 : i64, scratch_operands = 0 : i64, tpu.core_type = #tpu.core_type<tc>, window_params = [{transform_indices = @transform_0, window_bounds = array<i64: 8, 512>}, {pipeline_mode = #tpu.pipeline_mode<synchronous>, transform_indices = @transform_1, window_bounds = array<i64: 1, 512>}, {pipeline_mode = #tpu.pipeline_mode<synchronous>, transform_indices = @transform_2, window_bounds = array<i64: 1, 512>}, {pipeline_mode = #tpu.pipeline_mode<synchronous>, transform_indices = @transform_3, window_bounds = array<i64: 512, 1536>}, {pipeline_mode = #tpu.pipeline_mode<synchronous>, transform_indices = @transform_4, window_bounds = array<i64: 1, 1536>}, {transform_indices = @transform_5, window_bounds = array<i64: 8, 1536>}]} {
    %c0 = arith.constant 0 : index
    %c0_0 = arith.constant 0 : index
    %0 = vector.load %arg1[%c0, %c0_0] : memref<8x512xf32, #tpu.memory_space<vmem>>, vector<8x512xf32>
    %c0_1 = arith.constant 0 : index
    %c0_2 = arith.constant 0 : index
    %1 = vector.load %arg2[%c0_1, %c0_2] : memref<1x512xf32, #tpu.memory_space<vmem>>, vector<1x512xf32>
    %c0_3 = arith.constant 0 : index
    %c0_4 = arith.constant 0 : index
    %2 = vector.load %arg3[%c0_3, %c0_4] : memref<1x512xf32, #tpu.memory_space<vmem>>, vector<1x512xf32>
    %cst = arith.constant dense<0.000000e+00> : vector<8xf32>
    %3 = vector.multi_reduction <add>, %0, %cst [1] : vector<8x512xf32> to vector<8xf32>
    %4 = vector.shape_cast %3 : vector<8xf32> to vector<8x1xf32>
    %cst_5 = arith.constant 5.120000e+02 : f32
    %5 = vector.broadcast %cst_5 : f32 to vector<8x1xf32>
    %6 = arith.divf %4, %5 : vector<8x1xf32>
    %7 = vector.broadcast %6 : vector<8x1xf32> to vector<8x512xf32>
    %8 = arith.subf %0, %7 : vector<8x512xf32>
    %9 = arith.mulf %8, %8 : vector<8x512xf32>
    %cst_6 = arith.constant dense<0.000000e+00> : vector<8xf32>
    %10 = vector.multi_reduction <add>, %9, %cst_6 [1] : vector<8x512xf32> to vector<8xf32>
    %11 = vector.shape_cast %10 : vector<8xf32> to vector<8x1xf32>
    %cst_7 = arith.constant 5.120000e+02 : f32
    %12 = vector.broadcast %cst_7 : f32 to vector<8x1xf32>
    %13 = arith.divf %11, %12 : vector<8x1xf32>
    %cst_8 = arith.constant 9.99999974E-6 : f32
    %14 = vector.broadcast %cst_8 : f32 to vector<8x1xf32>
    %15 = arith.addf %13, %14 : vector<8x1xf32>
    %16 = math.rsqrt %15 : vector<8x1xf32>
    %17 = vector.broadcast %16 : vector<8x1xf32> to vector<8x512xf32>
    %18 = arith.mulf %8, %17 : vector<8x512xf32>
    %19 = vector.broadcast %1 : vector<1x512xf32> to vector<8x512xf32>
    %20 = arith.mulf %18, %19 : vector<8x512xf32>
    %21 = vector.broadcast %2 : vector<1x512xf32> to vector<8x512xf32>
    %22 = arith.addf %20, %21 : vector<8x512xf32>
    %c0_9 = arith.constant 0 : index
    %c0_10 = arith.constant 0 : index
    %23 = vector.load %arg4[%c0_9, %c0_10] : memref<512x1536xf32, #tpu.memory_space<vmem>>, vector<512x1536xf32>
    %cst_11 = arith.constant dense<0.000000e+00> : vector<8x1536xf32>
    %24 = tpu.matmul %22, %23, %cst_11 {dimension_numbers = #tpu.dot_dimension_numbers<[1], [0], [0], [1], [0, 0, 1, 1], [], []>} : vector<8x512xf32>, vector<512x1536xf32>, vector<8x1536xf32> -> vector<8x1536xf32>
    %c0_12 = arith.constant 0 : index
    %c0_13 = arith.constant 0 : index
    %25 = vector.load %arg5[%c0_12, %c0_13] : memref<1x1536xf32, #tpu.memory_space<vmem>>, vector<1x1536xf32>
    %26 = vector.broadcast %25 : vector<1x1536xf32> to vector<8x1536xf32>
    %27 = arith.addf %24, %26 : vector<8x1536xf32>
    %cst_14 = arith.constant 2.560000e+02 : f32
    %28 = vector.broadcast %cst_14 : f32 to vector<8x1536xf32>
    %29 = arith.mulf %27, %28 : vector<8x1536xf32>
    %30 = math.roundeven %29 : vector<8x1536xf32>
    %cst_15 = arith.constant -3.276800e+04 : f32
    %cst_16 = arith.constant 3.276700e+04 : f32
    %31 = vector.broadcast %cst_15 : f32 to vector<8x1536xf32>
    %32 = arith.maximumf %31, %30 : vector<8x1536xf32>
    %33 = vector.broadcast %cst_16 : f32 to vector<8x1536xf32>
    %34 = arith.minimumf %33, %32 : vector<8x1536xf32>
    %cst_17 = arith.constant 3.906250e-03 : f32
    %35 = vector.broadcast %cst_17 : f32 to vector<8x1536xf32>
    %36 = arith.mulf %34, %35 : vector<8x1536xf32>
    %c0_18 = arith.constant 0 : index
    %c0_19 = arith.constant 0 : index
    %37 = vector.load %arg6[%c0_18, %c0_19] : memref<8x1536xf32, #tpu.memory_space<vmem>>, vector<8x1536xf32>
    tpu.vector_store %arg6[%c0_18, %c0_19], %36 {strides = array<i32>} : memref<8x1536xf32, #tpu.memory_space<vmem>>, vector<8x1536xf32>,
    return
  }
  func.func @transform_0(%arg0: i32) -> (i32, i32) {
    %c0_i32 = arith.constant 0 : i32
    %c0_i32_0 = arith.constant 0 : i32
    return %arg0, %c0_i32 : i32, i32
  }
  func.func @transform_1(%arg0: i32) -> (i32, i32) {
    %c0_i32 = arith.constant 0 : i32
    %c0_i32_0 = arith.constant 0 : i32
    %c0_i32_1 = arith.constant 0 : i32
    return %c0_i32, %c0_i32_0 : i32, i32
  }
  func.func @transform_2(%arg0: i32) -> (i32, i32) {
    %c0_i32 = arith.constant 0 : i32
    %c0_i32_0 = arith.constant 0 : i32
    %c0_i32_1 = arith.constant 0 : i32
    return %c0_i32, %c0_i32_0 : i32, i32
  }
  func.func @transform_3(%arg0: i32) -> (i32, i32) {
    %c0_i32 = arith.constant 0 : i32
    %c0_i32_0 = arith.constant 0 : i32
    %c0_i32_1 = arith.constant 0 : i32
    return %c0_i32, %c0_i32_0 : i32, i32
  }
  func.func @transform_4(%arg0: i32) -> (i32, i32) {
    %c0_i32 = arith.constant 0 : i32
    %c0_i32_0 = arith.constant 0 : i32
    %c0_i32_1 = arith.constant 0 : i32
    return %c0_i32, %c0_i32_0 : i32, i32
  }
  func.func @transform_5(%arg0: i32) -> (i32, i32) {
    %c0_i32 = arith.constant 0 : i32
    %c0_i32_0 = arith.constant 0 : i32
    return %arg0, %c0_i32 : i32, i32
  }
}

</mosaic_0001>

<bundles_post_ra>
// kernel: tpu_custom_call.1
= control target key start
LH: loop header
LB: loop body
LE: loop exit
PB: predicated region body
PF: predicated region fallthrough
CT: control target
= control target key end

     0   :  { %10 = vsyncpa [#allocation3], 0  ;;  %s3831_s0 = inlined_call_operand.hbm [shape: f32[16,512], index: 0, kind: input, shape index: {}]   ;;  %s3832_s1 = inlined_call_operand.hbm [shape: f32[1,512], index: 1, kind: input, shape index: {}]   ;;  %s3833_s2 = inlined_call_operand.hbm [shape: f32[1,512], index: 2, kind: input, shape index: {}]   ;;  %s3834_s3 = inlined_call_operand.hbm [shape: f32[512,1536], index: 3, kind: input, shape index: {}]   ;;  %s3835_s4 = inlined_call_operand.hbm [shape: f32[1,1536], index: 4, kind: input, shape index: {}]   ;;  %s3836_s5 = inlined_call_operand.hbm [shape: f32[16,1536], index: 5, kind: output, shape index: {}]  }
   0x1   :  { %12 = vsyncpa [#allocation3 + $0x1], 0 }
   0x2   :  { %13 = vsyncpa [#allocation6], 0 }
   0x3   :  { %14 = vsyncpa [#allocation9], 0 }
   0x4   :  { %15 = vsyncpa [#allocation4], 0 }
   0x5   :  { %17 = vsyncpa [#allocation4 + $0x1], 0  ;;  %s3428_s18 = smov 0   ;;  %s3430_s19 = smov 0  }
   0x6   :  { %s3432_s20 = smov 0   ;;  %s3434_s21 = smov 0  }
   0x7 LB: > { %s3390_s22 = smov [#allocation5]   ;;  %s3449_s24 = sadd.s32 4294967295, %s3388_s21   ;;  %s3388_s21 = sphi %s3434_s21, %s3860_s21   ;;  %s3384_s20 = sphi %s3432_s20, %s3859_s20   ;;  %s3380_s19 = sphi %s3430_s19, %s3858_s19   ;;  %s3376_s18 = sphi %s3428_s18, %s3857_s18  }
   0x8   : > { %s177_s23 = sshll.u32 %s3390_s22, 4  ;;  %p2256_p0 = scmp.ge.s32.totalorder %s3388_s21, 1  ;;  %s178_s23 = int_to_ptr.vmem [resolvable:$true] %s177_s23 }
   0x9   : > { %p3837_p1 = scmp.eq.s32.totalorder %s3449_s24, 0  ;;  %p164_p2 = scmp.lt.s32.totalorder %s3388_s21, 3 }
   0xa   : > { %s3391_s26 = smov [#allocation8]   ;;  %s3392_s29 = smov [#allocation7]  }
   0xb   : > { %p3454_p3 = pnand %p2256_p0, %p164_p2  ;;  %s198_s27 = sshll.u32 %s3391_s26, 4  ;;  %s3461_s27 = int_to_ptr.vmem [resolvable:$true] %s198_s27 }
   0xc   : > { %s188_s30 = sshll.u32 %s3392_s29, 4  ;;  %s3172_s8 = scalar_lea.hbm %s3832_s1, 64  ;;  %s3469_s30 = int_to_ptr.vmem [resolvable:$true] %s188_s30 }
   0xd   : > { %s3840_s25 = scalar_select %p3454_p3, 1, 0 }
   0xe   : > { %p3101_p5 = pneg %p3454_p3  ;;  %p3173_p7 = scmp.ne.s32.totalorder %s3832_s1, %s3172_s8 }
   0xf   : > { %p3179_p11 = scmp.lt.u32.totalorder %s3172_s8, %s3832_s1 }
  0x10   : > { %p3465_p6 = pnand %p3101_p5, %p3837_p1 }
  0x12   : > { %p3479_p8 = pneg %p3465_p6 }
  0x14   : > { %p3175_p9 = pnand %p3479_p8, %p3173_p7 }
  0x16   : > { %p3176_p10 = pneg %p3175_p9 }
  0x18   : > { %p3181_p12 = pnand %p3179_p11, %p3176_p10 }
  0x1a   : > { %3184 = shalt.err (!%p3181_p12)
}
  0x1b   : > { %s3185_s14 = scalar_lea.vmem %s178_s23, 64  ;;  %p3193_p5 = scmp.lt.s32.totalorder %s178_s23, %s178_s23 }
  0x1c   : > { %p3186_p13 = scmp.ne.s32.totalorder %s178_s23, %s3185_s14  ;;  %p3194_p4 = scmp.lt.s32.totalorder %s3185_s14, %s3185_s14 }
  0x1e   : > { %p3188_p0 = pnand %p3186_p13, %p3479_p8  ;;  %p3195_p1 = por %p3194_p4, %p3193_p5 }
  0x20   : > { %p3189_p2 = pneg %p3188_p0 }
  0x22   : > { %p3196_p3 = pnand %p3195_p1, %p3189_p2 }
  0x24   : > { %3199 = shalt.err (!%p3196_p3)
}
  0x25   : > { %3104 = dma.hbm_to_vmem [thread:$0]  (!%p3465_p6), %s3832_s1, 64, %s178_s23, [#allocation6]  }
  0x26   : > { %s3200_s26 = scalar_lea.hbm %s3834_s3, 98304 }
  0x27   : > { %p3201_p7 = scmp.ne.s32.totalorder %s3834_s3, %s3200_s26  ;;  %p3207_p1 = scmp.lt.u32.totalorder %s3200_s26, %s3834_s3 }
  0x29   : > { %p3203_p9 = pnand %p3201_p7, %p3479_p8 }
  0x2b   : > { %p3204_p4 = pneg %p3203_p9 }
  0x2d   : > { %p3209_p3 = pnand %p3207_p1, %p3204_p4 }
  0x2f   : > { %3212 = shalt.err (!%p3209_p3)
}
  0x30   : > { %s3213_s23 = scalar_lea.vmem %s3461_s27, 98304  ;;  %p3221_p13 = scmp.lt.s32.totalorder %s3461_s27, %s3461_s27 }
  0x31   : > { %p3214_p10 = scmp.ne.s32.totalorder %s3461_s27, %s3213_s23  ;;  %p3222_p0 = scmp.lt.s32.totalorder %s3213_s23, %s3213_s23 }
  0x33   : > { %p3216_p11 = pnand %p3214_p10, %p3479_p8  ;;  %p3223_p2 = por %p3222_p0, %p3221_p13 }
  0x35   : > { %p3217_p12 = pneg %p3216_p11 }
  0x37   : > { %p3224_p5 = pnand %p3223_p2, %p3217_p12 }
  0x39   : > { %3227 = shalt.err (!%p3224_p5)
}
  0x3a   : > { %s3393_s9 = smov 1536   ;;  %s3394_s10 = smov 96  }
  0x3b   : > { %3110 = dma.hbm_to_vmem [thread:$0]  (!%p3465_p6), %s3834_s3, 98304, %s3461_s27, [#allocation9], %s3393_s9, %s3393_s9, %s3394_s10  }
  0x3c   : > { %s3228_s16 = scalar_lea.hbm %s3833_s2, 64 }
  0x3d   : > { %p3229_p7 = scmp.ne.s32.totalorder %s3833_s2, %s3228_s16  ;;  %p3235_p1 = scmp.lt.u32.totalorder %s3228_s16, %s3833_s2 }
  0x3f   : > { %p3231_p9 = pnand %p3229_p7, %p3479_p8 }
  0x41   : > { %p3232_p4 = pneg %p3231_p9 }
  0x43   : > { %p3237_p3 = pnand %p3235_p1, %p3232_p4 }
  0x45   : > { %3240 = shalt.err (!%p3237_p3)
}
  0x46   : > { %s3241_s27 = scalar_lea.vmem %s3469_s30, 64  ;;  %p3249_p13 = scmp.lt.s32.totalorder %s3469_s30, %s3469_s30 }
  0x47   : > { %p3242_p10 = scmp.ne.s32.totalorder %s3469_s30, %s3241_s27  ;;  %p3250_p0 = scmp.lt.s32.totalorder %s3241_s27, %s3241_s27 }
  0x49   : > { %p3244_p11 = pnand %p3242_p10, %p3479_p8  ;;  %p3251_p2 = por %p3250_p0, %p3249_p13 }
  0x4b   : > { %p3245_p12 = pneg %p3244_p11 }
  0x4d   : > { %p3252_p5 = pnand %p3251_p2, %p3245_p12 }
  0x4f   : > { %3255 = shalt.err (!%p3252_p5)
}
  0x50   : > { %3107 = dma.hbm_to_vmem [thread:$0]  (!%p3465_p6), %s3833_s2, 64, %s3469_s30, [#allocation6]  }
  0x51   : > { %s3395_s8 = smov [#allocation10]   ;;  %s3256_s12 = scalar_lea.hbm %s3835_s4, 192 }
  0x52   : > { %s212_s23 = sshll.u32 %s3395_s8, 4  ;;  %p3257_p7 = scmp.ne.s32.totalorder %s3835_s4, %s3256_s12  ;;  %s213_s23 = int_to_ptr.vmem [resolvable:$true] %s212_s23 }
  0x53   : > { %p3263_p1 = scmp.lt.u32.totalorder %s3256_s12, %s3835_s4 }
  0x54   : > { %p3259_p9 = pnand %p3257_p7, %p3479_p8 }
  0x56   : > { %p3260_p4 = pneg %p3259_p9 }
  0x58   : > { %p3265_p3 = pnand %p3263_p1, %p3260_p4 }
  0x5a   : > { %3268 = shalt.err (!%p3265_p3)
}
  0x5b   : > { %s3269_s30 = scalar_lea.vmem %s213_s23, 192  ;;  %p3277_p13 = scmp.lt.s32.totalorder %s213_s23, %s213_s23 }
  0x5c   : > { %p3270_p10 = scmp.ne.s32.totalorder %s213_s23, %s3269_s30  ;;  %p3278_p0 = scmp.lt.s32.totalorder %s3269_s30, %s3269_s30 }
  0x5e   : > { %p3272_p11 = pnand %p3270_p10, %p3479_p8  ;;  %p3279_p2 = por %p3278_p0, %p3277_p13 }
  0x60   : > { %p3273_p12 = pneg %p3272_p11 }
  0x62   : > { %p3280_p5 = pnand %p3279_p2, %p3273_p12 }
  0x64   : > { %3283 = shalt.err (!%p3280_p5)
}
  0x65   : > { %3113 = dma.hbm_to_vmem [thread:$0]  (!%p3465_p6), %s3835_s4, 192, %s213_s23, [#allocation9]  }
  0x66   : > { %s2255_s11 = sadd.s32 4294967294, %s3388_s21   ;;  %s3561_s28 = sadd.s32 1, %s3388_s21  }
  0x67   : > { %s27_s26 = ssub.s32 %s3388_s21, %s3561_s28  ;;  %s30_s29 = sadd.s32 1, %s3384_s20 }
  0x68   : > { %p28_p8 = scmp.eq.s32.totalorder %s27_s26, 0  ;;  %p37_p7 = scmp.ne.s32.totalorder %s3384_s20, %s3380_s19 }
  0x69   : > { %p38_p9 = scmp.eq.s32.totalorder %s3388_s21, 0  ;;  %p43_p4 = scmp.ne.s32.totalorder %s3380_s19, %s3376_s18 }
  0x6a   : > { %s3572_s27 = scalar_select %p28_p8, %s3384_s20, %s30_s29  }
  0x6b   : > { %p3574_p1 = por %p38_p9, %p37_p7  ;;  %p3844_p3 = scmp.eq.s32.totalorder %s3449_s24, 0 }
  0x6c   : > { %p151_p10 = scmp.eq.s32.totalorder %s3449_s24, 1  ;;  %p157_p11 = scmp.eq.s32.totalorder %s2255_s11, 1 }
  0x6d   : > { %p3580_p6 = por %p3844_p3, %p43_p4  ;;  %p3126_p12 = scmp.lt.s32.totalorder %s3388_s21, 2 }
  0x6e   : > { %s223_s8 = sand.u32 1, %s3384_s20   ;;  %p3587_p13 = por %p151_p10, %p37_p7 }
  0x6f   : > { %p3591_p0 = por %p157_p11, %p43_p4  ;;  %s2262_s10 = sshll.u32 %s223_s8, 5 }
  0x70   : > { %s3846_s23 = scalar_select %p3587_p13, 1, 0 }
  0x71   : > { %s3847_s9 = scalar_select %p3591_p0, 1, 0 }
  0x72   : > { %s2274_s12 = sshll.u32 %s3388_s21, 9  ;;  %s227_s16 = scalar_lea.vmem [#allocation2], %s2262_s10 }
  0x73   : > { %s3599_s15 = scalar_lea.hbm %s3831_s0, %s2274_s12  ;;  %s235_s30 = sshll.u32 %s227_s16, 4  ;;  %s3601_s30 = int_to_ptr.vmem [resolvable:$true] %s235_s30 }
  0x74   : > { %p3605_p2 = pnand %p3126_p12, %p3574_p1  ;;  %s224_s22 = scalar_lea.sflag [#allocation3], %s223_s8 }
  0x75   : > { %s3284_s11 = scalar_lea.hbm %s3599_s15, 512  ;;  %s3289_s10 = scalar_lea.hbm %s3831_s0, 1024 }
  0x76   : > { %p3285_p5 = scmp.ne.s32.totalorder %s3599_s15, %s3284_s11  ;;  %p3286_p8 = pneg %p3605_p2 }
  0x77   : > { %p3290_p4 = scmp.lt.u32.totalorder %s3599_s15, %s3831_s0  ;;  %p3291_p1 = scmp.lt.u32.totalorder %s3289_s10, %s3284_s11 }
  0x78   : > { %p3287_p7 = pnand %p3286_p8, %p3285_p5  ;;  %p3293_p10 = scmp.lt.u32.totalorder %s3284_s11, %s3599_s15 }
  0x79   : > { %p3292_p3 = por %p3291_p1, %p3290_p4 }
  0x7a   : > { %p3288_p9 = pneg %p3287_p7 }
  0x7b   : > { %p3294_p11 = por %p3293_p10, %p3292_p3 }
  0x7d   : > { %p3295_p12 = pnand %p3294_p11, %p3288_p9 }
  0x7f   : > { %3298 = shalt.err (!%p3295_p12)
}
  0x80   : > { %s3299_s8 = scalar_lea.vmem %s3601_s30, 512  ;;  %s3396_s13 = smov [#allocation2]  }
  0x81   : > { %p3300_p5 = scmp.ne.s32.totalorder %s3601_s30, %s3299_s8  ;;  %s3304_s14 = sshll.u32 %s3396_s13, 4  ;;  %s3305_s14 = int_to_ptr.vmem [resolvable:$false] %s3304_s14 }
  0x82   : > { %s3306_s16 = scalar_lea.vmem %s3305_s14, 1024  ;;  %p3307_p13 = scmp.lt.s32.totalorder %s3601_s30, %s3305_s14 }
  0x83   : > { %p3302_p7 = pnand %p3300_p5, %p3286_p8  ;;  %p3308_p4 = scmp.lt.s32.totalorder %s3306_s16, %s3299_s8 }
  0x85   : > { %p3303_p0 = pneg %p3302_p7  ;;  %p3309_p1 = por %p3308_p4, %p3307_p13 }
  0x87   : > { %p3310_p3 = pnand %p3309_p1, %p3303_p0 }
  0x89   : > { %3313 = shalt.err (!%p3310_p3)
}
  0x8a   : > { %3117 = dma.hbm_to_vmem [thread:$0]  (!%p3605_p2), %s3599_s15, 512, %s3601_s30, %s224_s22  }
  0x8b   : > { %p3849_p9 = scmp.ne.s32.totalorder %s3840_s25, 0 }
  0x8c   : > { %s3637_s11 = sand.u32 (!%p3849_p9), 1, %s3380_s19  }
  0x8d   : > { %244 = sbr.rel (%p3849_p9) target bundleno = 1041 (0x411), region = 40  ;;  %s2266_s26 = sshll.u32 (!%p3849_p9), %s3637_s11, 5 }
  0x8e   : > { %s247_s29 = scalar_lea.sflag (!%p3849_p9), [#allocation3], %s3637_s11  ;;  %s250_s10 = scalar_lea.vmem (!%p3849_p9), [#allocation2], %s2266_s26 }
  0x94   : > { %3359 = dma.done.wait (%p3580_p6), %s247_s29, 512  }
  0x95   : > { %3361 = vsyncadd (%p3580_p6), %s247_s29, 4294966784  ;;  %p3850_p13 = scmp.eq.s32.totalorder %s3449_s24, 0 }
  0x97   : > { %3363 = dma.done.wait (%p3850_p13), [#allocation6], 128   ;;  %p3851_p0 = pmov %p3850_p13 }
  0x99   : > { %3365 = vsyncadd (%p3851_p0), [#allocation6], 4294967168  ;;  %p3852_p2 = pmov %p3851_p0 }
  0x9a   : > { %p3853_p8 = pmov %p3851_p0 }
  0x9b   : > { %3367 = dma.done.wait (%p3852_p2), [#allocation9], 98496  }
  0x9c   : > { %3369 = vsyncadd (%p3853_p8), [#allocation9], 4294868800  ;;  %v3653_v0 = vld [vmem:[%s250_s10] sm:$0xff]  ;;  %v3655_v1 = vld [vmem:[%s250_s10 + $0x8] sm:$0xff]  ;;  %s3067_s25 = smul.u32 96, %s3637_s11  ;;  %p3854_p10 = scmp.ne.s32.totalorder %s3846_s23, 0 }
  0x9d   : > { %v3657_v2 = vld [vmem:[%s250_s10 + $0x10] sm:$0xff]  ;;  %v299_v3 = vadd.f32 %v3655_v1, %v3653_v0  ;;  %v3661_v4 = vld [vmem:[%s250_s10 + $0x18] sm:$0xff]  ;;  %v379_v9 = vld [vmem:[#allocation8 + $0x18] sm:$0xff]  ;;  %s3080_s15 = smul.u32 1536, %s3449_s24  ;;  %s2133_s24 = scalar_lea.sflag [#allocation4], %s3637_s11 }
  0x9e   : > { %v377_v7 = vld [vmem:[#allocation8 + $0x8] sm:$0xff]  ;;  %v391_v11 = vld [vmem:[#allocation8 + $0x78] sm:$0xff]  ;;  %v376_v12 = vld [vmem:[#allocation8] sm:$0xff]  ;;  %s3754_s7 = scalar_lea.vmem [#allocation11], %s3067_s25  ;;  %s3397_s8 = smov [#allocation11]  }
  0x9f   : > { %v300_v5 = vadd.f32 %v299_v3, %v3657_v2  ;;  %v389_v8 = vld [vmem:[#allocation8 + $0x68] sm:$0xff]  ;;  %v388_v13 = vld [vmem:[#allocation8 + $0x60] sm:$0xff]  ;;  %v2403_v14 = vpack.c.bf16 %v391_v11, %v379_v9  ;;  %v378_v16 = vld [vmem:[#allocation8 + $0x10] sm:$0xff]  ;;  %s2147_s30 = sshll.u32 %s3754_s7, 4  ;;  %s3784_s6 = scalar_lea.hbm %s3836_s5, %s3080_s15  ;;  %s3786_s30 = int_to_ptr.vmem [resolvable:$true] %s2147_s30 }
  0xa0   : > { %v2275_v10 = vpack.c.bf16 %v389_v8, %v377_v7  ;;  %v2277_v15 = vpack.c.bf16 %v388_v13, %v376_v12  ;;  %v390_v17 = vld [vmem:[#allocation8 + $0x70] sm:$0xff]  ;;  %v401_v18 = vld [vmem:[#allocation8 + $0xc8] sm:$0xff]  ;;  %v403_v21 = vld [vmem:[#allocation8 + $0xd8] sm:$0xff]  ;;  %s3314_s12 = scalar_lea.vmem %s3786_s30, 1536  ;;  %s3318_s13 = sshll.u32 %s3397_s8, 4  ;;  %s3319_s13 = int_to_ptr.vmem [resolvable:$false] %s3318_s13 }
  0xa1   : > { %v301_v6 = vadd.f32 %v300_v5, %v3661_v4  ;;  %v2405_v19 = vpack.c.bf16 %v390_v17, %v378_v16  ;;  %v413_v20 = vld [vmem:[#allocation8 + $0x128] sm:$0xff]  ;;  %v415_v22 = vld [vmem:[#allocation8 + $0x138] sm:$0xff]  ;;  %2404 = vmatprep.subr.bf16.mxu1 %v2403_v14  ;;  %v400_v25 = vld [vmem:[#allocation8 + $0xc0] sm:$0xff]  ;;  %p3315_p6 = scmp.ne.s32.totalorder %s3786_s30, %s3314_s12  ;;  %s3320_s14 = scalar_lea.vmem %s3319_s13, 3072 }
  0xa2   : > { %2276 = vmatprep.subr.bf16.mxu0 %v2275_v10  ;;  %v2279_v23 = vpack.c.bf16 %v413_v20, %v401_v18  ;;  %v2407_v24 = vpack.c.bf16 %v415_v22, %v403_v21  ;;  %v412_v26 = vld [vmem:[#allocation8 + $0x120] sm:$0xff]  ;;  %v402_v27 = vld [vmem:[#allocation8 + $0xd0] sm:$0xff]  ;;  %v425_v30 = vld [vmem:[#allocation8 + $0x188] sm:$0xff]  ;;  %p3321_p5 = scmp.lt.s32.totalorder %s3786_s30, %s3319_s13  ;;  %p3322_p7 = scmp.lt.s32.totalorder %s3320_s14, %s3314_s12 }
  0xa3   : > { %302 = vadd.xlane.f32.xlu0 %v301_v6  ;;  %2278 = vmatpush1.bf16.msra.mxu0 %v2277_v15  ;;  %v2281_v28 = vpack.c.bf16 %v412_v26, %v400_v25  ;;  %v414_v29 = vld [vmem:[#allocation8 + $0x130] sm:$0xff]  ;;  %v437_v31 = vld [vmem:[#allocation8 + $0x1e8] sm:$0xff]  ;;  %v427_v34 = vld [vmem:[#allocation8 + $0x198] sm:$0xff]  ;;  %p3316_p11 = pnand %p3315_p6, %p3854_p10 }
  0xa4   : > { %2406 = vmatpush1.bf16.msra.mxu1 %v2405_v19  ;;  %2280 = vmatprep.subr.bf16.mxu0 %v2279_v23  ;;  %v2409_v32 = vpack.c.bf16 %v414_v29, %v402_v27  ;;  %v2283_v33 = vpack.c.bf16 %v437_v31, %v425_v30  ;;  %v439_v35 = vld [vmem:[#allocation8 + $0x1f8] sm:$0xff]  ;;  %v424_v36 = vld [vmem:[#allocation8 + $0x180] sm:$0xff]  ;;  %v426_v39 = vld [vmem:[#allocation8 + $0x190] sm:$0xff]  ;;  %p3323_p4 = por %p3322_p7, %p3321_p5 }
  0xa5   : > { %2408 = vmatprep.subr.bf16.mxu1 %v2407_v24  ;;  %v2411_v37 = vpack.c.bf16 %v439_v35, %v427_v34  ;;  %v436_v38 = vld [vmem:[#allocation8 + $0x1e0] sm:$0xff]  ;;  %v438_v40 = vld [vmem:[#allocation8 + $0x1f0] sm:$0xff]  ;;  %v449_v42 = vld [vmem:[#allocation8 + $0x248] sm:$0xff]  ;;  %p3317_p12 = pneg %p3316_p11 }
  0xa6   : > { %v2285_v41 = vpack.c.bf16 %v436_v38, %v424_v36  ;;  %v461_v43 = vld [vmem:[#allocation8 + $0x2a8] sm:$0xff]  ;;  %v451_v44 = vld [vmem:[#allocation8 + $0x258] sm:$0xff]  ;;  %v2413_v45 = vpack.c.bf16 %v438_v40, %v426_v39  ;;  %v448_v48 = vld [vmem:[#allocation8 + $0x240] sm:$0xff] }
  0xa7   : > { %2282 = vmatpush1.bf16.msra.mxu0 %v2281_v28  ;;  %v2287_v46 = vpack.c.bf16 %v461_v43, %v449_v42  ;;  %v463_v47 = vld [vmem:[#allocation8 + $0x2b8] sm:$0xff]  ;;  %v460_v49 = vld [vmem:[#allocation8 + $0x2a0] sm:$0xff]  ;;  %v450_v51 = vld [vmem:[#allocation8 + $0x250] sm:$0xff]  ;;  %p3324_p1 = pnand %p3323_p4, %p3317_p12 }
  0xa8   : > { %2410 = vmatpush1.bf16.msra.mxu1 %v2409_v32  ;;  %2284 = vmatprep.subr.bf16.mxu0 %v2283_v33  ;;  %v2415_v50 = vpack.c.bf16 %v463_v47, %v451_v44  ;;  %v462_v52 = vld [vmem:[#allocation8 + $0x2b0] sm:$0xff]  ;;  %v473_v53 = vld [vmem:[#allocation8 + $0x308] sm:$0xff]  ;;  %v475_v55 = vld [vmem:[#allocation8 + $0x318] sm:$0xff]  ;;  %v2289_v57 = vpack.c.bf16 %v460_v49, %v448_v48 }
  0xa9   : > { %2412 = vmatprep.subr.bf16.mxu1 %v2411_v37  ;;  %v485_v54 = vld [vmem:[#allocation8 + $0x368] sm:$0xff]  ;;  %v487_v56 = vld [vmem:[#allocation8 + $0x378] sm:$0xff]  ;;  %v2417_v58 = vpack.c.bf16 %v462_v52, %v450_v51  ;;  %v472_v60 = vld [vmem:[#allocation8 + $0x300] sm:$0xff] }
  0xaa   : > { %v2291_v59 = vpack.c.bf16 %v485_v54, %v473_v53  ;;  %v484_v61 = vld [vmem:[#allocation8 + $0x360] sm:$0xff]  ;;  %v474_v62 = vld [vmem:[#allocation8 + $0x310] sm:$0xff]  ;;  %v2419_v63 = vpack.c.bf16 %v487_v56, %v475_v55  ;;  %v497_v5 = vld [vmem:[#allocation8 + $0x3c8] sm:$0xff] }
  0xab   : > { %2286 = vmatpush1.bf16.msra.mxu0 %v2285_v41  ;;  %v486_v3 = vld [vmem:[#allocation8 + $0x370] sm:$0xff]  ;;  %v509_v6 = vld [vmem:[#allocation8 + $0x428] sm:$0xff]  ;;  %v499_v7 = vld [vmem:[#allocation8 + $0x3d8] sm:$0xff]  ;;  %v2293_v9 = vpack.c.bf16 %v484_v61, %v472_v60 }
  0xac   : > { %2414 = vmatpush1.bf16.msra.mxu1 %v2413_v45  ;;  %2288 = vmatprep.subr.bf16.mxu0 %v2287_v46  ;;  %v511_v8 = vld [vmem:[#allocation8 + $0x438] sm:$0xff]  ;;  %v2421_v10 = vpack.c.bf16 %v486_v3, %v474_v62  ;;  %v2295_v11 = vpack.c.bf16 %v509_v6, %v497_v5  ;;  %v496_v12 = vld [vmem:[#allocation8 + $0x3c0] sm:$0xff]  ;;  %v498_v14 = vld [vmem:[#allocation8 + $0x3d0] sm:$0xff] }
  0xad   : > { %2416 = vmatprep.subr.bf16.mxu1 %v2415_v50  ;;  %v508_v13 = vld [vmem:[#allocation8 + $0x420] sm:$0xff]  ;;  %v2423_v15 = vpack.c.bf16 %v511_v8, %v499_v7  ;;  %v510_v16 = vld [vmem:[#allocation8 + $0x430] sm:$0xff]  ;;  %v521_v17 = vld [vmem:[#allocation8 + $0x488] sm:$0xff] }
  0xae   : > { %v533_v18 = vld [vmem:[#allocation8 + $0x4e8] sm:$0xff]  ;;  %v523_v19 = vld [vmem:[#allocation8 + $0x498] sm:$0xff]  ;;  %v2297_v21 = vpack.c.bf16 %v508_v13, %v496_v12  ;;  %v2425_v22 = vpack.c.bf16 %v510_v16, %v498_v14  ;;  %v520_v24 = vld [vmem:[#allocation8 + $0x480] sm:$0xff] }
  0xaf   : > { %2290 = vmatpush1.bf16.msra.mxu0 %v2289_v57  ;;  %v535_v20 = vld [vmem:[#allocation8 + $0x4f8] sm:$0xff]  ;;  %v2299_v23 = vpack.c.bf16 %v533_v18, %v521_v17  ;;  %v532_v25 = vld [vmem:[#allocation8 + $0x4e0] sm:$0xff]  ;;  %v522_v26 = vld [vmem:[#allocation8 + $0x490] sm:$0xff] }
  0xb0   : > { %2418 = vmatpush1.bf16.msra.mxu1 %v2417_v58  ;;  %2292 = vmatprep.subr.bf16.mxu0 %v2291_v59  ;;  %v2427_v27 = vpack.c.bf16 %v535_v20, %v523_v19  ;;  %v534_v28 = vld [vmem:[#allocation8 + $0x4f0] sm:$0xff]  ;;  %v545_v29 = vld [vmem:[#allocation8 + $0x548] sm:$0xff]  ;;  %v547_v31 = vld [vmem:[#allocation8 + $0x558] sm:$0xff]  ;;  %v2301_v33 = vpack.c.bf16 %v532_v25, %v520_v24 }
  0xb1   : > { %2420 = vmatprep.subr.bf16.mxu1 %v2419_v63  ;;  %v557_v30 = vld [vmem:[#allocation8 + $0x5a8] sm:$0xff]  ;;  %v559_v32 = vld [vmem:[#allocation8 + $0x5b8] sm:$0xff]  ;;  %v2429_v34 = vpack.c.bf16 %v534_v28, %v522_v26  ;;  %v544_v36 = vld [vmem:[#allocation8 + $0x540] sm:$0xff] }
  0xb2   : > { %v2303_v35 = vpack.c.bf16 %v557_v30, %v545_v29  ;;  %v556_v37 = vld [vmem:[#allocation8 + $0x5a0] sm:$0xff]  ;;  %v546_v38 = vld [vmem:[#allocation8 + $0x550] sm:$0xff]  ;;  %v2431_v39 = vpack.c.bf16 %v559_v32, %v547_v31  ;;  %v569_v41 = vld [vmem:[#allocation8 + $0x608] sm:$0xff] }
  0xb3   : > { %2294 = vmatpush1.bf16.msra.mxu0 %v2293_v9  ;;  %v558_v40 = vld [vmem:[#allocation8 + $0x5b0] sm:$0xff]  ;;  %v581_v42 = vld [vmem:[#allocation8 + $0x668] sm:$0xff]  ;;  %v571_v43 = vld [vmem:[#allocation8 + $0x618] sm:$0xff]  ;;  %v2305_v45 = vpack.c.bf16 %v556_v37, %v544_v36 }
  0xb4   : > { %2422 = vmatpush1.bf16.msra.mxu1 %v2421_v10  ;;  %2296 = vmatprep.subr.bf16.mxu0 %v2295_v11  ;;  %v583_v44 = vld [vmem:[#allocation8 + $0x678] sm:$0xff]  ;;  %v2433_v46 = vpack.c.bf16 %v558_v40, %v546_v38  ;;  %v2307_v47 = vpack.c.bf16 %v581_v42, %v569_v41  ;;  %v568_v48 = vld [vmem:[#allocation8 + $0x600] sm:$0xff]  ;;  %v570_v50 = vld [vmem:[#allocation8 + $0x610] sm:$0xff] }
  0xb5   : > { %2424 = vmatprep.subr.bf16.mxu1 %v2423_v15  ;;  %v580_v49 = vld [vmem:[#allocation8 + $0x660] sm:$0xff]  ;;  %v2435_v51 = vpack.c.bf16 %v583_v44, %v571_v43  ;;  %v582_v52 = vld [vmem:[#allocation8 + $0x670] sm:$0xff]  ;;  %v593_v53 = vld [vmem:[#allocation8 + $0x6c8] sm:$0xff] }
  0xb6   : > { %v605_v54 = vld [vmem:[#allocation8 + $0x728] sm:$0xff]  ;;  %v595_v55 = vld [vmem:[#allocation8 + $0x6d8] sm:$0xff]  ;;  %v2309_v57 = vpack.c.bf16 %v580_v49, %v568_v48  ;;  %v2437_v58 = vpack.c.bf16 %v582_v52, %v570_v50  ;;  %v592_v60 = vld [vmem:[#allocation8 + $0x6c0] sm:$0xff] }
  0xb7   : > { %2298 = vmatpush1.bf16.msra.mxu0 %v2297_v21  ;;  %v607_v56 = vld [vmem:[#allocation8 + $0x738] sm:$0xff]  ;;  %v2311_v59 = vpack.c.bf16 %v605_v54, %v593_v53  ;;  %v604_v61 = vld [vmem:[#allocation8 + $0x720] sm:$0xff]  ;;  %v594_v62 = vld [vmem:[#allocation8 + $0x6d0] sm:$0xff] }
  0xb8   : > { %2426 = vmatpush1.bf16.msra.mxu1 %v2425_v22  ;;  %2300 = vmatprep.subr.bf16.mxu0 %v2299_v23  ;;  %v2439_v63 = vpack.c.bf16 %v607_v56, %v595_v55  ;;  %v606_v3 = vld [vmem:[#allocation8 + $0x730] sm:$0xff]  ;;  %v617_v5 = vld [vmem:[#allocation8 + $0x788] sm:$0xff]  ;;  %v619_v7 = vld [vmem:[#allocation8 + $0x798] sm:$0xff]  ;;  %v2313_v9 = vpack.c.bf16 %v604_v61, %v592_v60 }
  0xb9   : > { %2428 = vmatprep.subr.bf16.mxu1 %v2427_v27  ;;  %v629_v6 = vld [vmem:[#allocation8 + $0x7e8] sm:$0xff]  ;;  %v631_v8 = vld [vmem:[#allocation8 + $0x7f8] sm:$0xff]  ;;  %v2441_v10 = vpack.c.bf16 %v606_v3, %v594_v62  ;;  %v616_v12 = vld [vmem:[#allocation8 + $0x780] sm:$0xff] }
  0xba   : > { %v2315_v11 = vpack.c.bf16 %v629_v6, %v617_v5  ;;  %v628_v13 = vld [vmem:[#allocation8 + $0x7e0] sm:$0xff]  ;;  %v2443_v14 = vpack.c.bf16 %v631_v8, %v619_v7  ;;  %v618_v15 = vld [vmem:[#allocation8 + $0x790] sm:$0xff]  ;;  %v653_v30 = vld [vmem:[#allocation8 + $0x8a8] sm:$0xff] }
  0xbb   : > { %2302 = vmatpush1.bf16.msra.mxu0 %v2301_v33  ;;  %v630_v16 = vld [vmem:[#allocation8 + $0x7f0] sm:$0xff]  ;;  %v2317_v17 = vpack.c.bf16 %v628_v13, %v616_v12  ;;  %v655_v32 = vld [vmem:[#allocation8 + $0x8b8] sm:$0xff]  ;;  %v640_v33 = vld [vmem:[#allocation8 + $0x840] sm:$0xff] }
  0xbc   : > { %2430 = vmatpush1.bf16.msra.mxu1 %v2429_v34  ;;  %2304 = vmatprep.subr.bf16.mxu0 %v2303_v35  ;;  %v2445_v18 = vpack.c.bf16 %v630_v16, %v618_v15  ;;  %v652_v34 = vld [vmem:[#allocation8 + $0x8a0] sm:$0xff]  ;;  %v642_v37 = vld [vmem:[#allocation8 + $0x850] sm:$0xff]  ;;  %v665_v40 = vld [vmem:[#allocation8 + $0x908] sm:$0xff] }
  0xbd   : > { %2432 = vmatprep.subr.bf16.mxu1 %v2431_v39  ;;  %v2321_v36 = vpack.c.bf16 %v652_v34, %v640_v33  ;;  %v654_v38 = vld [vmem:[#allocation8 + $0x8b0] sm:$0xff]  ;;  %v677_v41 = vld [vmem:[#allocation8 + $0x968] sm:$0xff]  ;;  %v667_v42 = vld [vmem:[#allocation8 + $0x918] sm:$0xff] }
  0xbe   : > { %v2449_v39 = vpack.c.bf16 %v654_v38, %v642_v37  ;;  %v2323_v43 = vpack.c.bf16 %v677_v41, %v665_v40  ;;  %v679_v44 = vld [vmem:[#allocation8 + $0x978] sm:$0xff]  ;;  %v666_v49 = vld [vmem:[#allocation8 + $0x910] sm:$0xff]  ;;  %v701_v53 = vld [vmem:[#allocation8 + $0xa28] sm:$0xff] }
  0xbf   : > { %2306 = vmatpush1.bf16.msra.mxu0 %v2305_v45  ;;  %v664_v45 = vld [vmem:[#allocation8 + $0x900] sm:$0xff]  ;;  %v678_v50 = vld [vmem:[#allocation8 + $0x970] sm:$0xff]  ;;  %v691_v54 = vld [vmem:[#allocation8 + $0x9d8] sm:$0xff] }
  0xc0   : > { %2434 = vmatpush1.bf16.msra.mxu1 %v2433_v46  ;;  %2308 = vmatprep.subr.bf16.mxu0 %v2307_v47  ;;  %v676_v46 = vld [vmem:[#allocation8 + $0x960] sm:$0xff]  ;;  %v2451_v47 = vpack.c.bf16 %v679_v44, %v667_v42  ;;  %v2453_v52 = vpack.c.bf16 %v678_v50, %v666_v49  ;;  %v703_v55 = vld [vmem:[#allocation8 + $0xa38] sm:$0xff]  ;;  %v690_v60 = vld [vmem:[#allocation8 + $0x9d0] sm:$0xff] }
  0xc1   : > { %2436 = vmatprep.subr.bf16.mxu1 %v2435_v51  ;;  %v2325_v48 = vpack.c.bf16 %v676_v46, %v664_v45  ;;  %v689_v51 = vld [vmem:[#allocation8 + $0x9c8] sm:$0xff]  ;;  %v702_v62 = vld [vmem:[#allocation8 + $0xa30] sm:$0xff]  ;;  %v715_v7 = vld [vmem:[#allocation8 + $0xa98] sm:$0xff] }
  0xc2   : > { %v2327_v56 = vpack.c.bf16 %v701_v53, %v689_v51  ;;  %v725_v3 = vld [vmem:[#allocation8 + $0xae8] sm:$0xff]  ;;  %v2457_v5 = vpack.c.bf16 %v702_v62, %v690_v60  ;;  %v727_v8 = vld [vmem:[#allocation8 + $0xaf8] sm:$0xff]  ;;  %v714_v12 = vld [vmem:[#allocation8 + $0xa90] sm:$0xff] }
  0xc3   : > { %2310 = vmatpush1.bf16.msra.mxu0 %v2309_v57  ;;  %v2455_v57 = vpack.c.bf16 %v703_v55, %v691_v54  ;;  %v726_v13 = vld [vmem:[#allocation8 + $0xaf0] sm:$0xff]  ;;  %v737_v15 = vld [vmem:[#allocation8 + $0xb48] sm:$0xff]  ;;  %v297_v42 = vld [vmem:[#allocation5] sm:$0xf] }
  0xc4   : > { %2438 = vmatpush1.bf16.msra.mxu1 %v2437_v58  ;;  %2312 = vmatprep.subr.bf16.mxu0 %v2311_v59  ;;  %v688_v58 = vld [vmem:[#allocation8 + $0x9c0] sm:$0xff]  ;;  %v749_v16 = vld [vmem:[#allocation8 + $0xba8] sm:$0xff]  ;;  %v298_v44 = vld [vmem:[#allocation7] sm:$0xf] }
  0xc5   : > { %2440 = vmatprep.subr.bf16.mxu1 %v2439_v63  ;;  %v700_v59 = vld [vmem:[#allocation8 + $0xa20] sm:$0xff]  ;;  %v713_v63 = vld [vmem:[#allocation8 + $0xa88] sm:$0xff]  ;;  %v774_v60 = vld [vmem:[#allocation8 + $0xc70] sm:$0xff] }
  0xc6   : > { %v2329_v61 = vpack.c.bf16 %v700_v59, %v688_v58  ;;  %v2331_v6 = vpack.c.bf16 %v725_v3, %v713_v63  ;;  %v760_v55 = vld [vmem:[#allocation8 + $0xc00] sm:$0xff]  ;;  %v762_v59 = vld [vmem:[#allocation8 + $0xc10] sm:$0xff]  ;;  %v785_v63 = vld [vmem:[#allocation8 + $0xcc8] sm:$0xff] }
  0xc7   : > { %2314 = vmatpush1.bf16.msra.mxu0 %v2313_v9  ;;  %v712_v9 = vld [vmem:[#allocation8 + $0xa80] sm:$0xff] }
  0xc8   : > { %2442 = vmatpush1.bf16.msra.mxu1 %v2441_v10  ;;  %2316 = vmatprep.subr.bf16.mxu0 %v2315_v11  ;;  %v2459_v10 = vpack.c.bf16 %v727_v8, %v715_v7  ;;  %v724_v11 = vld [vmem:[#allocation8 + $0xae0] sm:$0xff]  ;;  %v797_v8 = vld [vmem:[#allocation8 + $0xd28] sm:$0xff] }
  0xc9   : > { %2444 = vmatprep.subr.bf16.mxu1 %v2443_v14  ;;  %v2333_v14 = vpack.c.bf16 %v724_v11, %v712_v9  ;;  %v799_v9 = vld [vmem:[#allocation8 + $0xd38] sm:$0xff]  ;;  %v784_v11 = vld [vmem:[#allocation8 + $0xcc0] sm:$0xff] }
  0xcb   : > { %2318 = vmatpush1.bf16.msra.mxu0 %v2317_v17  ;;  %v739_v17 = vld [vmem:[#allocation8 + $0xb58] sm:$0xff] }
  0xcc   : > { %2446 = vmatpush1.bf16.msra.mxu1 %v2445_v18  ;;  %v2461_v18 = vpack.c.bf16 %v726_v13, %v714_v12  ;;  %v786_v13 = vld [vmem:[#allocation8 + $0xcd0] sm:$0xff] }
 0x130   : > { %v303_v19 = vpop.xlane.xlu0 %302 }
 0x131   : > { %v305_v20 = vmul.f32 0.001953125, %v303_v19  ;;  %v2335_v19 = vpack.c.bf16 %v749_v16, %v737_v15  ;;  %v809_v15 = vld [vmem:[#allocation8 + $0xd88] sm:$0xff]  ;;  %v2343_v16 = vpack.c.bf16 %v797_v8, %v785_v63 }
 0x133   : > { %v3666_v21 = vsub.f32 %v3653_v0, %v305_v20  ;;  %v3669_v22 = vsub.f32 %v3655_v1, %v305_v20  ;;  %v3672_v23 = vsub.f32 %v3657_v2, %v305_v20  ;;  %v3675_v24 = vsub.f32 %v3661_v4, %v305_v20  ;;  %v641_v2 = vld [vmem:[#allocation8 + $0x848] sm:$0xff]  ;;  %v643_v4 = vld [vmem:[#allocation8 + $0x858] sm:$0xff] }
 0x134   : > { %v2319_v31 = vpack.c.bf16 %v653_v30, %v641_v2  ;;  %v2447_v35 = vpack.c.bf16 %v655_v32, %v643_v4  ;;  %v751_v20 = vld [vmem:[#allocation8 + $0xbb8] sm:$0xff]  ;;  %v761_v2 = vld [vmem:[#allocation8 + $0xc08] sm:$0xff] }
 0x135   : > { %v310_v25 = vmul.f32 %v3666_v21, %v3666_v21  ;;  %v311_v26 = vmul.f32 %v3669_v22, %v3669_v22  ;;  %v312_v27 = vmul.f32 %v3672_v23, %v3672_v23  ;;  %v313_v1 = vmul.f32 %v3675_v24, %v3675_v24  ;;  %v773_v30 = vld [vmem:[#allocation8 + $0xc68] sm:$0xff]  ;;  %v763_v4 = vld [vmem:[#allocation8 + $0xc18] sm:$0xff] }
 0x136   : > { %2320 = vmatprep.subr.bf16.mxu0 %v2319_v31  ;;  %2448 = vmatprep.subr.bf16.mxu1 %v2447_v35  ;;  %v2339_v31 = vpack.c.bf16 %v773_v30, %v761_v2  ;;  %v775_v32 = vld [vmem:[#allocation8 + $0xc78] sm:$0xff]  ;;  %v810_v2 = vld [vmem:[#allocation8 + $0xd90] sm:$0xff] }
 0x137   : > { %v314_v0 = vadd.f32 %v311_v26, %v310_v25  ;;  %2322 = vmatpush1.bf16.msra.mxu0 %v2321_v36  ;;  %2450 = vmatpush1.bf16.msra.mxu1 %v2449_v39  ;;  %v736_v25 = vld [vmem:[#allocation8 + $0xb40] sm:$0xff]  ;;  %v2467_v33 = vpack.c.bf16 %v775_v32, %v763_v4  ;;  %v327_v36 = vlaneseq  ;;  %v822_v30 = vld [vmem:[#allocation8 + $0xdf0] sm:$0xff]  ;;  %v833_v4 = vld [vmem:[#allocation8 + $0xe48] sm:$0xff] }
 0x138   : > { %2324 = vmatprep.subr.bf16.mxu0 %v2323_v43  ;;  %2452 = vmatprep.subr.bf16.mxu1 %v2451_v47  ;;  %v748_v26 = vld [vmem:[#allocation8 + $0xba0] sm:$0xff]  ;;  %v835_v32 = vld [vmem:[#allocation8 + $0xe58] sm:$0xff] }
 0x139   : > { %v315_v28 = vadd.f32 %v314_v0, %v312_v27  ;;  %v2463_v27 = vpack.c.bf16 %v751_v20, %v739_v17  ;;  %v738_v0 = vld [vmem:[#allocation8 + $0xb50] sm:$0xff]  ;;  %v3685_v38 = vshrl.u32 %v327_v36, 7  ;;  %v823_v20 = vld [vmem:[#allocation8 + $0xdf8] sm:$0xff]  ;;  %v832_v36 = vld [vmem:[#allocation8 + $0xe40] sm:$0xff] }
 0x13b   : > { %v316_v29 = vadd.f32 %v315_v28, %v313_v1  ;;  %2326 = vmatpush1.bf16.msra.mxu0 %v2325_v48  ;;  %2454 = vmatpush1.bf16.msra.mxu1 %v2453_v52  ;;  %v750_v1 = vld [vmem:[#allocation8 + $0xbb0] sm:$0xff]  ;;  %v2337_v28 = vpack.c.bf16 %v748_v26, %v736_v25  ;;  %v3688_v39 = vsub.s32 1, %v3685_v38  ;;  %v3691_v40 = vsub.s32 0, %v3685_v38 }
 0x13c   : > { %2328 = vmatprep.subr.bf16.mxu0 %v2327_v56  ;;  %2456 = vmatprep.subr.bf16.mxu1 %v2455_v57  ;;  %v3694_v41 = vsub.s32 2, %v3685_v38  ;;  %v3697_v43 = vsub.s32 3, %v3685_v38  ;;  %v772_v56 = vld [vmem:[#allocation8 + $0xc60] sm:$0xff] }
 0x13d   : > { %317 = vadd.xlane.f32.xlu0 %v316_v29  ;;  %v2465_v29 = vpack.c.bf16 %v750_v1, %v738_v0  ;;  %v334_v45 = vrot.slane %v297_v42, %v3688_v39  ;;  %v330_v46 = vrot.slane %v297_v42, %v3691_v40  ;;  %v359_v49 = vrot.slane %v298_v44, %v3688_v39  ;;  %v808_v0 = vld [vmem:[#allocation8 + $0xd80] sm:$0xff] }
 0x13e   : > { %v338_v47 = vrot.slane %v297_v42, %v3694_v41  ;;  %v355_v50 = vrot.slane %v298_v44, %v3691_v40  ;;  %v342_v51 = vrot.slane %v297_v42, %v3697_v43  ;;  %v363_v52 = vrot.slane %v298_v44, %v3694_v41  ;;  %v820_v1 = vld [vmem:[#allocation8 + $0xde0] sm:$0xff] }
 0x13f   : > { %2330 = vmatpush1.bf16.msra.mxu0 %v2329_v61  ;;  %2458 = vmatpush1.bf16.msra.mxu1 %v2457_v5  ;;  %v2341_v5 = vpack.c.bf16 %v772_v56, %v760_v55  ;;  %v367_v7 = vrot.slane %v298_v44, %v3697_v43 }
 0x140   : > { %2332 = vmatprep.subr.bf16.mxu0 %v2331_v6  ;;  %2460 = vmatprep.subr.bf16.mxu1 %v2459_v10 }
 0x143   : > { %2334 = vmatpush1.bf16.msra.mxu0 %v2333_v14  ;;  %2462 = vmatpush1.bf16.msra.mxu1 %v2461_v18  ;;  %v798_v14 = vld [vmem:[#allocation8 + $0xd30] sm:$0xff]  ;;  %v821_v18 = vld [vmem:[#allocation8 + $0xde8] sm:$0xff] }
 0x144   : > { %2336 = vmatprep.subr.bf16.mxu0 %v2335_v19  ;;  %2464 = vmatprep.subr.bf16.mxu1 %v2463_v27  ;;  %v811_v19 = vld [vmem:[#allocation8 + $0xd98] sm:$0xff]  ;;  %v2473_v27 = vpack.c.bf16 %v798_v14, %v786_v13 }
 0x145   : > { %v919_v13 = vld [vmem:[#allocation8 + $0x10f8] sm:$0xff] }
 0x147   : > { %2338 = vmatpush1.bf16.msra.mxu0 %v2337_v28  ;;  %2466 = vmatpush1.bf16.msra.mxu1 %v2465_v29  ;;  %v2347_v28 = vpack.c.bf16 %v821_v18, %v809_v15  ;;  %v2475_v29 = vpack.c.bf16 %v823_v20, %v811_v19  ;;  %v906_v20 = vld [vmem:[#allocation8 + $0x1090] sm:$0xff] }
 0x148   : > { %2340 = vmatprep.subr.bf16.mxu0 %v2339_v31  ;;  %2468 = vmatprep.subr.bf16.mxu1 %v2467_v33  ;;  %v845_v31 = vld [vmem:[#allocation8 + $0xea8] sm:$0xff]  ;;  %v847_v33 = vld [vmem:[#allocation8 + $0xeb8] sm:$0xff] }
 0x149   : > { %v2351_v42 = vpack.c.bf16 %v845_v31, %v833_v4  ;;  %v2479_v44 = vpack.c.bf16 %v847_v33, %v835_v32  ;;  %v940_v4 = vld [vmem:[#allocation8 + $0x11a0] sm:$0xff]  ;;  %v930_v33 = vld [vmem:[#allocation8 + $0x1150] sm:$0xff] }
 0x1ca   : > { %v318_v34 = vpop.xlane.xlu0 %317 }
 0x1cb   : > { %v319_v35 = vmul.f32 0.001953125, %v318_v34  ;;  %v2349_v34 = vpack.c.bf16 %v820_v1, %v808_v0  ;;  %v941_v0 = vld [vmem:[#allocation8 + $0x11a8] sm:$0xff]  ;;  %v931_v1 = vld [vmem:[#allocation8 + $0x1158] sm:$0xff] }
 0x1cd   : > { %v320_v37 = vadd.f32 1e-05, %v319_v35  ;;  %v2477_v35 = vpack.c.bf16 %v822_v30, %v810_v2  ;;  %v928_v30 = vld [vmem:[#allocation8 + $0x1140] sm:$0xff] }
 0x1cf   : > { %3170 = vrsqrt.f32 %v320_v37  ;;  %v844_v37 = vld [vmem:[#allocation8 + $0xea0] sm:$0xff] }
 0x1d9   : > { %v3171_v48 = vpop.eup %3170 }
 0x1da   : > { %v323_v53 = vmul.f32 %v3171_v48, %v3669_v22  ;;  %v322_v54 = vmul.f32 %v3171_v48, %v3666_v21  ;;  %v325_v57 = vmul.f32 %v3171_v48, %v3675_v24  ;;  %v324_v58 = vmul.f32 %v3171_v48, %v3672_v23  ;;  %v787_v22 = vld [vmem:[#allocation8 + $0xcd8] sm:$0xff]  ;;  %v796_v23 = vld [vmem:[#allocation8 + $0xd20] sm:$0xff]  ;;  %v869_v48 = vld [vmem:[#allocation8 + $0xf68] sm:$0xff] }
 0x1db   : > { %v2469_v24 = vpack.c.bf16 %v774_v60, %v762_v59  ;;  %v2471_v17 = vpack.c.bf16 %v799_v9, %v787_v22  ;;  %v2345_v26 = vpack.c.bf16 %v796_v23, %v784_v11  ;;  %v881_v59 = vld [vmem:[#allocation8 + $0xfc8] sm:$0xff]  ;;  %v882_v22 = vld [vmem:[#allocation8 + $0xfd0] sm:$0xff]  ;;  %v907_v23 = vld [vmem:[#allocation8 + $0x1098] sm:$0xff] }
 0x1dc   : > { %v348_v61 = vmul.f32 %v334_v45, %v323_v53  ;;  %v347_v62 = vmul.f32 %v330_v46, %v322_v54  ;;  %v349_v3 = vmul.f32 %v338_v47, %v324_v58  ;;  %v350_v6 = vmul.f32 %v342_v51, %v325_v57  ;;  %v834_v45 = vld [vmem:[#allocation8 + $0xe50] sm:$0xff]  ;;  %v857_v47 = vld [vmem:[#allocation8 + $0xf08] sm:$0xff]  ;;  %v856_v53 = vld [vmem:[#allocation8 + $0xf00] sm:$0xff] }
 0x1dd   : > { %v846_v46 = vld [vmem:[#allocation8 + $0xeb0] sm:$0xff]  ;;  %v2353_v51 = vpack.c.bf16 %v844_v37, %v832_v36  ;;  %v868_v54 = vld [vmem:[#allocation8 + $0xf60] sm:$0xff]  ;;  %v2355_v55 = vpack.c.bf16 %v869_v48, %v857_v47  ;;  %v893_v60 = vld [vmem:[#allocation8 + $0x1028] sm:$0xff]  ;;  %v2491_v19 = vpack.c.bf16 %v919_v13, %v907_v23 }
 0x1de   : > { %v3711_v21 = vadd.f32 %v359_v49, %v348_v61  ;;  %v3713_v10 = vadd.f32 %v355_v50, %v347_v62  ;;  %v3715_v12 = vadd.f32 %v363_v52, %v349_v3  ;;  %v3721_v25 = vadd.f32 %v367_v7, %v350_v6  ;;  %v859_v49 = vld [vmem:[#allocation8 + $0xf18] sm:$0xff]  ;;  %v858_v57 = vld [vmem:[#allocation8 + $0xf10] sm:$0xff]  ;;  %v892_v6 = vld [vmem:[#allocation8 + $0x1020] sm:$0xff] }
 0x1df   : > { %v871_v50 = vld [vmem:[#allocation8 + $0xf78] sm:$0xff]  ;;  %v2481_v52 = vpack.c.bf16 %v846_v46, %v834_v45  ;;  %v870_v58 = vld [vmem:[#allocation8 + $0xf70] sm:$0xff]  ;;  %v2357_v63 = vpack.c.bf16 %v868_v54, %v856_v53  ;;  %v2359_v7 = vpack.c.bf16 %v893_v60, %v881_v59  ;;  %v917_v11 = vld [vmem:[#allocation8 + $0x10e8] sm:$0xff] }
 0x1e0   : > { %1272 = vmatprep.mubr.f32.mxu0 %v3711_v21  ;;  %1414 = vmatprep.mubr.f32.mxu1 %v3711_v21  ;;  %v2483_v56 = vpack.c.bf16 %v871_v50, %v859_v49  ;;  %v883_v61 = vld [vmem:[#allocation8 + $0xfd8] sm:$0xff]  ;;  %v2485_v3 = vpack.c.bf16 %v870_v58, %v858_v57  ;;  %v894_v9 = vld [vmem:[#allocation8 + $0x1030] sm:$0xff]  ;;  %v965_v36 = vld [vmem:[#allocation8 + $0x1268] sm:$0xff] }
 0x1e1   : > { %1273 = vmatmul.mubr.f32.vlgmr.msra.gmra.mrb[0].mxu0 %v3713_v10  ;;  %1415 = vmatmul.mubr.f32.vlgmr.msra.gmra.mrb[0].mxu1 %v3713_v10  ;;  %v895_v62 = vld [vmem:[#allocation8 + $0x1038] sm:$0xff]  ;;  %v2489_v15 = vpack.c.bf16 %v894_v9, %v882_v22  ;;  %v952_v46 = vld [vmem:[#allocation8 + $0x1200] sm:$0xff]  ;;  %v954_v50 = vld [vmem:[#allocation8 + $0x1210] sm:$0xff] }
 0x1e2   : > { %2342 = vmatpush1.bf16.msra.mxu0 %v2341_v5  ;;  %2470 = vmatpush1.bf16.msra.mxu1 %v2469_v24  ;;  %v880_v5 = vld [vmem:[#allocation8 + $0xfc0] sm:$0xff]  ;;  %v2487_v8 = vpack.c.bf16 %v895_v62, %v883_v61  ;;  %v905_v24 = vld [vmem:[#allocation8 + $0x1088] sm:$0xff]  ;;  %v955_v37 = vld [vmem:[#allocation8 + $0x1218] sm:$0xff] }
 0x1e3   : > { %1343 = vmatprep.mubr.f32.mxu0 %v3721_v25  ;;  %1485 = vmatprep.mubr.f32.mxu1 %v3721_v25  ;;  %v2361_v14 = vpack.c.bf16 %v892_v6, %v880_v5  ;;  %v2363_v18 = vpack.c.bf16 %v917_v11, %v905_v24  ;;  %v964_v47 = vld [vmem:[#allocation8 + $0x1260] sm:$0xff]  ;;  %v989_v53 = vld [vmem:[#allocation8 + $0x1328] sm:$0xff]  ;;  %v979_v54 = vld [vmem:[#allocation8 + $0x12d8] sm:$0xff] }
 0x1e4   : > { %2344 = vmatprep.subr.bf16.mxu0 %v2343_v16  ;;  %2472 = vmatprep.subr.bf16.mxu1 %v2471_v17  ;;  %v904_v16 = vld [vmem:[#allocation8 + $0x1080] sm:$0xff]  ;;  %v978_v62 = vld [vmem:[#allocation8 + $0x12d0] sm:$0xff]  ;;  %v1013_v5 = vld [vmem:[#allocation8 + $0x13e8] sm:$0xff] }
 0x1e5   : > { %v916_v17 = vld [vmem:[#allocation8 + $0x10e0] sm:$0xff]  ;;  %v1003_v6 = vld [vmem:[#allocation8 + $0x1398] sm:$0xff]  ;;  %v1002_v13 = vld [vmem:[#allocation8 + $0x1390] sm:$0xff] }
 0x1e6   : > { %2346 = vmatpush1.bf16.msra.mxu0 %v2345_v26  ;;  %2474 = vmatpush1.bf16.msra.mxu1 %v2473_v27  ;;  %v918_v26 = vld [vmem:[#allocation8 + $0x10f0] sm:$0xff]  ;;  %v929_v27 = vld [vmem:[#allocation8 + $0x1148] sm:$0xff]  ;;  %v976_v58 = vld [vmem:[#allocation8 + $0x12c0] sm:$0xff] }
 0x1e7   : > { %2348 = vmatprep.subr.bf16.mxu0 %v2347_v28  ;;  %2476 = vmatprep.subr.bf16.mxu1 %v2475_v29  ;;  %v943_v28 = vld [vmem:[#allocation8 + $0x11b8] sm:$0xff]  ;;  %v2365_v29 = vpack.c.bf16 %v916_v17, %v904_v16  ;;  %v2493_v2 = vpack.c.bf16 %v918_v26, %v906_v20  ;;  %v2367_v31 = vpack.c.bf16 %v941_v0, %v929_v27  ;;  %v988_v59 = vld [vmem:[#allocation8 + $0x1320] sm:$0xff]  ;;  %v1037_v16 = vld [vmem:[#allocation8 + $0x14a8] sm:$0xff] }
 0x1e8   : > { %v2495_v32 = vpack.c.bf16 %v943_v28, %v931_v1  ;;  %v1000_v9 = vld [vmem:[#allocation8 + $0x1380] sm:$0xff]  ;;  %v1027_v17 = vld [vmem:[#allocation8 + $0x1458] sm:$0xff]  ;;  %v1026_v28 = vld [vmem:[#allocation8 + $0x1450] sm:$0xff] }
 0x1e9   : > { %v1012_v24 = vld [vmem:[#allocation8 + $0x13e0] sm:$0xff] }
 0x1ea   : > { %2350 = vmatpush1.bf16.msra.mxu0 %v2349_v34  ;;  %2478 = vmatpush1.bf16.msra.mxu1 %v2477_v35  ;;  %v942_v34 = vld [vmem:[#allocation8 + $0x11b0] sm:$0xff]  ;;  %v953_v35 = vld [vmem:[#allocation8 + $0x1208] sm:$0xff]  ;;  %v1024_v26 = vld [vmem:[#allocation8 + $0x1440] sm:$0xff] }
 0x1eb   : > { %2352 = vmatprep.subr.bf16.mxu0 %v2351_v42  ;;  %2480 = vmatprep.subr.bf16.mxu1 %v2479_v44  ;;  %v967_v42 = vld [vmem:[#allocation8 + $0x1278] sm:$0xff]  ;;  %v2369_v44 = vpack.c.bf16 %v940_v4, %v928_v30  ;;  %v2497_v45 = vpack.c.bf16 %v942_v34, %v930_v33  ;;  %v2371_v48 = vpack.c.bf16 %v965_v36, %v953_v35  ;;  %v1036_v27 = vld [vmem:[#allocation8 + $0x14a0] sm:$0xff]  ;;  %v1061_v30 = vld [vmem:[#allocation8 + $0x1568] sm:$0xff] }
 0x1ec   : > { %v2499_v49 = vpack.c.bf16 %v967_v42, %v955_v37  ;;  %v1051_v4 = vld [vmem:[#allocation8 + $0x1518] sm:$0xff]  ;;  %v1048_v34 = vld [vmem:[#allocation8 + $0x1500] sm:$0xff]  ;;  %v1050_v42 = vld [vmem:[#allocation8 + $0x1510] sm:$0xff] }
 0x1ed   : > { %v1060_v35 = vld [vmem:[#allocation8 + $0x1560] sm:$0xff] }
 0x1ee   : > { %2354 = vmatpush1.bf16.msra.mxu0 %v2353_v51  ;;  %2482 = vmatpush1.bf16.msra.mxu1 %v2481_v52  ;;  %v966_v51 = vld [vmem:[#allocation8 + $0x1270] sm:$0xff]  ;;  %v977_v52 = vld [vmem:[#allocation8 + $0x12c8] sm:$0xff] }
 0x1ef   : > { %2356 = vmatprep.subr.bf16.mxu0 %v2355_v55  ;;  %2484 = vmatprep.subr.bf16.mxu1 %v2483_v56  ;;  %v991_v55 = vld [vmem:[#allocation8 + $0x1338] sm:$0xff]  ;;  %v2373_v56 = vpack.c.bf16 %v964_v47, %v952_v46  ;;  %v2501_v57 = vpack.c.bf16 %v966_v51, %v954_v50  ;;  %v2375_v60 = vpack.c.bf16 %v989_v53, %v977_v52  ;;  %v1085_v46 = vld [vmem:[#allocation8 + $0x1628] sm:$0xff]  ;;  %v1072_v51 = vld [vmem:[#allocation8 + $0x15c0] sm:$0xff] }
 0x1f0   : > { %v2503_v61 = vpack.c.bf16 %v991_v55, %v979_v54  ;;  %v1075_v47 = vld [vmem:[#allocation8 + $0x15d8] sm:$0xff]  ;;  %v1084_v52 = vld [vmem:[#allocation8 + $0x1620] sm:$0xff]  ;;  %v1074_v55 = vld [vmem:[#allocation8 + $0x15d0] sm:$0xff] }
 0x1f2   : > { %2358 = vmatpush1.bf16.msra.mxu0 %v2357_v63  ;;  %2486 = vmatpush1.bf16.msra.mxu1 %v2485_v3  ;;  %v990_v63 = vld [vmem:[#allocation8 + $0x1330] sm:$0xff]  ;;  %v1001_v3 = vld [vmem:[#allocation8 + $0x1388] sm:$0xff] }
 0x1f3   : > { %2360 = vmatprep.subr.bf16.mxu0 %v2359_v7  ;;  %2488 = vmatprep.subr.bf16.mxu1 %v2487_v8  ;;  %v1015_v7 = vld [vmem:[#allocation8 + $0x13f8] sm:$0xff]  ;;  %v2377_v8 = vpack.c.bf16 %v988_v59, %v976_v58  ;;  %v2505_v22 = vpack.c.bf16 %v990_v63, %v978_v62  ;;  %v2379_v11 = vpack.c.bf16 %v1013_v5, %v1001_v3  ;;  %v1109_v58 = vld [vmem:[#allocation8 + $0x16e8] sm:$0xff]  ;;  %v1096_v63 = vld [vmem:[#allocation8 + $0x1680] sm:$0xff] }
 0x1f4   : > { %v2507_v23 = vpack.c.bf16 %v1015_v7, %v1003_v6  ;;  %v1099_v59 = vld [vmem:[#allocation8 + $0x1698] sm:$0xff]  ;;  %v1108_v3 = vld [vmem:[#allocation8 + $0x16e0] sm:$0xff]  ;;  %v1098_v7 = vld [vmem:[#allocation8 + $0x1690] sm:$0xff] }
 0x1f6   : > { %2362 = vmatpush1.bf16.msra.mxu0 %v2361_v14  ;;  %2490 = vmatpush1.bf16.msra.mxu1 %v2489_v15  ;;  %v1014_v14 = vld [vmem:[#allocation8 + $0x13f0] sm:$0xff]  ;;  %v1025_v15 = vld [vmem:[#allocation8 + $0x1448] sm:$0xff] }
 0x1f7   : > { %2364 = vmatprep.subr.bf16.mxu0 %v2363_v18  ;;  %2492 = vmatprep.subr.bf16.mxu1 %v2491_v19  ;;  %v1039_v18 = vld [vmem:[#allocation8 + $0x14b8] sm:$0xff]  ;;  %v2381_v19 = vpack.c.bf16 %v1012_v24, %v1000_v9  ;;  %v2509_v20 = vpack.c.bf16 %v1014_v14, %v1002_v13  ;;  %v2383_v0 = vpack.c.bf16 %v1037_v16, %v1025_v15  ;;  %v1133_v9 = vld [vmem:[#allocation8 + $0x17a8] sm:$0xff]  ;;  %v1120_v14 = vld [vmem:[#allocation8 + $0x1740] sm:$0xff] }
 0x1f8   : > { %v2511_v1 = vpack.c.bf16 %v1039_v18, %v1027_v17  ;;  %v1123_v24 = vld [vmem:[#allocation8 + $0x1758] sm:$0xff]  ;;  %v1132_v15 = vld [vmem:[#allocation8 + $0x17a0] sm:$0xff]  ;;  %v1122_v18 = vld [vmem:[#allocation8 + $0x1750] sm:$0xff] }
 0x1fa   : > { %2366 = vmatpush1.bf16.msra.mxu0 %v2365_v29  ;;  %2494 = vmatpush1.bf16.msra.mxu1 %v2493_v2  ;;  %v1038_v29 = vld [vmem:[#allocation8 + $0x14b0] sm:$0xff]  ;;  %v1049_v2 = vld [vmem:[#allocation8 + $0x1508] sm:$0xff] }
 0x1fb   : > { %2368 = vmatprep.subr.bf16.mxu0 %v2367_v31  ;;  %2496 = vmatprep.subr.bf16.mxu1 %v2495_v32  ;;  %v1063_v31 = vld [vmem:[#allocation8 + $0x1578] sm:$0xff]  ;;  %v2385_v32 = vpack.c.bf16 %v1036_v27, %v1024_v26  ;;  %v2513_v33 = vpack.c.bf16 %v1038_v29, %v1026_v28  ;;  %v2387_v36 = vpack.c.bf16 %v1061_v30, %v1049_v2  ;;  %v393_v26 = vld [vmem:[#allocation8 + $0x88] sm:$0xff]  ;;  %v380_v30 = vld [vmem:[#allocation8 + $0x20] sm:$0xff] }
 0x1fc   : > { %v2515_v37 = vpack.c.bf16 %v1063_v31, %v1051_v4  ;;  %v383_v27 = vld [vmem:[#allocation8 + $0x38] sm:$0xff]  ;;  %v392_v4 = vld [vmem:[#allocation8 + $0x80] sm:$0xff]  ;;  %v382_v31 = vld [vmem:[#allocation8 + $0x30] sm:$0xff] }
 0x1fe   : > { %2370 = vmatpush1.bf16.msra.mxu0 %v2369_v44  ;;  %2498 = vmatpush1.bf16.msra.mxu1 %v2497_v45  ;;  %v1062_v44 = vld [vmem:[#allocation8 + $0x1570] sm:$0xff]  ;;  %v1073_v45 = vld [vmem:[#allocation8 + $0x15c8] sm:$0xff] }
 0x1ff   : > { %2372 = vmatprep.subr.bf16.mxu0 %v2371_v48  ;;  %2500 = vmatprep.subr.bf16.mxu1 %v2499_v49  ;;  %v1087_v48 = vld [vmem:[#allocation8 + $0x1638] sm:$0xff]  ;;  %v2389_v49 = vpack.c.bf16 %v1060_v35, %v1048_v34  ;;  %v2517_v50 = vpack.c.bf16 %v1062_v44, %v1050_v42  ;;  %v2391_v53 = vpack.c.bf16 %v1085_v46, %v1073_v45  ;;  %v417_v34 = vld [vmem:[#allocation8 + $0x148] sm:$0xff]  ;;  %v404_v44 = vld [vmem:[#allocation8 + $0xe0] sm:$0xff] }
 0x200   : > { %v2519_v54 = vpack.c.bf16 %v1087_v48, %v1075_v47  ;;  %v407_v35 = vld [vmem:[#allocation8 + $0xf8] sm:$0xff]  ;;  %v416_v45 = vld [vmem:[#allocation8 + $0x140] sm:$0xff]  ;;  %v406_v46 = vld [vmem:[#allocation8 + $0xf0] sm:$0xff] }
 0x202   : > { %2374 = vmatpush1.bf16.msra.mxu0 %v2373_v56  ;;  %2502 = vmatpush1.bf16.msra.mxu1 %v2501_v57  ;;  %v1086_v56 = vld [vmem:[#allocation8 + $0x1630] sm:$0xff]  ;;  %v1097_v57 = vld [vmem:[#allocation8 + $0x1688] sm:$0xff] }
 0x203   : > { %2376 = vmatprep.subr.bf16.mxu0 %v2375_v60  ;;  %2504 = vmatprep.subr.bf16.mxu1 %v2503_v61  ;;  %v1111_v60 = vld [vmem:[#allocation8 + $0x16f8] sm:$0xff]  ;;  %v2393_v61 = vpack.c.bf16 %v1084_v52, %v1072_v51  ;;  %v2521_v62 = vpack.c.bf16 %v1086_v56, %v1074_v55  ;;  %v2395_v5 = vpack.c.bf16 %v1109_v58, %v1097_v57  ;;  %v441_v51 = vld [vmem:[#allocation8 + $0x208] sm:$0xff]  ;;  %v428_v57 = vld [vmem:[#allocation8 + $0x1a0] sm:$0xff] }
 0x204   : > { %v2523_v6 = vpack.c.bf16 %v1111_v60, %v1099_v59  ;;  %v431_v52 = vld [vmem:[#allocation8 + $0x1b8] sm:$0xff]  ;;  %v440_v58 = vld [vmem:[#allocation8 + $0x200] sm:$0xff]  ;;  %v430_v59 = vld [vmem:[#allocation8 + $0x1b0] sm:$0xff] }
 0x206   : > { %2378 = vmatpush1.bf16.msra.mxu0 %v2377_v8  ;;  %2506 = vmatpush1.bf16.msra.mxu1 %v2505_v22  ;;  %v1110_v8 = vld [vmem:[#allocation8 + $0x16f0] sm:$0xff]  ;;  %v1121_v22 = vld [vmem:[#allocation8 + $0x1748] sm:$0xff] }
 0x207   : > { %2380 = vmatprep.subr.bf16.mxu0 %v2379_v11  ;;  %2508 = vmatprep.subr.bf16.mxu1 %v2507_v23  ;;  %v1135_v11 = vld [vmem:[#allocation8 + $0x17b8] sm:$0xff]  ;;  %v2397_v23 = vpack.c.bf16 %v1108_v3, %v1096_v63  ;;  %v2525_v13 = vpack.c.bf16 %v1110_v8, %v1098_v7  ;;  %v2399_v16 = vpack.c.bf16 %v1133_v9, %v1121_v22  ;;  %v465_v63 = vld [vmem:[#allocation8 + $0x2c8] sm:$0xff]  ;;  %v452_v22 = vld [vmem:[#allocation8 + $0x260] sm:$0xff] }
 0x208   : > { %v2527_v17 = vpack.c.bf16 %v1135_v11, %v1123_v24  ;;  %v455_v3 = vld [vmem:[#allocation8 + $0x278] sm:$0xff]  ;;  %v464_v9 = vld [vmem:[#allocation8 + $0x2c0] sm:$0xff]  ;;  %v454_v24 = vld [vmem:[#allocation8 + $0x270] sm:$0xff] }
 0x20a   : > { %2382 = vmatpush1.bf16.msra.mxu0 %v2381_v19  ;;  %2510 = vmatpush1.bf16.msra.mxu1 %v2509_v20  ;;  %v1134_v19 = vld [vmem:[#allocation8 + $0x17b0] sm:$0xff]  ;;  %v381_v20 = vld [vmem:[#allocation8 + $0x28] sm:$0xff] }
 0x20b   : > { %2384 = vmatprep.subr.bf16.mxu0 %v2383_v0  ;;  %2512 = vmatprep.subr.bf16.mxu1 %v2511_v1  ;;  %v395_v0 = vld [vmem:[#allocation8 + $0x98] sm:$0xff]  ;;  %v2401_v1 = vpack.c.bf16 %v1132_v15, %v1120_v14  ;;  %v2529_v28 = vpack.c.bf16 %v1134_v19, %v1122_v18  ;;  %v2531_v29 = vpack.c.bf16 %v393_v26, %v381_v20  ;;  %v489_v14 = vld [vmem:[#allocation8 + $0x388] sm:$0xff]  ;;  %v476_v20 = vld [vmem:[#allocation8 + $0x320] sm:$0xff] }
 0x20c   : > { %v2659_v2 = vpack.c.bf16 %v395_v0, %v383_v27  ;;  %v479_v15 = vld [vmem:[#allocation8 + $0x338] sm:$0xff]  ;;  %v488_v26 = vld [vmem:[#allocation8 + $0x380] sm:$0xff]  ;;  %v478_v27 = vld [vmem:[#allocation8 + $0x330] sm:$0xff] }
 0x20e   : > { %2386 = vmatpush1.bf16.msra.mxu0 %v2385_v32  ;;  %2514 = vmatpush1.bf16.msra.mxu1 %v2513_v33  ;;  %v394_v32 = vld [vmem:[#allocation8 + $0x90] sm:$0xff]  ;;  %v405_v33 = vld [vmem:[#allocation8 + $0xe8] sm:$0xff] }
 0x20f   : > { %2388 = vmatprep.subr.bf16.mxu0 %v2387_v36  ;;  %2516 = vmatprep.subr.bf16.mxu1 %v2515_v37  ;;  %v419_v36 = vld [vmem:[#allocation8 + $0x158] sm:$0xff]  ;;  %v2533_v37 = vpack.c.bf16 %v392_v4, %v380_v30  ;;  %v2661_v42 = vpack.c.bf16 %v394_v32, %v382_v31  ;;  %v2535_v47 = vpack.c.bf16 %v417_v34, %v405_v33  ;;  %v500_v33 = vld [vmem:[#allocation8 + $0x3e0] sm:$0xff] }
 0x210   : > { %v2663_v48 = vpack.c.bf16 %v419_v36, %v407_v35  ;;  %v515_v30 = vld [vmem:[#allocation8 + $0x458] sm:$0xff]  ;;  %v2549_v4 = vpack.c.bf16 %v488_v26, %v476_v20  ;;  %v512_v34 = vld [vmem:[#allocation8 + $0x440] sm:$0xff]  ;;  %v502_v35 = vld [vmem:[#allocation8 + $0x3f0] sm:$0xff] }
 0x211   : > { %v599_v20 = vld [vmem:[#allocation8 + $0x6f8] sm:$0xff] }
 0x212   : > { %2390 = vmatpush1.bf16.msra.mxu0 %v2389_v49  ;;  %2518 = vmatpush1.bf16.msra.mxu1 %v2517_v50  ;;  %v418_v49 = vld [vmem:[#allocation8 + $0x150] sm:$0xff]  ;;  %v429_v50 = vld [vmem:[#allocation8 + $0x1a8] sm:$0xff]  ;;  %v611_v26 = vld [vmem:[#allocation8 + $0x758] sm:$0xff] }
 0x213   : > { %2392 = vmatprep.subr.bf16.mxu0 %v2391_v53  ;;  %2520 = vmatprep.subr.bf16.mxu1 %v2519_v54  ;;  %v443_v53 = vld [vmem:[#allocation8 + $0x218] sm:$0xff]  ;;  %v2537_v54 = vpack.c.bf16 %v416_v45, %v404_v44  ;;  %v2665_v55 = vpack.c.bf16 %v418_v49, %v406_v46  ;;  %v2539_v56 = vpack.c.bf16 %v441_v51, %v429_v50  ;;  %v537_v44 = vld [vmem:[#allocation8 + $0x508] sm:$0xff]  ;;  %v524_v50 = vld [vmem:[#allocation8 + $0x4a0] sm:$0xff] }
 0x214   : > { %v2667_v60 = vpack.c.bf16 %v443_v53, %v431_v52  ;;  %v527_v45 = vld [vmem:[#allocation8 + $0x4b8] sm:$0xff]  ;;  %v536_v51 = vld [vmem:[#allocation8 + $0x500] sm:$0xff]  ;;  %v526_v52 = vld [vmem:[#allocation8 + $0x4b0] sm:$0xff] }
 0x215   : > { %v539_v46 = vld [vmem:[#allocation8 + $0x518] sm:$0xff] }
 0x216   : > { %2394 = vmatpush1.bf16.msra.mxu0 %v2393_v61  ;;  %2522 = vmatpush1.bf16.msra.mxu1 %v2521_v62  ;;  %v442_v61 = vld [vmem:[#allocation8 + $0x210] sm:$0xff]  ;;  %v453_v62 = vld [vmem:[#allocation8 + $0x268] sm:$0xff]  ;;  %v2683_v53 = vpack.c.bf16 %v539_v46, %v527_v45 }
 0x217   : > { %2396 = vmatprep.subr.bf16.mxu0 %v2395_v5  ;;  %2524 = vmatprep.subr.bf16.mxu1 %v2523_v6  ;;  %v467_v5 = vld [vmem:[#allocation8 + $0x2d8] sm:$0xff]  ;;  %v2541_v6 = vpack.c.bf16 %v440_v58, %v428_v57  ;;  %v2669_v7 = vpack.c.bf16 %v442_v61, %v430_v59  ;;  %v2543_v8 = vpack.c.bf16 %v465_v63, %v453_v62  ;;  %v548_v62 = vld [vmem:[#allocation8 + $0x560] sm:$0xff]  ;;  %v622_v45 = vld [vmem:[#allocation8 + $0x7b0] sm:$0xff] }
 0x218   : > { %v2671_v11 = vpack.c.bf16 %v467_v5, %v455_v3  ;;  %v551_v57 = vld [vmem:[#allocation8 + $0x578] sm:$0xff]  ;;  %v2557_v59 = vpack.c.bf16 %v536_v51, %v524_v50  ;;  %v560_v63 = vld [vmem:[#allocation8 + $0x5c0] sm:$0xff]  ;;  %v550_v3 = vld [vmem:[#allocation8 + $0x570] sm:$0xff] }
 0x219   : > { %v563_v58 = vld [vmem:[#allocation8 + $0x5d8] sm:$0xff] }
 0x21a   : > { %2398 = vmatpush1.bf16.msra.mxu0 %v2397_v23  ;;  %2526 = vmatpush1.bf16.msra.mxu1 %v2525_v13  ;;  %v466_v23 = vld [vmem:[#allocation8 + $0x2d0] sm:$0xff]  ;;  %v477_v13 = vld [vmem:[#allocation8 + $0x328] sm:$0xff]  ;;  %v2687_v5 = vpack.c.bf16 %v563_v58, %v551_v57  ;;  %v647_v50 = vld [vmem:[#allocation8 + $0x878] sm:$0xff] }
 0x21b   : > { %2400 = vmatprep.subr.bf16.mxu0 %v2399_v16  ;;  %2528 = vmatprep.subr.bf16.mxu1 %v2527_v17  ;;  %v491_v16 = vld [vmem:[#allocation8 + $0x398] sm:$0xff]  ;;  %v2545_v17 = vpack.c.bf16 %v464_v9, %v452_v22  ;;  %v2673_v18 = vpack.c.bf16 %v466_v23, %v454_v24  ;;  %v2547_v19 = vpack.c.bf16 %v489_v14, %v477_v13  ;;  %v572_v13 = vld [vmem:[#allocation8 + $0x620] sm:$0xff]  ;;  %v646_v57 = vld [vmem:[#allocation8 + $0x870] sm:$0xff] }
 0x21c   : > { %v2675_v0 = vpack.c.bf16 %v491_v16, %v479_v15  ;;  %v575_v22 = vld [vmem:[#allocation8 + $0x638] sm:$0xff]  ;;  %v2561_v24 = vpack.c.bf16 %v560_v63, %v548_v62  ;;  %v584_v14 = vld [vmem:[#allocation8 + $0x680] sm:$0xff]  ;;  %v574_v15 = vld [vmem:[#allocation8 + $0x630] sm:$0xff] }
 0x21d   : > { %v587_v9 = vld [vmem:[#allocation8 + $0x698] sm:$0xff] }
 0x21e   : > { %2402 = vmatpush1.bf16.msra.mxu0 %v2401_v1  ;;  %2530 = vmatpush1.bf16.msra.mxu1 %v2529_v28  ;;  %v490_v1 = vld [vmem:[#allocation8 + $0x390] sm:$0xff]  ;;  %v501_v28 = vld [vmem:[#allocation8 + $0x3e8] sm:$0xff]  ;;  %v2691_v16 = vpack.c.bf16 %v587_v9, %v575_v22  ;;  %v659_v51 = vld [vmem:[#allocation8 + $0x8d8] sm:$0xff] }
 0x21f   : > { %2532 = vmatprep.subr.bf16.mxu0 %v2531_v29  ;;  %2660 = vmatprep.subr.bf16.mxu1 %v2659_v2  ;;  %v513_v29 = vld [vmem:[#allocation8 + $0x448] sm:$0xff]  ;;  %v503_v2 = vld [vmem:[#allocation8 + $0x3f8] sm:$0xff]  ;;  %v2677_v31 = vpack.c.bf16 %v490_v1, %v478_v27  ;;  %v2565_v27 = vpack.c.bf16 %v584_v14, %v572_v13  ;;  %v2703_v58 = vpack.c.bf16 %v659_v51, %v647_v50  ;;  %v670_v22 = vld [vmem:[#allocation8 + $0x930] sm:$0xff] }
 0x220   : > { %v2551_v32 = vpack.c.bf16 %v513_v29, %v501_v28  ;;  %v2679_v36 = vpack.c.bf16 %v515_v30, %v503_v2  ;;  %v596_v28 = vld [vmem:[#allocation8 + $0x6e0] sm:$0xff]  ;;  %v598_v2 = vld [vmem:[#allocation8 + $0x6f0] sm:$0xff]  ;;  %v2695_v30 = vpack.c.bf16 %v611_v26, %v599_v20  ;;  %v671_v62 = vld [vmem:[#allocation8 + $0x938] sm:$0xff] }
 0x221   : > { %1344 = vmatmul.mubr.f32.vlgmr.msra.gmra.mrb[0].mxu0 %v3715_v12  ;;  %1486 = vmatmul.mubr.f32.vlgmr.msra.gmra.mrb[0].mxu1 %v3715_v12  ;;  %v608_v29 = vld [vmem:[#allocation8 + $0x740] sm:$0xff]  ;;  %v683_v63 = vld [vmem:[#allocation8 + $0x998] sm:$0xff]  ;;  %v694_v20 = vld [vmem:[#allocation8 + $0x9f0] sm:$0xff] }
 0x222   : > { %2534 = vmatpush1.bf16.msra.mxu0 %v2533_v37  ;;  %1556 = vmatprep.mubr.f32.mxu0 %v3711_v21  ;;  %v514_v37 = vld [vmem:[#allocation8 + $0x450] sm:$0xff]  ;;  %v2707_v9 = vpack.c.bf16 %v683_v63, %v671_v62  ;;  %v695_v13 = vld [vmem:[#allocation8 + $0x9f8] sm:$0xff] }
 0x223   : > { %2662 = vmatpush1.bf16.msra.mxu1 %v2661_v42  ;;  %1698 = vmatprep.mubr.f32.mxu1 %v3711_v21  ;;  %v525_v42 = vld [vmem:[#allocation8 + $0x4a8] sm:$0xff]  ;;  %v707_v14 = vld [vmem:[#allocation8 + $0xa58] sm:$0xff]  ;;  %v742_v50 = vld [vmem:[#allocation8 + $0xb70] sm:$0xff] }
 0x224   : > { %2536 = vmatprep.subr.bf16.mxu0 %v2535_v47  ;;  %2664 = vmatprep.subr.bf16.mxu1 %v2663_v48  ;;  %v2553_v47 = vpack.c.bf16 %v512_v34, %v500_v33  ;;  %v2681_v48 = vpack.c.bf16 %v514_v37, %v502_v35  ;;  %v2555_v49 = vpack.c.bf16 %v537_v44, %v525_v42  ;;  %v623_v33 = vld [vmem:[#allocation8 + $0x7b8] sm:$0xff]  ;;  %v620_v42 = vld [vmem:[#allocation8 + $0x7a0] sm:$0xff]  ;;  %v766_v63 = vld [vmem:[#allocation8 + $0xc30] sm:$0xff] }
 0x225   : > { %v635_v34 = vld [vmem:[#allocation8 + $0x818] sm:$0xff]  ;;  %v2569_v35 = vpack.c.bf16 %v608_v29, %v596_v28  ;;  %v632_v44 = vld [vmem:[#allocation8 + $0x800] sm:$0xff]  ;;  %v2711_v26 = vpack.c.bf16 %v707_v14, %v695_v13  ;;  %v802_v14 = vld [vmem:[#allocation8 + $0xd50] sm:$0xff] }
 0x226   : > { %2538 = vmatpush1.bf16.msra.mxu0 %v2537_v54  ;;  %v538_v54 = vld [vmem:[#allocation8 + $0x510] sm:$0xff]  ;;  %v2699_v46 = vpack.c.bf16 %v635_v34, %v623_v33  ;;  %v719_v28 = vld [vmem:[#allocation8 + $0xab8] sm:$0xff] }
 0x227   : > { %2666 = vmatpush1.bf16.msra.mxu1 %v2665_v55  ;;  %2540 = vmatprep.subr.bf16.mxu0 %v2539_v56  ;;  %v549_v55 = vld [vmem:[#allocation8 + $0x568] sm:$0xff]  ;;  %v731_v29 = vld [vmem:[#allocation8 + $0xb18] sm:$0xff]  ;;  %v718_v33 = vld [vmem:[#allocation8 + $0xab0] sm:$0xff] }
 0x228   : > { %2668 = vmatprep.subr.bf16.mxu1 %v2667_v60  ;;  %v561_v56 = vld [vmem:[#allocation8 + $0x5c8] sm:$0xff]  ;;  %v2685_v60 = vpack.c.bf16 %v538_v54, %v526_v52  ;;  %v2573_v52 = vpack.c.bf16 %v632_v44, %v620_v42  ;;  %v2715_v34 = vpack.c.bf16 %v731_v29, %v719_v28  ;;  %v743_v42 = vld [vmem:[#allocation8 + $0xb78] sm:$0xff]  ;;  %v814_v28 = vld [vmem:[#allocation8 + $0xdb0] sm:$0xff] }
 0x229   : > { %v2559_v61 = vpack.c.bf16 %v561_v56, %v549_v55  ;;  %v644_v55 = vld [vmem:[#allocation8 + $0x860] sm:$0xff]  ;;  %v755_v44 = vld [vmem:[#allocation8 + $0xbd8] sm:$0xff] }
 0x22a   : > { %2542 = vmatpush1.bf16.msra.mxu0 %v2541_v6  ;;  %v562_v6 = vld [vmem:[#allocation8 + $0x5d0] sm:$0xff]  ;;  %v656_v56 = vld [vmem:[#allocation8 + $0x8c0] sm:$0xff]  ;;  %v2719_v51 = vpack.c.bf16 %v755_v44, %v743_v42 }
 0x22b   : > { %2670 = vmatpush1.bf16.msra.mxu1 %v2669_v7  ;;  %2544 = vmatprep.subr.bf16.mxu0 %v2543_v8  ;;  %v573_v7 = vld [vmem:[#allocation8 + $0x628] sm:$0xff]  ;;  %v838_v42 = vld [vmem:[#allocation8 + $0xe70] sm:$0xff] }
 0x22c   : > { %2672 = vmatprep.subr.bf16.mxu1 %v2671_v11  ;;  %v585_v8 = vld [vmem:[#allocation8 + $0x688] sm:$0xff]  ;;  %v2689_v11 = vpack.c.bf16 %v562_v6, %v550_v3  ;;  %v2577_v3 = vpack.c.bf16 %v656_v56, %v644_v55  ;;  %v767_v55 = vld [vmem:[#allocation8 + $0xc38] sm:$0xff] }
 0x22d   : > { %v2563_v23 = vpack.c.bf16 %v585_v8, %v573_v7  ;;  %v668_v7 = vld [vmem:[#allocation8 + $0x920] sm:$0xff]  ;;  %v779_v56 = vld [vmem:[#allocation8 + $0xc98] sm:$0xff] }
 0x22e   : > { %2546 = vmatpush1.bf16.msra.mxu0 %v2545_v17  ;;  %v586_v17 = vld [vmem:[#allocation8 + $0x690] sm:$0xff]  ;;  %v680_v8 = vld [vmem:[#allocation8 + $0x980] sm:$0xff]  ;;  %v2723_v62 = vpack.c.bf16 %v779_v56, %v767_v55 }
 0x22f   : > { %2674 = vmatpush1.bf16.msra.mxu1 %v2673_v18  ;;  %2548 = vmatprep.subr.bf16.mxu0 %v2547_v19  ;;  %v597_v18 = vld [vmem:[#allocation8 + $0x6e8] sm:$0xff]  ;;  %v862_v55 = vld [vmem:[#allocation8 + $0xf30] sm:$0xff] }
 0x230   : > { %2676 = vmatprep.subr.bf16.mxu1 %v2675_v0  ;;  %v609_v19 = vld [vmem:[#allocation8 + $0x748] sm:$0xff]  ;;  %v2693_v0 = vpack.c.bf16 %v586_v17, %v574_v15  ;;  %v2581_v15 = vpack.c.bf16 %v680_v8, %v668_v7  ;;  %v791_v8 = vld [vmem:[#allocation8 + $0xcf8] sm:$0xff] }
 0x231   : > { %v2567_v1 = vpack.c.bf16 %v609_v19, %v597_v18  ;;  %v692_v18 = vld [vmem:[#allocation8 + $0x9e0] sm:$0xff] }
 0x232   : > { %2550 = vmatpush1.bf16.msra.mxu0 %v2549_v4  ;;  %v610_v4 = vld [vmem:[#allocation8 + $0x750] sm:$0xff]  ;;  %v704_v19 = vld [vmem:[#allocation8 + $0xa40] sm:$0xff] }
 0x233   : > { %2678 = vmatpush1.bf16.msra.mxu1 %v2677_v31  ;;  %2552 = vmatprep.subr.bf16.mxu0 %v2551_v32  ;;  %v621_v31 = vld [vmem:[#allocation8 + $0x7a8] sm:$0xff] }
 0x234   : > { %2680 = vmatprep.subr.bf16.mxu1 %v2679_v36  ;;  %v633_v32 = vld [vmem:[#allocation8 + $0x808] sm:$0xff]  ;;  %v2697_v36 = vpack.c.bf16 %v610_v4, %v598_v2  ;;  %v2585_v2 = vpack.c.bf16 %v704_v19, %v692_v18  ;;  %v815_v18 = vld [vmem:[#allocation8 + $0xdb8] sm:$0xff] }
 0x235   : > { %v2571_v37 = vpack.c.bf16 %v633_v32, %v621_v31  ;;  %v716_v31 = vld [vmem:[#allocation8 + $0xaa0] sm:$0xff]  ;;  %v827_v19 = vld [vmem:[#allocation8 + $0xe18] sm:$0xff] }
 0x236   : > { %2554 = vmatpush1.bf16.msra.mxu0 %v2553_v47  ;;  %v634_v47 = vld [vmem:[#allocation8 + $0x810] sm:$0xff]  ;;  %v728_v32 = vld [vmem:[#allocation8 + $0xb00] sm:$0xff]  ;;  %v2731_v29 = vpack.c.bf16 %v827_v19, %v815_v18 }
 0x237   : > { %2682 = vmatpush1.bf16.msra.mxu1 %v2681_v48  ;;  %2556 = vmatprep.subr.bf16.mxu0 %v2555_v49  ;;  %v645_v48 = vld [vmem:[#allocation8 + $0x868] sm:$0xff]  ;;  %v910_v18 = vld [vmem:[#allocation8 + $0x10b0] sm:$0xff] }
 0x238   : > { %2684 = vmatprep.subr.bf16.mxu1 %v2683_v53  ;;  %v657_v49 = vld [vmem:[#allocation8 + $0x8c8] sm:$0xff]  ;;  %v2701_v53 = vpack.c.bf16 %v634_v47, %v622_v45  ;;  %v2589_v45 = vpack.c.bf16 %v728_v32, %v716_v31  ;;  %v839_v31 = vld [vmem:[#allocation8 + $0xe78] sm:$0xff] }
 0x239   : > { %v2575_v54 = vpack.c.bf16 %v657_v49, %v645_v48  ;;  %v740_v48 = vld [vmem:[#allocation8 + $0xb60] sm:$0xff]  ;;  %v851_v32 = vld [vmem:[#allocation8 + $0xed8] sm:$0xff] }
 0x23a   : > { %2558 = vmatpush1.bf16.msra.mxu0 %v2557_v59  ;;  %v658_v59 = vld [vmem:[#allocation8 + $0x8d0] sm:$0xff]  ;;  %v752_v49 = vld [vmem:[#allocation8 + $0xbc0] sm:$0xff]  ;;  %v2735_v44 = vpack.c.bf16 %v851_v32, %v839_v31 }
 0x23b   : > { %2686 = vmatpush1.bf16.msra.mxu1 %v2685_v60  ;;  %2560 = vmatprep.subr.bf16.mxu0 %v2559_v61  ;;  %v669_v60 = vld [vmem:[#allocation8 + $0x928] sm:$0xff]  ;;  %v934_v31 = vld [vmem:[#allocation8 + $0x1170] sm:$0xff] }
 0x23c   : > { %2688 = vmatprep.subr.bf16.mxu1 %v2687_v5  ;;  %v681_v61 = vld [vmem:[#allocation8 + $0x988] sm:$0xff]  ;;  %v2705_v5 = vpack.c.bf16 %v658_v59, %v646_v57  ;;  %v2593_v57 = vpack.c.bf16 %v752_v49, %v740_v48  ;;  %v863_v48 = vld [vmem:[#allocation8 + $0xf38] sm:$0xff] }
 0x23d   : > { %v2579_v6 = vpack.c.bf16 %v681_v61, %v669_v60  ;;  %v764_v60 = vld [vmem:[#allocation8 + $0xc20] sm:$0xff]  ;;  %v875_v49 = vld [vmem:[#allocation8 + $0xf98] sm:$0xff] }
 0x23e   : > { %2562 = vmatpush1.bf16.msra.mxu0 %v2561_v24  ;;  %v682_v24 = vld [vmem:[#allocation8 + $0x990] sm:$0xff]  ;;  %v776_v61 = vld [vmem:[#allocation8 + $0xc80] sm:$0xff]  ;;  %v2739_v56 = vpack.c.bf16 %v875_v49, %v863_v48 }
 0x23f   : > { %2690 = vmatpush1.bf16.msra.mxu1 %v2689_v11  ;;  %2564 = vmatprep.subr.bf16.mxu0 %v2563_v23  ;;  %v693_v11 = vld [vmem:[#allocation8 + $0x9e8] sm:$0xff]  ;;  %v2597_v7 = vpack.c.bf16 %v776_v61, %v764_v60  ;;  %v887_v60 = vld [vmem:[#allocation8 + $0xff8] sm:$0xff]  ;;  %v958_v48 = vld [vmem:[#allocation8 + $0x1230] sm:$0xff] }
 0x240   : > { %2692 = vmatprep.subr.bf16.mxu1 %v2691_v16  ;;  %v705_v23 = vld [vmem:[#allocation8 + $0xa48] sm:$0xff]  ;;  %v2709_v16 = vpack.c.bf16 %v682_v24, %v670_v22  ;;  %v803_v22 = vld [vmem:[#allocation8 + $0xd58] sm:$0xff]  ;;  %v788_v24 = vld [vmem:[#allocation8 + $0xce0] sm:$0xff] }
 0x241   : > { %v2583_v17 = vpack.c.bf16 %v705_v23, %v693_v11  ;;  %v800_v11 = vld [vmem:[#allocation8 + $0xd40] sm:$0xff]  ;;  %v790_v23 = vld [vmem:[#allocation8 + $0xcf0] sm:$0xff]  ;;  %v899_v61 = vld [vmem:[#allocation8 + $0x1058] sm:$0xff] }
 0x242   : > { %2566 = vmatpush1.bf16.msra.mxu0 %v2565_v27  ;;  %v706_v27 = vld [vmem:[#allocation8 + $0xa50] sm:$0xff] }
 0x243   : > { %2694 = vmatpush1.bf16.msra.mxu1 %v2693_v0  ;;  %2568 = vmatprep.subr.bf16.mxu0 %v2567_v1  ;;  %v717_v0 = vld [vmem:[#allocation8 + $0xaa8] sm:$0xff] }
 0x244   : > { %2696 = vmatprep.subr.bf16.mxu1 %v2695_v30  ;;  %v729_v1 = vld [vmem:[#allocation8 + $0xb08] sm:$0xff]  ;;  %v2713_v30 = vpack.c.bf16 %v706_v27, %v694_v20  ;;  %v2601_v20 = vpack.c.bf16 %v800_v11, %v788_v24  ;;  %v911_v11 = vld [vmem:[#allocation8 + $0x10b8] sm:$0xff] }
 0x245   : > { %v2587_v4 = vpack.c.bf16 %v729_v1, %v717_v0  ;;  %v812_v0 = vld [vmem:[#allocation8 + $0xda0] sm:$0xff]  ;;  %v921_v24 = vld [vmem:[#allocation8 + $0x1108] sm:$0xff] }
 0x246   : > { %2570 = vmatpush1.bf16.msra.mxu0 %v2569_v35  ;;  %v730_v35 = vld [vmem:[#allocation8 + $0xb10] sm:$0xff]  ;;  %v824_v1 = vld [vmem:[#allocation8 + $0xe00] sm:$0xff] }
 0x247   : > { %2698 = vmatpush1.bf16.msra.mxu1 %v2697_v36  ;;  %2572 = vmatprep.subr.bf16.mxu0 %v2571_v37  ;;  %v741_v36 = vld [vmem:[#allocation8 + $0xb68] sm:$0xff] }
 0x248   : > { %2700 = vmatprep.subr.bf16.mxu1 %v2699_v46  ;;  %v753_v37 = vld [vmem:[#allocation8 + $0xbc8] sm:$0xff]  ;;  %v2717_v46 = vpack.c.bf16 %v730_v35, %v718_v33  ;;  %v2605_v33 = vpack.c.bf16 %v824_v1, %v812_v0  ;;  %v935_v0 = vld [vmem:[#allocation8 + $0x1178] sm:$0xff] }
 0x249   : > { %v2591_v47 = vpack.c.bf16 %v753_v37, %v741_v36  ;;  %v836_v36 = vld [vmem:[#allocation8 + $0xe60] sm:$0xff]  ;;  %v947_v1 = vld [vmem:[#allocation8 + $0x11d8] sm:$0xff] }
 0x24a   : > { %2574 = vmatpush1.bf16.msra.mxu0 %v2573_v52  ;;  %v754_v52 = vld [vmem:[#allocation8 + $0xbd0] sm:$0xff]  ;;  %v848_v37 = vld [vmem:[#allocation8 + $0xec0] sm:$0xff]  ;;  %v2751_v32 = vpack.c.bf16 %v947_v1, %v935_v0 }
 0x24b   : > { %2702 = vmatpush1.bf16.msra.mxu1 %v2701_v53  ;;  %2576 = vmatprep.subr.bf16.mxu0 %v2575_v54  ;;  %v765_v53 = vld [vmem:[#allocation8 + $0xc28] sm:$0xff]  ;;  %v1030_v0 = vld [vmem:[#allocation8 + $0x1470] sm:$0xff] }
 0x24c   : > { %2704 = vmatprep.subr.bf16.mxu1 %v2703_v58  ;;  %v777_v54 = vld [vmem:[#allocation8 + $0xc88] sm:$0xff]  ;;  %v2721_v58 = vpack.c.bf16 %v754_v52, %v742_v50  ;;  %v2609_v50 = vpack.c.bf16 %v848_v37, %v836_v36  ;;  %v959_v36 = vld [vmem:[#allocation8 + $0x1238] sm:$0xff] }
 0x24d   : > { %v2595_v59 = vpack.c.bf16 %v777_v54, %v765_v53  ;;  %v860_v53 = vld [vmem:[#allocation8 + $0xf20] sm:$0xff]  ;;  %v971_v37 = vld [vmem:[#allocation8 + $0x1298] sm:$0xff] }
 0x24e   : > { %2578 = vmatpush1.bf16.msra.mxu0 %v2577_v3  ;;  %v778_v3 = vld [vmem:[#allocation8 + $0xc90] sm:$0xff]  ;;  %v872_v54 = vld [vmem:[#allocation8 + $0xf80] sm:$0xff]  ;;  %v2755_v49 = vpack.c.bf16 %v971_v37, %v959_v36 }
 0x24f   : > { %2706 = vmatpush1.bf16.msra.mxu1 %v2705_v5  ;;  %2580 = vmatprep.subr.bf16.mxu0 %v2579_v6  ;;  %v789_v5 = vld [vmem:[#allocation8 + $0xce8] sm:$0xff]  ;;  %v1054_v36 = vld [vmem:[#allocation8 + $0x1530] sm:$0xff] }
 0x250   : > { %2708 = vmatprep.subr.bf16.mxu1 %v2707_v9  ;;  %v801_v6 = vld [vmem:[#allocation8 + $0xd48] sm:$0xff]  ;;  %v2725_v9 = vpack.c.bf16 %v778_v3, %v766_v63 }
 0x251   : > { %v2599_v13 = vpack.c.bf16 %v801_v6, %v789_v5  ;;  %v884_v5 = vld [vmem:[#allocation8 + $0xfe0] sm:$0xff] }
 0x252   : > { %2582 = vmatpush1.bf16.msra.mxu0 %v2581_v15  ;;  %v813_v15 = vld [vmem:[#allocation8 + $0xda8] sm:$0xff]  ;;  %v896_v6 = vld [vmem:[#allocation8 + $0x1040] sm:$0xff] }
 0x253   : > { %2710 = vmatpush1.bf16.msra.mxu1 %v2709_v16  ;;  %2584 = vmatprep.subr.bf16.mxu0 %v2583_v17  ;;  %v825_v16 = vld [vmem:[#allocation8 + $0xe08] sm:$0xff]  ;;  %v2727_v17 = vpack.c.bf16 %v803_v22, %v791_v8  ;;  %v2743_v8 = vpack.c.bf16 %v899_v61, %v887_v60  ;;  %v898_v22 = vld [vmem:[#allocation8 + $0x1050] sm:$0xff] }
 0x254   : > { %2712 = vmatprep.subr.bf16.mxu1 %v2711_v26  ;;  %v2729_v26 = vpack.c.bf16 %v802_v14, %v790_v23  ;;  %v2603_v27 = vpack.c.bf16 %v825_v16, %v813_v15  ;;  %v923_v23 = vld [vmem:[#allocation8 + $0x1118] sm:$0xff]  ;;  %v908_v16 = vld [vmem:[#allocation8 + $0x10a0] sm:$0xff]  ;;  %v982_v60 = vld [vmem:[#allocation8 + $0x12f0] sm:$0xff] }
 0x255   : > { %v2747_v19 = vpack.c.bf16 %v923_v23, %v911_v11  ;;  %v1006_v11 = vld [vmem:[#allocation8 + $0x13b0] sm:$0xff] }
 0x256   : > { %2586 = vmatpush1.bf16.msra.mxu0 %v2585_v2  ;;  %v826_v2 = vld [vmem:[#allocation8 + $0xe10] sm:$0xff] }
 0x257   : > { %2714 = vmatpush1.bf16.msra.mxu1 %v2713_v30  ;;  %2588 = vmatprep.subr.bf16.mxu0 %v2587_v4  ;;  %v837_v30 = vld [vmem:[#allocation8 + $0xe68] sm:$0xff] }
 0x258   : > { %2716 = vmatprep.subr.bf16.mxu1 %v2715_v34  ;;  %v849_v4 = vld [vmem:[#allocation8 + $0xec8] sm:$0xff]  ;;  %v2733_v34 = vpack.c.bf16 %v826_v2, %v814_v28 }
 0x259   : > { %v2607_v35 = vpack.c.bf16 %v849_v4, %v837_v30  ;;  %v932_v30 = vld [vmem:[#allocation8 + $0x1160] sm:$0xff] }
 0x25a   : > { %2590 = vmatpush1.bf16.msra.mxu0 %v2589_v45  ;;  %v850_v45 = vld [vmem:[#allocation8 + $0xed0] sm:$0xff]  ;;  %v944_v4 = vld [vmem:[#allocation8 + $0x11c0] sm:$0xff] }
 0x25b   : > { %2718 = vmatpush1.bf16.msra.mxu1 %v2717_v46  ;;  %2592 = vmatprep.subr.bf16.mxu0 %v2591_v47  ;;  %v861_v46 = vld [vmem:[#allocation8 + $0xf28] sm:$0xff] }
 0x25c   : > { %2720 = vmatprep.subr.bf16.mxu1 %v2719_v51  ;;  %v873_v47 = vld [vmem:[#allocation8 + $0xf88] sm:$0xff]  ;;  %v2737_v51 = vpack.c.bf16 %v850_v45, %v838_v42  ;;  %v2625_v42 = vpack.c.bf16 %v944_v4, %v932_v30  ;;  %v1055_v30 = vld [vmem:[#allocation8 + $0x1538] sm:$0xff] }
 0x25d   : > { %v2611_v52 = vpack.c.bf16 %v873_v47, %v861_v46  ;;  %v956_v46 = vld [vmem:[#allocation8 + $0x1220] sm:$0xff]  ;;  %v1067_v4 = vld [vmem:[#allocation8 + $0x1598] sm:$0xff] }
 0x25e   : > { %2594 = vmatpush1.bf16.msra.mxu0 %v2593_v57  ;;  %v874_v57 = vld [vmem:[#allocation8 + $0xf90] sm:$0xff]  ;;  %v968_v47 = vld [vmem:[#allocation8 + $0x1280] sm:$0xff]  ;;  %v2771_v37 = vpack.c.bf16 %v1067_v4, %v1055_v30 }
 0x25f   : > { %2722 = vmatpush1.bf16.msra.mxu1 %v2721_v58  ;;  %2596 = vmatprep.subr.bf16.mxu0 %v2595_v59  ;;  %v885_v58 = vld [vmem:[#allocation8 + $0xfe8] sm:$0xff]  ;;  %v2741_v63 = vpack.c.bf16 %v874_v57, %v862_v55  ;;  %v2629_v55 = vpack.c.bf16 %v968_v47, %v956_v46  ;;  %v1079_v46 = vld [vmem:[#allocation8 + $0x15f8] sm:$0xff]  ;;  %v386_v4 = vld [vmem:[#allocation8 + $0x50] sm:$0xff] }
 0x260   : > { %2724 = vmatprep.subr.bf16.mxu1 %v2723_v62  ;;  %v897_v59 = vld [vmem:[#allocation8 + $0x1048] sm:$0xff]  ;;  %v2613_v62 = vpack.c.bf16 %v872_v54, %v860_v53  ;;  %v983_v53 = vld [vmem:[#allocation8 + $0x12f8] sm:$0xff] }
 0x261   : > { %1557 = vmatmul.mubr.f32.vlgmr.msra.gmra.mrb[2].mxu0 %v3713_v10  ;;  %v2615_v3 = vpack.c.bf16 %v897_v59, %v885_v58  ;;  %v995_v54 = vld [vmem:[#allocation8 + $0x1358] sm:$0xff]  ;;  %v980_v58 = vld [vmem:[#allocation8 + $0x12e0] sm:$0xff] }
 0x262   : > { %1699 = vmatmul.mubr.f32.vlgmr.msra.gmra.mrb[2].mxu1 %v3713_v10  ;;  %2598 = vmatpush1.bf16.msra.mxu0 %v2597_v7  ;;  %v886_v7 = vld [vmem:[#allocation8 + $0xff0] sm:$0xff]  ;;  %v992_v59 = vld [vmem:[#allocation8 + $0x1340] sm:$0xff]  ;;  %v2759_v61 = vpack.c.bf16 %v995_v54, %v983_v53  ;;  %v1091_v47 = vld [vmem:[#allocation8 + $0x1658] sm:$0xff] }
 0x263   : > { %1627 = vmatprep.mubr.f32.mxu0 %v3721_v25  ;;  %2726 = vmatpush1.bf16.msra.mxu1 %v2725_v9  ;;  %v909_v9 = vld [vmem:[#allocation8 + $0x10a8] sm:$0xff]  ;;  %v2745_v14 = vpack.c.bf16 %v898_v22, %v886_v7  ;;  %v2633_v7 = vpack.c.bf16 %v992_v59, %v980_v58  ;;  %v1078_v53 = vld [vmem:[#allocation8 + $0x15f0] sm:$0xff]  ;;  %v2775_v54 = vpack.c.bf16 %v1091_v47, %v1079_v46  ;;  %v1103_v58 = vld [vmem:[#allocation8 + $0x16b8] sm:$0xff] }
 0x264   : > { %1769 = vmatprep.mubr.f32.mxu1 %v3721_v25  ;;  %2600 = vmatprep.subr.bf16.mxu0 %v2599_v13  ;;  %v2617_v13 = vpack.c.bf16 %v896_v6, %v884_v5  ;;  %v2619_v15 = vpack.c.bf16 %v921_v24, %v909_v9  ;;  %v1007_v5 = vld [vmem:[#allocation8 + $0x13b8] sm:$0xff]  ;;  %v1004_v9 = vld [vmem:[#allocation8 + $0x13a0] sm:$0xff]  ;;  %v422_v47 = vld [vmem:[#allocation8 + $0x170] sm:$0xff] }
 0x265   : > { %2728 = vmatprep.subr.bf16.mxu1 %v2727_v17  ;;  %v920_v17 = vld [vmem:[#allocation8 + $0x1100] sm:$0xff]  ;;  %v1019_v6 = vld [vmem:[#allocation8 + $0x1418] sm:$0xff] }
 0x266   : > { %2602 = vmatpush1.bf16.msra.mxu0 %v2601_v20  ;;  %v922_v20 = vld [vmem:[#allocation8 + $0x1110] sm:$0xff]  ;;  %v2621_v28 = vpack.c.bf16 %v920_v17, %v908_v16  ;;  %v1016_v24 = vld [vmem:[#allocation8 + $0x1400] sm:$0xff]  ;;  %v2763_v23 = vpack.c.bf16 %v1019_v6, %v1007_v5  ;;  %v1031_v16 = vld [vmem:[#allocation8 + $0x1478] sm:$0xff] }
 0x267   : > { %2730 = vmatpush1.bf16.msra.mxu1 %v2729_v26  ;;  %2604 = vmatprep.subr.bf16.mxu0 %v2603_v27  ;;  %v933_v26 = vld [vmem:[#allocation8 + $0x1168] sm:$0xff]  ;;  %v1043_v17 = vld [vmem:[#allocation8 + $0x14d8] sm:$0xff]  ;;  %v1102_v5 = vld [vmem:[#allocation8 + $0x16b0] sm:$0xff] }
 0x268   : > { %2732 = vmatprep.subr.bf16.mxu1 %v2731_v29  ;;  %v945_v27 = vld [vmem:[#allocation8 + $0x11c8] sm:$0xff]  ;;  %v2749_v29 = vpack.c.bf16 %v922_v20, %v910_v18  ;;  %v2637_v18 = vpack.c.bf16 %v1016_v24, %v1004_v9  ;;  %v2767_v1 = vpack.c.bf16 %v1043_v17, %v1031_v16  ;;  %v1115_v59 = vld [vmem:[#allocation8 + $0x1718] sm:$0xff]  ;;  %v1126_v16 = vld [vmem:[#allocation8 + $0x1770] sm:$0xff] }
 0x269   : > { %v2623_v2 = vpack.c.bf16 %v945_v27, %v933_v26  ;;  %v1028_v26 = vld [vmem:[#allocation8 + $0x1460] sm:$0xff]  ;;  %v2779_v6 = vpack.c.bf16 %v1115_v59, %v1103_v58  ;;  %v1127_v9 = vld [vmem:[#allocation8 + $0x1778] sm:$0xff]  ;;  %v434_v58 = vld [vmem:[#allocation8 + $0x1d0] sm:$0xff] }
 0x26a   : > { %2606 = vmatpush1.bf16.msra.mxu0 %v2605_v33  ;;  %v946_v33 = vld [vmem:[#allocation8 + $0x11d0] sm:$0xff]  ;;  %v1040_v27 = vld [vmem:[#allocation8 + $0x14c0] sm:$0xff]  ;;  %v1139_v24 = vld [vmem:[#allocation8 + $0x17d8] sm:$0xff] }
 0x26b   : > { %2734 = vmatpush1.bf16.msra.mxu1 %v2733_v34  ;;  %2608 = vmatprep.subr.bf16.mxu0 %v2607_v35  ;;  %v957_v34 = vld [vmem:[#allocation8 + $0x1228] sm:$0xff]  ;;  %v2783_v17 = vpack.c.bf16 %v1139_v24, %v1127_v9  ;;  %v458_v9 = vld [vmem:[#allocation8 + $0x290] sm:$0xff] }
 0x26c   : > { %2736 = vmatprep.subr.bf16.mxu1 %v2735_v44  ;;  %v969_v35 = vld [vmem:[#allocation8 + $0x1288] sm:$0xff]  ;;  %v2753_v44 = vpack.c.bf16 %v946_v33, %v934_v31  ;;  %v2641_v31 = vpack.c.bf16 %v1040_v27, %v1028_v26  ;;  %v387_v26 = vld [vmem:[#allocation8 + $0x58] sm:$0xff] }
 0x26d   : > { %v2627_v45 = vpack.c.bf16 %v969_v35, %v957_v34  ;;  %v1052_v34 = vld [vmem:[#allocation8 + $0x1520] sm:$0xff]  ;;  %v399_v27 = vld [vmem:[#allocation8 + $0xb8] sm:$0xff] }
 0x26e   : > { %2610 = vmatpush1.bf16.msra.mxu0 %v2609_v50  ;;  %v970_v50 = vld [vmem:[#allocation8 + $0x1290] sm:$0xff]  ;;  %v1064_v35 = vld [vmem:[#allocation8 + $0x1580] sm:$0xff]  ;;  %v2915_v30 = vpack.c.bf16 %v399_v27, %v387_v26 }
 0x26f   : > { %2738 = vmatpush1.bf16.msra.mxu1 %v2737_v51  ;;  %2612 = vmatprep.subr.bf16.mxu0 %v2611_v52  ;;  %v981_v51 = vld [vmem:[#allocation8 + $0x12e8] sm:$0xff]  ;;  %v494_v27 = vld [vmem:[#allocation8 + $0x3b0] sm:$0xff] }
 0x270   : > { %2740 = vmatprep.subr.bf16.mxu1 %v2739_v56  ;;  %v993_v52 = vld [vmem:[#allocation8 + $0x1348] sm:$0xff]  ;;  %v2757_v56 = vpack.c.bf16 %v970_v50, %v958_v48  ;;  %v2645_v48 = vpack.c.bf16 %v1064_v35, %v1052_v34  ;;  %v411_v35 = vld [vmem:[#allocation8 + $0x118] sm:$0xff] }
 0x271   : > { %v2631_v57 = vpack.c.bf16 %v993_v52, %v981_v51  ;;  %v1076_v51 = vld [vmem:[#allocation8 + $0x15e0] sm:$0xff] }
 0x272   : > { %2614 = vmatpush1.bf16.msra.mxu0 %v2613_v62  ;;  %v994_v62 = vld [vmem:[#allocation8 + $0x1350] sm:$0xff]  ;;  %v1088_v52 = vld [vmem:[#allocation8 + $0x1640] sm:$0xff] }
 0x273   : > { %2742 = vmatpush1.bf16.msra.mxu1 %v2741_v63  ;;  %2616 = vmatprep.subr.bf16.mxu0 %v2615_v3  ;;  %v1005_v63 = vld [vmem:[#allocation8 + $0x13a8] sm:$0xff] }
 0x274   : > { %2744 = vmatprep.subr.bf16.mxu1 %v2743_v8  ;;  %v1017_v3 = vld [vmem:[#allocation8 + $0x1408] sm:$0xff]  ;;  %v2761_v8 = vpack.c.bf16 %v994_v62, %v982_v60  ;;  %v2649_v60 = vpack.c.bf16 %v1088_v52, %v1076_v51  ;;  %v435_v51 = vld [vmem:[#allocation8 + $0x1d8] sm:$0xff] }
 0x275   : > { %v2635_v22 = vpack.c.bf16 %v1017_v3, %v1005_v63  ;;  %v1100_v63 = vld [vmem:[#allocation8 + $0x16a0] sm:$0xff]  ;;  %v447_v52 = vld [vmem:[#allocation8 + $0x238] sm:$0xff] }
 0x276   : > { %2618 = vmatpush1.bf16.msra.mxu0 %v2617_v13  ;;  %v1018_v13 = vld [vmem:[#allocation8 + $0x1410] sm:$0xff]  ;;  %v1112_v3 = vld [vmem:[#allocation8 + $0x1700] sm:$0xff]  ;;  %v2923_v59 = vpack.c.bf16 %v447_v52, %v435_v51 }
 0x277   : > { %2746 = vmatpush1.bf16.msra.mxu1 %v2745_v14  ;;  %2620 = vmatprep.subr.bf16.mxu0 %v2619_v15  ;;  %v1029_v14 = vld [vmem:[#allocation8 + $0x1468] sm:$0xff]  ;;  %v542_v52 = vld [vmem:[#allocation8 + $0x530] sm:$0xff] }
 0x278   : > { %2748 = vmatprep.subr.bf16.mxu1 %v2747_v19  ;;  %v1041_v15 = vld [vmem:[#allocation8 + $0x14c8] sm:$0xff]  ;;  %v2765_v19 = vpack.c.bf16 %v1018_v13, %v1006_v11  ;;  %v2653_v11 = vpack.c.bf16 %v1112_v3, %v1100_v63  ;;  %v459_v63 = vld [vmem:[#allocation8 + $0x298] sm:$0xff] }
 0x279   : > { %v2639_v20 = vpack.c.bf16 %v1041_v15, %v1029_v14  ;;  %v1124_v14 = vld [vmem:[#allocation8 + $0x1760] sm:$0xff]  ;;  %v471_v3 = vld [vmem:[#allocation8 + $0x2f8] sm:$0xff] }
 0x27a   : > { %2622 = vmatpush1.bf16.msra.mxu0 %v2621_v28  ;;  %v1042_v28 = vld [vmem:[#allocation8 + $0x14d0] sm:$0xff]  ;;  %v1136_v15 = vld [vmem:[#allocation8 + $0x17c0] sm:$0xff]  ;;  %v2927_v24 = vpack.c.bf16 %v471_v3, %v459_v63 }
 0x27b   : > { %2750 = vmatpush1.bf16.msra.mxu1 %v2749_v29  ;;  %2624 = vmatprep.subr.bf16.mxu0 %v2623_v2  ;;  %v1053_v29 = vld [vmem:[#allocation8 + $0x1528] sm:$0xff]  ;;  %v566_v3 = vld [vmem:[#allocation8 + $0x5f0] sm:$0xff] }
 0x27c   : > { %2752 = vmatprep.subr.bf16.mxu1 %v2751_v32  ;;  %v1065_v2 = vld [vmem:[#allocation8 + $0x1588] sm:$0xff]  ;;  %v2769_v32 = vpack.c.bf16 %v1042_v28, %v1030_v0  ;;  %v2657_v0 = vpack.c.bf16 %v1136_v15, %v1124_v14  ;;  %v495_v14 = vld [vmem:[#allocation8 + $0x3b8] sm:$0xff] }
 0x27d   : > { %v2643_v33 = vpack.c.bf16 %v1065_v2, %v1053_v29  ;;  %v384_v29 = vld [vmem:[#allocation8 + $0x40] sm:$0xff] }
 0x27e   : > { %2626 = vmatpush1.bf16.msra.mxu0 %v2625_v42  ;;  %v1066_v42 = vld [vmem:[#allocation8 + $0x1590] sm:$0xff]  ;;  %v396_v2 = vld [vmem:[#allocation8 + $0xa0] sm:$0xff] }
 0x27f   : > { %2754 = vmatpush1.bf16.msra.mxu1 %v2753_v44  ;;  %2628 = vmatprep.subr.bf16.mxu0 %v2627_v45  ;;  %v1077_v44 = vld [vmem:[#allocation8 + $0x15e8] sm:$0xff]  ;;  %v2789_v34 = vpack.c.bf16 %v396_v2, %v384_v29  ;;  %v519_v29 = vld [vmem:[#allocation8 + $0x478] sm:$0xff] }
 0x280   : > { %2756 = vmatprep.subr.bf16.mxu1 %v2755_v49  ;;  %v1089_v45 = vld [vmem:[#allocation8 + $0x1648] sm:$0xff]  ;;  %v2773_v49 = vpack.c.bf16 %v1066_v42, %v1054_v36  ;;  %v423_v36 = vld [vmem:[#allocation8 + $0x178] sm:$0xff]  ;;  %v408_v42 = vld [vmem:[#allocation8 + $0x100] sm:$0xff] }
 0x281   : > { %v2647_v50 = vpack.c.bf16 %v1089_v45, %v1077_v44  ;;  %v420_v44 = vld [vmem:[#allocation8 + $0x160] sm:$0xff]  ;;  %v410_v45 = vld [vmem:[#allocation8 + $0x110] sm:$0xff] }
 0x282   : > { %2630 = vmatpush1.bf16.msra.mxu0 %v2629_v55  ;;  %v1090_v55 = vld [vmem:[#allocation8 + $0x1650] sm:$0xff] }
 0x283   : > { %2758 = vmatpush1.bf16.msra.mxu1 %v2757_v56  ;;  %2632 = vmatprep.subr.bf16.mxu0 %v2631_v57  ;;  %v1101_v56 = vld [vmem:[#allocation8 + $0x16a8] sm:$0xff] }
 0x284   : > { %2760 = vmatprep.subr.bf16.mxu1 %v2759_v61  ;;  %v1113_v57 = vld [vmem:[#allocation8 + $0x1708] sm:$0xff]  ;;  %v2777_v61 = vpack.c.bf16 %v1090_v55, %v1078_v53  ;;  %v2793_v53 = vpack.c.bf16 %v420_v44, %v408_v42  ;;  %v531_v42 = vld [vmem:[#allocation8 + $0x4d8] sm:$0xff] }
 0x285   : > { %v2651_v62 = vpack.c.bf16 %v1113_v57, %v1101_v56  ;;  %v432_v56 = vld [vmem:[#allocation8 + $0x1c0] sm:$0xff]  ;;  %v543_v44 = vld [vmem:[#allocation8 + $0x538] sm:$0xff] }
 0x286   : > { %2634 = vmatpush1.bf16.msra.mxu0 %v2633_v7  ;;  %v1114_v7 = vld [vmem:[#allocation8 + $0x1710] sm:$0xff]  ;;  %v444_v57 = vld [vmem:[#allocation8 + $0x220] sm:$0xff]  ;;  %v2939_v51 = vpack.c.bf16 %v543_v44, %v531_v42 }
 0x287   : > { %2762 = vmatpush1.bf16.msra.mxu1 %v2761_v8  ;;  %2636 = vmatprep.subr.bf16.mxu0 %v2635_v22  ;;  %v1125_v8 = vld [vmem:[#allocation8 + $0x1768] sm:$0xff]  ;;  %v638_v44 = vld [vmem:[#allocation8 + $0x830] sm:$0xff] }
 0x288   : > { %2764 = vmatprep.subr.bf16.mxu1 %v2763_v23  ;;  %v1137_v22 = vld [vmem:[#allocation8 + $0x17c8] sm:$0xff]  ;;  %v2781_v23 = vpack.c.bf16 %v1114_v7, %v1102_v5  ;;  %v2797_v5 = vpack.c.bf16 %v444_v57, %v432_v56  ;;  %v567_v56 = vld [vmem:[#allocation8 + $0x5f8] sm:$0xff] }
 0x289   : > { %v2655_v13 = vpack.c.bf16 %v1137_v22, %v1125_v8  ;;  %v456_v8 = vld [vmem:[#allocation8 + $0x280] sm:$0xff] }
 0x28a   : > { %2638 = vmatpush1.bf16.msra.mxu0 %v2637_v18  ;;  %v1138_v18 = vld [vmem:[#allocation8 + $0x17d0] sm:$0xff]  ;;  %v468_v22 = vld [vmem:[#allocation8 + $0x2e0] sm:$0xff] }
 0x28b   : > { %2766 = vmatpush1.bf16.msra.mxu1 %v2765_v19  ;;  %2640 = vmatprep.subr.bf16.mxu0 %v2639_v20  ;;  %v385_v19 = vld [vmem:[#allocation8 + $0x48] sm:$0xff]  ;;  %v2801_v15 = vpack.c.bf16 %v468_v22, %v456_v8  ;;  %v591_v8 = vld [vmem:[#allocation8 + $0x6b8] sm:$0xff] }
 0x28c   : > { %2768 = vmatprep.subr.bf16.mxu1 %v2767_v1  ;;  %v397_v20 = vld [vmem:[#allocation8 + $0xa8] sm:$0xff]  ;;  %v2785_v1 = vpack.c.bf16 %v1138_v18, %v1126_v16  ;;  %v480_v18 = vld [vmem:[#allocation8 + $0x340] sm:$0xff] }
 0x28d   : > { %v2787_v28 = vpack.c.bf16 %v397_v20, %v385_v19  ;;  %v492_v19 = vld [vmem:[#allocation8 + $0x3a0] sm:$0xff]  ;;  %v482_v20 = vld [vmem:[#allocation8 + $0x350] sm:$0xff] }
 0x28e   : > { %2642 = vmatpush1.bf16.msra.mxu0 %v2641_v31  ;;  %v398_v31 = vld [vmem:[#allocation8 + $0xb0] sm:$0xff]  ;;  %v2805_v2 = vpack.c.bf16 %v492_v19, %v480_v18  ;;  %v615_v18 = vld [vmem:[#allocation8 + $0x778] sm:$0xff] }
 0x28f   : > { %2770 = vmatpush1.bf16.msra.mxu1 %v2769_v32  ;;  %2644 = vmatprep.subr.bf16.mxu0 %v2643_v33  ;;  %v409_v32 = vld [vmem:[#allocation8 + $0x108] sm:$0xff] }
 0x290   : > { %2772 = vmatprep.subr.bf16.mxu1 %v2771_v37  ;;  %v421_v33 = vld [vmem:[#allocation8 + $0x168] sm:$0xff]  ;;  %v2917_v37 = vpack.c.bf16 %v398_v31, %v386_v4  ;;  %v504_v31 = vld [vmem:[#allocation8 + $0x400] sm:$0xff] }
 0x291   : > { %v2791_v46 = vpack.c.bf16 %v421_v33, %v409_v32  ;;  %v516_v32 = vld [vmem:[#allocation8 + $0x460] sm:$0xff]  ;;  %v506_v33 = vld [vmem:[#allocation8 + $0x410] sm:$0xff] }
 0x292   : > { %2646 = vmatpush1.bf16.msra.mxu0 %v2645_v48  ;;  %v433_v48 = vld [vmem:[#allocation8 + $0x1c8] sm:$0xff] }
 0x293   : > { %2774 = vmatpush1.bf16.msra.mxu1 %v2773_v49  ;;  %2648 = vmatprep.subr.bf16.mxu0 %v2647_v50  ;;  %v445_v49 = vld [vmem:[#allocation8 + $0x228] sm:$0xff]  ;;  %v2919_v50 = vpack.c.bf16 %v423_v36, %v411_v35  ;;  %v518_v35 = vld [vmem:[#allocation8 + $0x470] sm:$0xff] }
 0x294   : > { %2776 = vmatprep.subr.bf16.mxu1 %v2775_v54  ;;  %v2921_v54 = vpack.c.bf16 %v422_v47, %v410_v45  ;;  %v2795_v55 = vpack.c.bf16 %v445_v49, %v433_v48  ;;  %v529_v36 = vld [vmem:[#allocation8 + $0x4c8] sm:$0xff]  ;;  %v2809_v45 = vpack.c.bf16 %v516_v32, %v504_v31  ;;  %v528_v48 = vld [vmem:[#allocation8 + $0x4c0] sm:$0xff]  ;;  %v639_v31 = vld [vmem:[#allocation8 + $0x838] sm:$0xff] }
 0x295   : > { %v540_v49 = vld [vmem:[#allocation8 + $0x520] sm:$0xff] }
 0x296   : > { %2650 = vmatpush1.bf16.msra.mxu0 %v2649_v60  ;;  %v446_v60 = vld [vmem:[#allocation8 + $0x230] sm:$0xff]  ;;  %v2813_v57 = vpack.c.bf16 %v540_v49, %v528_v48  ;;  %v663_v48 = vld [vmem:[#allocation8 + $0x8f8] sm:$0xff] }
 0x297   : > { %2778 = vmatpush1.bf16.msra.mxu1 %v2777_v61  ;;  %2652 = vmatprep.subr.bf16.mxu0 %v2651_v62  ;;  %v457_v61 = vld [vmem:[#allocation8 + $0x288] sm:$0xff] }
 0x298   : > { %2780 = vmatprep.subr.bf16.mxu1 %v2779_v6  ;;  %v469_v62 = vld [vmem:[#allocation8 + $0x2e8] sm:$0xff]  ;;  %v2925_v6 = vpack.c.bf16 %v446_v60, %v434_v58  ;;  %v552_v60 = vld [vmem:[#allocation8 + $0x580] sm:$0xff] }
 0x299   : > { %v2799_v7 = vpack.c.bf16 %v469_v62, %v457_v61  ;;  %v564_v61 = vld [vmem:[#allocation8 + $0x5e0] sm:$0xff]  ;;  %v554_v62 = vld [vmem:[#allocation8 + $0x590] sm:$0xff] }
 0x29a   : > { %2654 = vmatpush1.bf16.msra.mxu0 %v2653_v11  ;;  %v481_v11 = vld [vmem:[#allocation8 + $0x348] sm:$0xff]  ;;  %v2817_v22 = vpack.c.bf16 %v564_v61, %v552_v60  ;;  %v687_v60 = vld [vmem:[#allocation8 + $0x9b8] sm:$0xff] }
 0x29b   : > { %2782 = vmatpush1.bf16.msra.mxu1 %v2781_v23  ;;  %2656 = vmatprep.subr.bf16.mxu0 %v2655_v13  ;;  %v493_v23 = vld [vmem:[#allocation8 + $0x3a8] sm:$0xff]  ;;  %v483_v13 = vld [vmem:[#allocation8 + $0x358] sm:$0xff] }
 0x29c   : > { %2784 = vmatprep.subr.bf16.mxu1 %v2783_v17  ;;  %v2803_v17 = vpack.c.bf16 %v493_v23, %v481_v11  ;;  %v2931_v26 = vpack.c.bf16 %v495_v14, %v483_v13  ;;  %v588_v11 = vld [vmem:[#allocation8 + $0x6a0] sm:$0xff]  ;;  %v578_v23 = vld [vmem:[#allocation8 + $0x650] sm:$0xff] }
 0x29d   : > { %v590_v14 = vld [vmem:[#allocation8 + $0x6b0] sm:$0xff] }
 0x29e   : > { %2658 = vmatpush1.bf16.msra.mxu0 %v2657_v0  ;;  %v505_v0 = vld [vmem:[#allocation8 + $0x408] sm:$0xff] }
 0x29f   : > { %2786 = vmatpush1.bf16.msra.mxu1 %v2785_v1  ;;  %2788 = vmatprep.subr.bf16.mxu0 %v2787_v28  ;;  %v517_v1 = vld [vmem:[#allocation8 + $0x468] sm:$0xff]  ;;  %v507_v28 = vld [vmem:[#allocation8 + $0x418] sm:$0xff] }
 0x2a0   : > { %2916 = vmatprep.subr.bf16.mxu1 %v2915_v30  ;;  %v2933_v30 = vpack.c.bf16 %v494_v27, %v482_v20  ;;  %v2807_v4 = vpack.c.bf16 %v517_v1, %v505_v0  ;;  %v2949_v20 = vpack.c.bf16 %v590_v14, %v578_v23  ;;  %v600_v27 = vld [vmem:[#allocation8 + $0x700] sm:$0xff]  ;;  %v602_v1 = vld [vmem:[#allocation8 + $0x710] sm:$0xff] }
 0x2a1   : > { %1628 = vmatmul.mubr.f32.vlgmr.msra.gmra.mrb[2].mxu0 %v3715_v12  ;;  %v612_v0 = vld [vmem:[#allocation8 + $0x760] sm:$0xff] }
 0x2a2   : > { %1770 = vmatmul.mubr.f32.vlgmr.msra.gmra.mrb[2].mxu1 %v3715_v12  ;;  %2790 = vmatpush1.bf16.msra.mxu0 %v2789_v34  ;;  %v2935_v34 = vpack.c.bf16 %v519_v29, %v507_v28  ;;  %v614_v29 = vld [vmem:[#allocation8 + $0x770] sm:$0xff]  ;;  %v2825_v32 = vpack.c.bf16 %v612_v0, %v600_v27  ;;  %v696_v14 = vld [vmem:[#allocation8 + $0xa00] sm:$0xff]  ;;  %v735_v27 = vld [vmem:[#allocation8 + $0xb38] sm:$0xff] }
 0x2a3   : > { %1840 = vmatprep.mubr.f32.mxu0 %v3711_v21  ;;  %2918 = vmatpush1.bf16.msra.mxu1 %v2917_v37  ;;  %v541_v37 = vld [vmem:[#allocation8 + $0x528] sm:$0xff] }
 0x2a4   : > { %1982 = vmatprep.mubr.f32.mxu1 %v3711_v21  ;;  %2792 = vmatprep.subr.bf16.mxu0 %v2791_v46  ;;  %v470_v21 = vld [vmem:[#allocation8 + $0x2f0] sm:$0xff]  ;;  %v2937_v46 = vpack.c.bf16 %v518_v35, %v506_v33  ;;  %v2811_v47 = vpack.c.bf16 %v541_v37, %v529_v36  ;;  %v2953_v33 = vpack.c.bf16 %v614_v29, %v602_v1  ;;  %v624_v35 = vld [vmem:[#allocation8 + $0x7c0] sm:$0xff] }
 0x2a5   : > { %2920 = vmatprep.subr.bf16.mxu1 %v2919_v50  ;;  %v2929_v16 = vpack.c.bf16 %v470_v21, %v458_v9  ;;  %v530_v50 = vld [vmem:[#allocation8 + $0x4d0] sm:$0xff]  ;;  %v2945_v9 = vpack.c.bf16 %v566_v3, %v554_v62  ;;  %v576_v21 = vld [vmem:[#allocation8 + $0x640] sm:$0xff] }
 0x2a6   : > { %2794 = vmatpush1.bf16.msra.mxu0 %v2793_v53  ;;  %v553_v53 = vld [vmem:[#allocation8 + $0x588] sm:$0xff]  ;;  %v2941_v58 = vpack.c.bf16 %v542_v52, %v530_v50  ;;  %v2821_v19 = vpack.c.bf16 %v588_v11, %v576_v21  ;;  %v636_v36 = vld [vmem:[#allocation8 + $0x820] sm:$0xff]  ;;  %v626_v37 = vld [vmem:[#allocation8 + $0x7d0] sm:$0xff] }
 0x2a7   : > { %2922 = vmatpush1.bf16.msra.mxu1 %v2921_v54  ;;  %2796 = vmatprep.subr.bf16.mxu0 %v2795_v55  ;;  %v565_v54 = vld [vmem:[#allocation8 + $0x5e8] sm:$0xff]  ;;  %v555_v55 = vld [vmem:[#allocation8 + $0x598] sm:$0xff]  ;;  %v2829_v49 = vpack.c.bf16 %v636_v36, %v624_v35  ;;  %v2957_v50 = vpack.c.bf16 %v638_v44, %v626_v37  ;;  %v648_v52 = vld [vmem:[#allocation8 + $0x880] sm:$0xff] }
 0x2a8   : > { %2924 = vmatprep.subr.bf16.mxu1 %v2923_v59  ;;  %v2815_v59 = vpack.c.bf16 %v565_v54, %v553_v53  ;;  %v2943_v63 = vpack.c.bf16 %v567_v56, %v555_v55  ;;  %v660_v53 = vld [vmem:[#allocation8 + $0x8e0] sm:$0xff]  ;;  %v650_v54 = vld [vmem:[#allocation8 + $0x890] sm:$0xff]  ;;  %v711_v21 = vld [vmem:[#allocation8 + $0xa78] sm:$0xff] }
 0x2a9   : > { %v662_v56 = vld [vmem:[#allocation8 + $0x8f0] sm:$0xff]  ;;  %v2833_v61 = vpack.c.bf16 %v660_v53, %v648_v52  ;;  %v672_v3 = vld [vmem:[#allocation8 + $0x940] sm:$0xff]  ;;  %v759_v35 = vld [vmem:[#allocation8 + $0xbf8] sm:$0xff] }
 0x2aa   : > { %2798 = vmatpush1.bf16.msra.mxu0 %v2797_v5  ;;  %v577_v5 = vld [vmem:[#allocation8 + $0x648] sm:$0xff]  ;;  %v2961_v62 = vpack.c.bf16 %v662_v56, %v650_v54  ;;  %v720_v29 = vld [vmem:[#allocation8 + $0xac0] sm:$0xff]  ;;  %v783_v52 = vld [vmem:[#allocation8 + $0xcb8] sm:$0xff] }
 0x2ab   : > { %2926 = vmatpush1.bf16.msra.mxu1 %v2925_v6  ;;  %2800 = vmatprep.subr.bf16.mxu0 %v2799_v7  ;;  %v589_v6 = vld [vmem:[#allocation8 + $0x6a8] sm:$0xff]  ;;  %v579_v7 = vld [vmem:[#allocation8 + $0x658] sm:$0xff]  ;;  %v744_v44 = vld [vmem:[#allocation8 + $0xb80] sm:$0xff] }
 0x2ac   : > { %2928 = vmatprep.subr.bf16.mxu1 %v2927_v24  ;;  %v2819_v24 = vpack.c.bf16 %v589_v6, %v577_v5  ;;  %v2947_v13 = vpack.c.bf16 %v591_v8, %v579_v7  ;;  %v684_v5 = vld [vmem:[#allocation8 + $0x9a0] sm:$0xff]  ;;  %v674_v6 = vld [vmem:[#allocation8 + $0x950] sm:$0xff] }
 0x2ad   : > { %v686_v8 = vld [vmem:[#allocation8 + $0x9b0] sm:$0xff]  ;;  %v2837_v11 = vpack.c.bf16 %v684_v5, %v672_v3  ;;  %v768_v56 = vld [vmem:[#allocation8 + $0xc40] sm:$0xff]  ;;  %v795_v3 = vld [vmem:[#allocation8 + $0xd18] sm:$0xff] }
 0x2ae   : > { %2802 = vmatpush1.bf16.msra.mxu0 %v2801_v15  ;;  %v601_v15 = vld [vmem:[#allocation8 + $0x708] sm:$0xff]  ;;  %v2965_v23 = vpack.c.bf16 %v686_v8, %v674_v6  ;;  %v807_v5 = vld [vmem:[#allocation8 + $0xd78] sm:$0xff]  ;;  %v804_v8 = vld [vmem:[#allocation8 + $0xd60] sm:$0xff] }
 0x2af   : > { %2930 = vmatpush1.bf16.msra.mxu1 %v2929_v16  ;;  %2804 = vmatprep.subr.bf16.mxu0 %v2803_v17  ;;  %v613_v16 = vld [vmem:[#allocation8 + $0x768] sm:$0xff]  ;;  %v603_v17 = vld [vmem:[#allocation8 + $0x718] sm:$0xff] }
 0x2b0   : > { %2932 = vmatprep.subr.bf16.mxu1 %v2931_v26  ;;  %v2823_v26 = vpack.c.bf16 %v613_v16, %v601_v15  ;;  %v2951_v28 = vpack.c.bf16 %v615_v18, %v603_v17  ;;  %v708_v15 = vld [vmem:[#allocation8 + $0xa60] sm:$0xff]  ;;  %v698_v16 = vld [vmem:[#allocation8 + $0xa10] sm:$0xff] }
 0x2b1   : > { %v710_v18 = vld [vmem:[#allocation8 + $0xa70] sm:$0xff]  ;;  %v2841_v0 = vpack.c.bf16 %v708_v15, %v696_v14  ;;  %v831_v14 = vld [vmem:[#allocation8 + $0xe38] sm:$0xff] }
 0x2b2   : > { %2806 = vmatpush1.bf16.msra.mxu0 %v2805_v2  ;;  %v625_v2 = vld [vmem:[#allocation8 + $0x7c8] sm:$0xff]  ;;  %v2969_v1 = vpack.c.bf16 %v710_v18, %v698_v16  ;;  %v816_v18 = vld [vmem:[#allocation8 + $0xdc0] sm:$0xff] }
 0x2b3   : > { %2934 = vmatpush1.bf16.msra.mxu1 %v2933_v30  ;;  %2808 = vmatprep.subr.bf16.mxu0 %v2807_v4  ;;  %v637_v30 = vld [vmem:[#allocation8 + $0x828] sm:$0xff]  ;;  %v627_v4 = vld [vmem:[#allocation8 + $0x7d8] sm:$0xff] }
 0x2b4   : > { %2936 = vmatprep.subr.bf16.mxu1 %v2935_v34  ;;  %v2827_v34 = vpack.c.bf16 %v637_v30, %v625_v2  ;;  %v2955_v42 = vpack.c.bf16 %v639_v31, %v627_v4  ;;  %v732_v2 = vld [vmem:[#allocation8 + $0xb20] sm:$0xff]  ;;  %v722_v30 = vld [vmem:[#allocation8 + $0xad0] sm:$0xff] }
 0x2b5   : > { %v734_v31 = vld [vmem:[#allocation8 + $0xb30] sm:$0xff]  ;;  %v2845_v36 = vpack.c.bf16 %v732_v2, %v720_v29 }
 0x2b6   : > { %2810 = vmatpush1.bf16.msra.mxu0 %v2809_v45  ;;  %v649_v45 = vld [vmem:[#allocation8 + $0x888] sm:$0xff]  ;;  %v2973_v37 = vpack.c.bf16 %v734_v31, %v722_v30  ;;  %v852_v31 = vld [vmem:[#allocation8 + $0xee0] sm:$0xff] }
 0x2b7   : > { %2938 = vmatpush1.bf16.msra.mxu1 %v2937_v46  ;;  %2812 = vmatprep.subr.bf16.mxu0 %v2811_v47  ;;  %v661_v46 = vld [vmem:[#allocation8 + $0x8e8] sm:$0xff]  ;;  %v651_v47 = vld [vmem:[#allocation8 + $0x898] sm:$0xff] }
 0x2b8   : > { %2940 = vmatprep.subr.bf16.mxu1 %v2939_v51  ;;  %v2831_v51 = vpack.c.bf16 %v661_v46, %v649_v45  ;;  %v2959_v55 = vpack.c.bf16 %v663_v48, %v651_v47  ;;  %v756_v45 = vld [vmem:[#allocation8 + $0xbe0] sm:$0xff]  ;;  %v746_v46 = vld [vmem:[#allocation8 + $0xb90] sm:$0xff] }
 0x2b9   : > { %v758_v48 = vld [vmem:[#allocation8 + $0xbf0] sm:$0xff]  ;;  %v2849_v53 = vpack.c.bf16 %v756_v45, %v744_v44 }
 0x2ba   : > { %2814 = vmatpush1.bf16.msra.mxu0 %v2813_v57  ;;  %v673_v57 = vld [vmem:[#allocation8 + $0x948] sm:$0xff]  ;;  %v2977_v54 = vpack.c.bf16 %v758_v48, %v746_v46  ;;  %v864_v46 = vld [vmem:[#allocation8 + $0xf40] sm:$0xff]  ;;  %v866_v48 = vld [vmem:[#allocation8 + $0xf50] sm:$0xff] }
 0x2bb   : > { %2942 = vmatpush1.bf16.msra.mxu1 %v2941_v58  ;;  %2816 = vmatprep.subr.bf16.mxu0 %v2815_v59  ;;  %v685_v58 = vld [vmem:[#allocation8 + $0x9a8] sm:$0xff]  ;;  %v675_v59 = vld [vmem:[#allocation8 + $0x958] sm:$0xff] }
 0x2bc   : > { %2944 = vmatprep.subr.bf16.mxu1 %v2943_v63  ;;  %v2835_v63 = vpack.c.bf16 %v685_v58, %v673_v57  ;;  %v2963_v7 = vpack.c.bf16 %v687_v60, %v675_v59  ;;  %v780_v57 = vld [vmem:[#allocation8 + $0xca0] sm:$0xff]  ;;  %v770_v59 = vld [vmem:[#allocation8 + $0xc50] sm:$0xff] }
 0x2bd   : > { %v782_v60 = vld [vmem:[#allocation8 + $0xcb0] sm:$0xff] }
 0x2be   : > { %2818 = vmatpush1.bf16.msra.mxu0 %v2817_v22  ;;  %v697_v22 = vld [vmem:[#allocation8 + $0xa08] sm:$0xff]  ;;  %v2981_v6 = vpack.c.bf16 %v782_v60, %v770_v59  ;;  %v888_v59 = vld [vmem:[#allocation8 + $0x1000] sm:$0xff] }
 0x2bf   : > { %2946 = vmatpush1.bf16.msra.mxu1 %v2945_v9  ;;  %2820 = vmatprep.subr.bf16.mxu0 %v2819_v24  ;;  %v709_v9 = vld [vmem:[#allocation8 + $0xa68] sm:$0xff]  ;;  %v699_v24 = vld [vmem:[#allocation8 + $0xa18] sm:$0xff]  ;;  %v900_v60 = vld [vmem:[#allocation8 + $0x1060] sm:$0xff] }
 0x2c0   : > { %2948 = vmatprep.subr.bf16.mxu1 %v2947_v13  ;;  %v2839_v13 = vpack.c.bf16 %v709_v9, %v697_v22  ;;  %v2967_v17 = vpack.c.bf16 %v711_v21, %v699_v24  ;;  %v794_v22 = vld [vmem:[#allocation8 + $0xd10] sm:$0xff]  ;;  %v817_v21 = vld [vmem:[#allocation8 + $0xdc8] sm:$0xff] }
 0x2c1   : > { %v806_v24 = vld [vmem:[#allocation8 + $0xd70] sm:$0xff] }
 0x2c2   : > { %2822 = vmatpush1.bf16.msra.mxu0 %v2821_v19  ;;  %v721_v19 = vld [vmem:[#allocation8 + $0xac8] sm:$0xff]  ;;  %v2985_v16 = vpack.c.bf16 %v806_v24, %v794_v22  ;;  %v927_v22 = vld [vmem:[#allocation8 + $0x1138] sm:$0xff] }
 0x2c3   : > { %2950 = vmatpush1.bf16.msra.mxu1 %v2949_v20  ;;  %2824 = vmatprep.subr.bf16.mxu0 %v2823_v26  ;;  %v733_v20 = vld [vmem:[#allocation8 + $0xb28] sm:$0xff]  ;;  %v723_v26 = vld [vmem:[#allocation8 + $0xad8] sm:$0xff] }
 0x2c4   : > { %2952 = vmatprep.subr.bf16.mxu1 %v2951_v28  ;;  %v2843_v28 = vpack.c.bf16 %v733_v20, %v721_v19  ;;  %v2971_v4 = vpack.c.bf16 %v735_v27, %v723_v26  ;;  %v828_v19 = vld [vmem:[#allocation8 + $0xe20] sm:$0xff]  ;;  %v818_v20 = vld [vmem:[#allocation8 + $0xdd0] sm:$0xff] }
 0x2c5   : > { %v830_v27 = vld [vmem:[#allocation8 + $0xe30] sm:$0xff]  ;;  %v2861_v29 = vpack.c.bf16 %v828_v19, %v816_v18 }
 0x2c6   : > { %2826 = vmatpush1.bf16.msra.mxu0 %v2825_v32  ;;  %v745_v32 = vld [vmem:[#allocation8 + $0xb88] sm:$0xff]  ;;  %v2989_v2 = vpack.c.bf16 %v830_v27, %v818_v20  ;;  %v926_v19 = vld [vmem:[#allocation8 + $0x1130] sm:$0xff] }
 0x2c7   : > { %2954 = vmatpush1.bf16.msra.mxu1 %v2953_v33  ;;  %2828 = vmatprep.subr.bf16.mxu0 %v2827_v34  ;;  %v757_v33 = vld [vmem:[#allocation8 + $0xbe8] sm:$0xff]  ;;  %v747_v34 = vld [vmem:[#allocation8 + $0xb98] sm:$0xff] }
 0x2c8   : > { %2956 = vmatprep.subr.bf16.mxu1 %v2955_v42  ;;  %v2847_v42 = vpack.c.bf16 %v757_v33, %v745_v32  ;;  %v2975_v47 = vpack.c.bf16 %v759_v35, %v747_v34  ;;  %v842_v32 = vld [vmem:[#allocation8 + $0xe90] sm:$0xff]  ;;  %v865_v34 = vld [vmem:[#allocation8 + $0xf48] sm:$0xff] }
 0x2c9   : > { %v877_v35 = vld [vmem:[#allocation8 + $0xfa8] sm:$0xff] }
 0x2ca   : > { %2830 = vmatpush1.bf16.msra.mxu0 %v2829_v49  ;;  %v769_v49 = vld [vmem:[#allocation8 + $0xc48] sm:$0xff]  ;;  %v2867_v45 = vpack.c.bf16 %v877_v35, %v865_v34  ;;  %v936_v34 = vld [vmem:[#allocation8 + $0x1180] sm:$0xff] }
 0x2cb   : > { %2958 = vmatpush1.bf16.msra.mxu1 %v2957_v50  ;;  %2832 = vmatprep.subr.bf16.mxu0 %v2831_v51  ;;  %v781_v50 = vld [vmem:[#allocation8 + $0xca8] sm:$0xff]  ;;  %v771_v51 = vld [vmem:[#allocation8 + $0xc58] sm:$0xff]  ;;  %v948_v35 = vld [vmem:[#allocation8 + $0x11e0] sm:$0xff] }
 0x2cc   : > { %2960 = vmatprep.subr.bf16.mxu1 %v2959_v55  ;;  %v2851_v55 = vpack.c.bf16 %v781_v50, %v769_v49  ;;  %v2979_v58 = vpack.c.bf16 %v783_v52, %v771_v51  ;;  %v878_v50 = vld [vmem:[#allocation8 + $0xfb0] sm:$0xff]  ;;  %v889_v51 = vld [vmem:[#allocation8 + $0x1008] sm:$0xff] }
 0x2cd   : > { %v901_v52 = vld [vmem:[#allocation8 + $0x1068] sm:$0xff] }
 0x2ce   : > { %2834 = vmatpush1.bf16.msra.mxu0 %v2833_v61  ;;  %v793_v61 = vld [vmem:[#allocation8 + $0xd08] sm:$0xff] }
 0x2cf   : > { %2962 = vmatpush1.bf16.msra.mxu1 %v2961_v62  ;;  %2836 = vmatprep.subr.bf16.mxu0 %v2835_v63  ;;  %v805_v62 = vld [vmem:[#allocation8 + $0xd68] sm:$0xff]  ;;  %v2853_v63 = vpack.c.bf16 %v780_v57, %v768_v56  ;;  %v3741_v56 = vld [vmem:[#allocation10] sm:$0xff]  ;;  %v2997_v57 = vpack.c.bf16 %v878_v50, %v866_v48  ;;  %v963_v50 = vld [vmem:[#allocation8 + $0x1258] sm:$0xff] }
 0x2d0   : > { %2964 = vmatprep.subr.bf16.mxu1 %v2963_v7  ;;  %v792_v7 = vld [vmem:[#allocation8 + $0xd00] sm:$0xff]  ;;  %v2855_v9 = vpack.c.bf16 %v805_v62, %v793_v61  ;;  %v890_v61 = vld [vmem:[#allocation8 + $0x1010] sm:$0xff]  ;;  %v1163_v24 = vrot.slane %v3741_v56, %v3697_v43  ;;  %v937_v20 = vld [vmem:[#allocation8 + $0x1188] sm:$0xff] }
 0x2d1   : > { %v2857_v15 = vpack.c.bf16 %v804_v8, %v792_v7  ;;  %v1159_v7 = vrot.slane %v3741_v56, %v3694_v41  ;;  %v915_v8 = vld [vmem:[#allocation8 + $0x10d8] sm:$0xff] }
 0x2d2   : > { %2838 = vmatpush1.bf16.msra.mxu0 %v2837_v11  ;;  %v829_v11 = vld [vmem:[#allocation8 + $0xe28] sm:$0xff]  ;;  %v3003_v18 = vpack.c.bf16 %v927_v22, %v915_v8 }
 0x2d3   : > { %2966 = vmatpush1.bf16.msra.mxu1 %v2965_v23  ;;  %2840 = vmatprep.subr.bf16.mxu0 %v2839_v13  ;;  %v2983_v23 = vpack.c.bf16 %v807_v5, %v795_v3  ;;  %v819_v13 = vld [vmem:[#allocation8 + $0xdd8] sm:$0xff]  ;;  %v913_v3 = vld [vmem:[#allocation8 + $0x10c8] sm:$0xff] }
 0x2d4   : > { %2968 = vmatprep.subr.bf16.mxu1 %v2967_v17  ;;  %v2859_v17 = vpack.c.bf16 %v829_v11, %v817_v21  ;;  %v2987_v26 = vpack.c.bf16 %v831_v14, %v819_v13  ;;  %v925_v5 = vld [vmem:[#allocation8 + $0x1128] sm:$0xff]  ;;  %v2873_v21 = vpack.c.bf16 %v900_v60, %v888_v59  ;;  %v912_v13 = vld [vmem:[#allocation8 + $0x10c0] sm:$0xff] }
 0x2d5   : > { %v924_v14 = vld [vmem:[#allocation8 + $0x1120] sm:$0xff]  ;;  %v997_v8 = vld [vmem:[#allocation8 + $0x1368] sm:$0xff] }
 0x2d6   : > { %2842 = vmatpush1.bf16.msra.mxu0 %v2841_v0  ;;  %v841_v0 = vld [vmem:[#allocation8 + $0xe88] sm:$0xff]  ;;  %v960_v60 = vld [vmem:[#allocation8 + $0x1240] sm:$0xff] }
 0x2d7   : > { %2970 = vmatpush1.bf16.msra.mxu1 %v2969_v1  ;;  %2844 = vmatprep.subr.bf16.mxu0 %v2843_v28  ;;  %v853_v1 = vld [vmem:[#allocation8 + $0xee8] sm:$0xff]  ;;  %v843_v28 = vld [vmem:[#allocation8 + $0xe98] sm:$0xff] }
 0x2d8   : > { %2972 = vmatprep.subr.bf16.mxu1 %v2971_v4  ;;  %v2863_v30 = vpack.c.bf16 %v853_v1, %v841_v0  ;;  %v840_v4 = vld [vmem:[#allocation8 + $0xe80] sm:$0xff] }
 0x2da   : > { %2846 = vmatpush1.bf16.msra.mxu0 %v2845_v36  ;;  %v867_v36 = vld [vmem:[#allocation8 + $0xf58] sm:$0xff] }
 0x2db   : > { %2974 = vmatpush1.bf16.msra.mxu1 %v2973_v37  ;;  %2848 = vmatprep.subr.bf16.mxu0 %v2847_v42  ;;  %v879_v37 = vld [vmem:[#allocation8 + $0xfb8] sm:$0xff]  ;;  %v2865_v42 = vpack.c.bf16 %v852_v31, %v840_v4  ;;  %v2877_v4 = vpack.c.bf16 %v924_v14, %v912_v13 }
 0x2dc   : > { %2976 = vmatprep.subr.bf16.mxu1 %v2975_v47  ;;  %v876_v47 = vld [vmem:[#allocation8 + $0xfa0] sm:$0xff]  ;;  %v2995_v49 = vpack.c.bf16 %v879_v37, %v867_v36  ;;  %v938_v36 = vld [vmem:[#allocation8 + $0x1190] sm:$0xff] }
 0x2de   : > { %2850 = vmatpush1.bf16.msra.mxu0 %v2849_v53  ;;  %v891_v53 = vld [vmem:[#allocation8 + $0x1018] sm:$0xff] }
 0x2df   : > { %2978 = vmatpush1.bf16.msra.mxu1 %v2977_v54  ;;  %2852 = vmatprep.subr.bf16.mxu0 %v2851_v55  ;;  %v903_v54 = vld [vmem:[#allocation8 + $0x1078] sm:$0xff]  ;;  %v2869_v55 = vpack.c.bf16 %v876_v47, %v864_v46  ;;  %v961_v46 = vld [vmem:[#allocation8 + $0x1248] sm:$0xff] }
 0x2e0   : > { %2980 = vmatprep.subr.bf16.mxu1 %v2979_v58  ;;  %v2871_v58 = vpack.c.bf16 %v901_v52, %v889_v51  ;;  %v2999_v62 = vpack.c.bf16 %v903_v54, %v891_v53  ;;  %v973_v47 = vld [vmem:[#allocation8 + $0x12a8] sm:$0xff]  ;;  %v975_v51 = vld [vmem:[#allocation8 + $0x12b8] sm:$0xff]  ;;  %v2881_v54 = vpack.c.bf16 %v948_v35, %v936_v34  ;;  %v1022_v35 = vld [vmem:[#allocation8 + $0x1430] sm:$0xff] }
 0x2e1   : > { %1841 = vmatmul.mubr.f32.vlgmr.msra.gmra.mrb[4].mxu0 %v3713_v10  ;;  %v2883_v59 = vpack.c.bf16 %v973_v47, %v961_v46 }
 0x2e2   : > { %1983 = vmatmul.mubr.f32.vlgmr.msra.gmra.mrb[4].mxu1 %v3713_v10  ;;  %2854 = vmatpush1.bf16.msra.mxu0 %v2853_v63  ;;  %v855_v10 = vld [vmem:[#allocation8 + $0xef8] sm:$0xff]  ;;  %v902_v63 = vld [vmem:[#allocation8 + $0x1070] sm:$0xff] }
 0x2e3   : > { %1911 = vmatprep.mubr.f32.mxu0 %v3721_v25  ;;  %2982 = vmatpush1.bf16.msra.mxu1 %v2981_v6  ;;  %v2991_v33 = vpack.c.bf16 %v855_v10, %v843_v28  ;;  %v1151_v6 = vrot.slane %v3741_v56, %v3691_v40  ;;  %v3001_v11 = vpack.c.bf16 %v902_v63, %v890_v61  ;;  %v939_v10 = vld [vmem:[#allocation8 + $0x1198] sm:$0xff]  ;;  %v972_v61 = vld [vmem:[#allocation8 + $0x12a0] sm:$0xff] }
 0x2e4   : > { %2053 = vmatprep.mubr.f32.mxu1 %v3721_v25  ;;  %2856 = vmatprep.subr.bf16.mxu0 %v2855_v9  ;;  %v854_v25 = vld [vmem:[#allocation8 + $0xef0] sm:$0xff]  ;;  %v1155_v9 = vrot.slane %v3741_v56, %v3688_v39  ;;  %v2885_v13 = vpack.c.bf16 %v972_v61, %v960_v60  ;;  %v1056_v61 = vld [vmem:[#allocation8 + $0x1540] sm:$0xff] }
 0x2e5   : > { %2984 = vmatprep.subr.bf16.mxu1 %v2983_v23  ;;  %v2993_v44 = vpack.c.bf16 %v854_v25, %v842_v32  ;;  %v2875_v23 = vpack.c.bf16 %v925_v5, %v913_v3  ;;  %v3011_v5 = vpack.c.bf16 %v975_v51, %v963_v50  ;;  %v1034_v50 = vld [vmem:[#allocation8 + $0x1490] sm:$0xff] }
 0x2e6   : > { %2858 = vmatpush1.bf16.msra.mxu0 %v2857_v15  ;;  %v914_v15 = vld [vmem:[#allocation8 + $0x10d0] sm:$0xff] }
 0x2e7   : > { %2986 = vmatpush1.bf16.msra.mxu1 %v2985_v16  ;;  %2860 = vmatprep.subr.bf16.mxu0 %v2859_v17 }
 0x2e8   : > { %2988 = vmatprep.subr.bf16.mxu1 %v2987_v26  ;;  %v949_v26 = vld [vmem:[#allocation8 + $0x11e8] sm:$0xff] }
 0x2e9   : > { %v2879_v25 = vpack.c.bf16 %v949_v26, %v937_v20  ;;  %v986_v20 = vld [vmem:[#allocation8 + $0x1310] sm:$0xff] }
 0x2ea   : > { %2862 = vmatpush1.bf16.msra.mxu0 %v2861_v29  ;;  %v951_v29 = vld [vmem:[#allocation8 + $0x11f8] sm:$0xff] }
 0x2eb   : > { %2990 = vmatpush1.bf16.msra.mxu1 %v2989_v2  ;;  %2864 = vmatprep.subr.bf16.mxu0 %v2863_v30 }
 0x2ec   : > { %2992 = vmatprep.subr.bf16.mxu1 %v2991_v33  ;;  %v3005_v33 = vpack.c.bf16 %v926_v19, %v914_v15  ;;  %v996_v19 = vld [vmem:[#allocation8 + $0x1360] sm:$0xff] }
 0x2ee   : > { %2866 = vmatpush1.bf16.msra.mxu0 %v2865_v42 }
 0x2ef   : > { %2994 = vmatpush1.bf16.msra.mxu1 %v2993_v44  ;;  %2868 = vmatprep.subr.bf16.mxu0 %v2867_v45  ;;  %v3007_v44 = vpack.c.bf16 %v951_v29, %v939_v10  ;;  %v950_v45 = vld [vmem:[#allocation8 + $0x11f0] sm:$0xff]  ;;  %v1021_v10 = vld [vmem:[#allocation8 + $0x1428] sm:$0xff]  ;;  %v1011_v29 = vld [vmem:[#allocation8 + $0x13d8] sm:$0xff] }
 0x2f0   : > { %2996 = vmatprep.subr.bf16.mxu1 %v2995_v49 }
 0x2f2   : > { %2870 = vmatpush1.bf16.msra.mxu0 %v2869_v55 }
 0x2f3   : > { %2998 = vmatpush1.bf16.msra.mxu1 %v2997_v57  ;;  %2872 = vmatprep.subr.bf16.mxu0 %v2871_v58  ;;  %v3009_v58 = vpack.c.bf16 %v950_v45, %v938_v36  ;;  %v1033_v36 = vld [vmem:[#allocation8 + $0x1488] sm:$0xff] }
 0x2f4   : > { %v1345_v16 = vpop.f32.mrb[0].mxu0  ;;  %v1487_v17 = vpop.f32.mrb[0].mxu1  ;;  %3000 = vmatprep.subr.bf16.mxu1 %v2999_v62  ;;  %v962_v62 = vld [vmem:[#allocation8 + $0x1250] sm:$0xff] }
 0x2f5   : > { %v3043_v27 = vadd.f32 %v1345_v16, %v1151_v6  ;;  %v3045_v0 = vadd.f32 %v1487_v17, %v1159_v7  ;;  %v1347_v1 = vpop.f32.mrb[1].mxu0  ;;  %v1489_v28 = vpop.f32.mrb[1].mxu1  ;;  %v974_v6 = vld [vmem:[#allocation8 + $0x12b0] sm:$0xff]  ;;  %v985_v7 = vld [vmem:[#allocation8 + $0x1308] sm:$0xff] }
 0x2f6   : > { %v3044_v2 = vadd.f32 %v1347_v1, %v1155_v9  ;;  %v3046_v30 = vadd.f32 %v1489_v28, %v1163_v24  ;;  %2874 = vmatpush1.bf16.msra.mxu0 %v2873_v21  ;;  %v987_v24 = vld [vmem:[#allocation8 + $0x1318] sm:$0xff]  ;;  %v3013_v16 = vpack.c.bf16 %v974_v6, %v962_v62  ;;  %v2887_v17 = vpack.c.bf16 %v997_v8, %v985_v7  ;;  %v998_v1 = vld [vmem:[#allocation8 + $0x1370] sm:$0xff]  ;;  %v1009_v28 = vld [vmem:[#allocation8 + $0x13c8] sm:$0xff] }
 0x2f7   : > { %v2060_v31 = vmul.f32 256.0, %v3043_v27  ;;  %v2062_v32 = vmul.f32 256.0, %v3045_v0  ;;  %3002 = vmatpush1.bf16.msra.mxu1 %v3001_v11  ;;  %2876 = vmatprep.subr.bf16.mxu0 %v2875_v23  ;;  %v999_v21 = vld [vmem:[#allocation8 + $0x1378] sm:$0xff]  ;;  %v1068_v62 = vld [vmem:[#allocation8 + $0x15a0] sm:$0xff]  ;;  %v1081_v6 = vld [vmem:[#allocation8 + $0x1608] sm:$0xff] }
 0x2f8   : > { %v2061_v37 = vmul.f32 256.0, %v3044_v2  ;;  %v2063_v42 = vmul.f32 256.0, %v3046_v30  ;;  %3004 = vmatprep.subr.bf16.mxu1 %v3003_v18  ;;  %v984_v18 = vld [vmem:[#allocation8 + $0x1300] sm:$0xff]  ;;  %v3015_v0 = vpack.c.bf16 %v999_v21, %v987_v24  ;;  %v1023_v2 = vld [vmem:[#allocation8 + $0x1438] sm:$0xff]  ;;  %v1093_v7 = vld [vmem:[#allocation8 + $0x1668] sm:$0xff] }
 0x2f9   : > { %v3068_v48 = vround.rtne.f32 %v2060_v31  ;;  %v3070_v49 = vround.rtne.f32 %v2062_v32  ;;  %v2889_v30 = vpack.c.bf16 %v996_v19, %v984_v18  ;;  %v2891_v31 = vpack.c.bf16 %v1021_v10, %v1009_v28  ;;  %v1008_v32 = vld [vmem:[#allocation8 + $0x13c0] sm:$0xff]  ;;  %v1083_v8 = vld [vmem:[#allocation8 + $0x1618] sm:$0xff]  ;;  %v1106_v28 = vld [vmem:[#allocation8 + $0x16d0] sm:$0xff] }
 0x2fa   : > { %v3069_v52 = vround.rtne.f32 %v2061_v37  ;;  %v3071_v53 = vround.rtne.f32 %v2063_v42  ;;  %2878 = vmatpush1.bf16.msra.mxu0 %v2877_v4  ;;  %v3017_v4 = vpack.c.bf16 %v998_v1, %v986_v20  ;;  %v3019_v34 = vpack.c.bf16 %v1023_v2, %v1011_v29  ;;  %v1045_v37 = vld [vmem:[#allocation8 + $0x14e8] sm:$0xff]  ;;  %v1035_v42 = vld [vmem:[#allocation8 + $0x1498] sm:$0xff]  ;;  %v1116_v1 = vld [vmem:[#allocation8 + $0x1720] sm:$0xff] }
 0x2fb   : > { %v2084_v55 = vmax.f32 %v3068_v48, -32768.0  ;;  %v2086_v57 = vmax.f32 %v3070_v49, -32768.0  ;;  %3006 = vmatpush1.bf16.msra.mxu1 %v3005_v33  ;;  %2880 = vmatprep.subr.bf16.mxu0 %v2879_v25  ;;  %v1020_v33 = vld [vmem:[#allocation8 + $0x1420] sm:$0xff]  ;;  %v1010_v25 = vld [vmem:[#allocation8 + $0x13d0] sm:$0xff]  ;;  %v2895_v47 = vpack.c.bf16 %v1045_v37, %v1033_v36  ;;  %v2903_v21 = vpack.c.bf16 %v1093_v7, %v1081_v6  ;;  %v1107_v18 = vld [vmem:[#allocation8 + $0x16d8] sm:$0xff] }
 0x2fc   : > { %v2085_v63 = vmax.f32 %v3069_v52, -32768.0  ;;  %v2087_v3 = vmax.f32 %v3071_v53, -32768.0  ;;  %3008 = vmatprep.subr.bf16.mxu1 %v3007_v44  ;;  %v1047_v44 = vld [vmem:[#allocation8 + $0x14f8] sm:$0xff]  ;;  %v2893_v45 = vpack.c.bf16 %v1020_v33, %v1008_v32  ;;  %v3021_v46 = vpack.c.bf16 %v1022_v35, %v1010_v25  ;;  %v1032_v48 = vld [vmem:[#allocation8 + $0x1480] sm:$0xff]  ;;  %v1046_v52 = vld [vmem:[#allocation8 + $0x14f0] sm:$0xff] }
 0x2fd   : > { %v2096_v22 = vmin.f32 %v2084_v55, 32767.0  ;;  %v2098_v9 = vmin.f32 %v2086_v57, 32767.0  ;;  %v1044_v49 = vld [vmem:[#allocation8 + $0x14e0] sm:$0xff]  ;;  %v3023_v51 = vpack.c.bf16 %v1047_v44, %v1035_v42  ;;  %v1057_v53 = vld [vmem:[#allocation8 + $0x1548] sm:$0xff] }
 0x2fe   : > { %v2097_v11 = vmin.f32 %v2085_v63, 32767.0  ;;  %v2099_v23 = vmin.f32 %v2087_v3, 32767.0  ;;  %2882 = vmatpush1.bf16.msra.mxu0 %v2881_v54  ;;  %v1069_v54 = vld [vmem:[#allocation8 + $0x15a8] sm:$0xff]  ;;  %v1059_v55 = vld [vmem:[#allocation8 + $0x1558] sm:$0xff] }
 0x2ff   : > { %v2108_v14 = vmul.f32 0.00390625, %v2096_v22  ;;  %v2110_v15 = vmul.f32 0.00390625, %v2098_v9  ;;  %3010 = vmatpush1.bf16.msra.mxu1 %v3009_v58  ;;  %2884 = vmatprep.subr.bf16.mxu0 %v2883_v59  ;;  %v1071_v57 = vld [vmem:[#allocation8 + $0x15b8] sm:$0xff]  ;;  %v2897_v58 = vpack.c.bf16 %v1044_v49, %v1032_v48  ;;  %v3025_v59 = vpack.c.bf16 %v1046_v52, %v1034_v50  ;;  %v1058_v63 = vld [vmem:[#allocation8 + $0x1550] sm:$0xff]  ;;  %v1129_v2 = vld [vmem:[#allocation8 + $0x1788] sm:$0xff] }
 0x300   : > { %v2109_v26 = vmul.f32 0.00390625, %v2097_v11  ;;  %v2111_v27 = vmul.f32 0.00390625, %v2099_v23  ;;  %3012 = vmatprep.subr.bf16.mxu1 %v3011_v5  ;;  %v2899_v60 = vpack.c.bf16 %v1069_v54, %v1057_v53  ;;  %v3027_v3 = vpack.c.bf16 %v1071_v57, %v1059_v55  ;;  %v1070_v5 = vld [vmem:[#allocation8 + $0x15b0] sm:$0xff]  ;;  %v1095_v22 = vld [vmem:[#allocation8 + $0x1678] sm:$0xff]  ;;  %v1080_v11 = vld [vmem:[#allocation8 + $0x1600] sm:$0xff] }
 0x301   : > { %2120 = vst [vmem:[%s3754_s7] sm:$0xff] %v2108_v14  ;;  %2122 = vst [vmem:[%s3754_s7 + $0x10] sm:$0xff] %v2110_v15  ;;  %v2901_v9 = vpack.c.bf16 %v1068_v62, %v1056_v61  ;;  %v3029_v24 = vpack.c.bf16 %v1070_v5, %v1058_v63  ;;  %v1092_v23 = vld [vmem:[#allocation8 + $0x1660] sm:$0xff]  ;;  %v3031_v14 = vpack.c.bf16 %v1095_v22, %v1083_v8  ;;  %v1094_v15 = vld [vmem:[#allocation8 + $0x1670] sm:$0xff]  ;;  %v1170_v48 = vsub.s32 5, %v3685_v38 }
 0x302   : > { %2121 = vst [vmem:[%s3754_s7 + $0x8] sm:$0xff] %v2109_v26  ;;  %2123 = vst [vmem:[%s3754_s7 + $0x18] sm:$0xff] %v2111_v27  ;;  %2886 = vmatpush1.bf16.msra.mxu0 %v2885_v13  ;;  %v1082_v13 = vld [vmem:[#allocation8 + $0x1610] sm:$0xff]  ;;  %v1119_v19 = vld [vmem:[#allocation8 + $0x1738] sm:$0xff]  ;;  %v2905_v20 = vpack.c.bf16 %v1092_v23, %v1080_v11  ;;  %v1178_v49 = vsub.s32 7, %v3685_v38 }
 0x303   : > { %3014 = vmatpush1.bf16.msra.mxu1 %v3013_v16  ;;  %2888 = vmatprep.subr.bf16.mxu0 %v2887_v17  ;;  %v1105_v16 = vld [vmem:[#allocation8 + $0x16c8] sm:$0xff]  ;;  %v3033_v26 = vpack.c.bf16 %v1094_v15, %v1082_v13  ;;  %v3035_v10 = vpack.c.bf16 %v1119_v19, %v1107_v18  ;;  %v1118_v29 = vld [vmem:[#allocation8 + $0x1730] sm:$0xff]  ;;  %v1140_v35 = vld [vmem:[#allocation8 + $0x17e0] sm:$0xff]  ;;  %v1171_v52 = vrot.slane %v3741_v56, %v1170_v48 }
 0x304   : > { %3016 = vmatprep.subr.bf16.mxu1 %v3015_v0  ;;  %v1117_v17 = vld [vmem:[#allocation8 + $0x1728] sm:$0xff]  ;;  %v1104_v0 = vld [vmem:[#allocation8 + $0x16c0] sm:$0xff]  ;;  %v3037_v33 = vpack.c.bf16 %v1118_v29, %v1106_v28  ;;  %v1130_v37 = vld [vmem:[#allocation8 + $0x1790] sm:$0xff]  ;;  %v1179_v53 = vrot.slane %v3741_v56, %v1178_v49 }
 0x305   : > { %v2907_v27 = vpack.c.bf16 %v1117_v17, %v1105_v16  ;;  %v2909_v32 = vpack.c.bf16 %v1116_v1, %v1104_v0  ;;  %v1142_v42 = vld [vmem:[#allocation8 + $0x17f0] sm:$0xff]  ;;  %v1145_v18 = vld [vmem:[#allocation10 + $0x8] sm:$0xf] }
 0x306   : > { %2890 = vmatpush1.bf16.msra.mxu0 %v2889_v30  ;;  %v1141_v30 = vld [vmem:[#allocation8 + $0x17e8] sm:$0xff]  ;;  %v1183_v19 = vrot.slane %v1145_v18, %v3691_v40 }
 0x307   : > { %3018 = vmatpush1.bf16.msra.mxu1 %v3017_v4  ;;  %2892 = vmatprep.subr.bf16.mxu0 %v2891_v31  ;;  %v1131_v4 = vld [vmem:[#allocation8 + $0x1798] sm:$0xff]  ;;  %v2911_v25 = vpack.c.bf16 %v1141_v30, %v1129_v2 }
 0x308   : > { %3020 = vmatprep.subr.bf16.mxu1 %v3019_v34  ;;  %v1143_v31 = vld [vmem:[#allocation8 + $0x17f8] sm:$0xff]  ;;  %v1128_v34 = vld [vmem:[#allocation8 + $0x1780] sm:$0xff] }
 0x309   : > { %v3039_v36 = vpack.c.bf16 %v1143_v31, %v1131_v4  ;;  %v2913_v44 = vpack.c.bf16 %v1140_v35, %v1128_v34 }
 0x30a   : > { %2894 = vmatpush1.bf16.msra.mxu0 %v2893_v45  ;;  %v3041_v45 = vpack.c.bf16 %v1142_v42, %v1130_v37 }
 0x30b   : > { %3022 = vmatpush1.bf16.msra.mxu1 %v3021_v46  ;;  %2896 = vmatprep.subr.bf16.mxu0 %v2895_v47  ;;  %v1166_v46 = vsub.s32 4, %v3685_v38  ;;  %v1174_v47 = vsub.s32 6, %v3685_v38 }
 0x30c   : > { %3024 = vmatprep.subr.bf16.mxu1 %v3023_v51 }
 0x30d   : > { %v1167_v50 = vrot.slane %v3741_v56, %v1166_v46  ;;  %v1175_v51 = vrot.slane %v3741_v56, %v1174_v47 }
 0x30e   : > { %2898 = vmatpush1.bf16.msra.mxu0 %v2897_v58 }
 0x30f   : > { %3026 = vmatpush1.bf16.msra.mxu1 %v3025_v59  ;;  %2900 = vmatprep.subr.bf16.mxu0 %v2899_v60 }
 0x310   : > { %3028 = vmatprep.subr.bf16.mxu1 %v3027_v3 }
 0x312   : > { %2902 = vmatpush1.bf16.msra.mxu0 %v2901_v9 }
 0x313   : > { %3030 = vmatpush1.bf16.msra.mxu1 %v3029_v24  ;;  %2904 = vmatprep.subr.bf16.mxu0 %v2903_v21 }
 0x314   : > { %3032 = vmatprep.subr.bf16.mxu1 %v3031_v14 }
 0x316   : > { %2906 = vmatpush1.bf16.msra.mxu0 %v2905_v20  ;;  %v1191_v20 = vrot.slane %v1145_v18, %v3694_v41 }
 0x317   : > { %3034 = vmatpush1.bf16.msra.mxu1 %v3033_v26  ;;  %2908 = vmatprep.subr.bf16.mxu0 %v2907_v27  ;;  %v1187_v26 = vrot.slane %v1145_v18, %v3688_v39  ;;  %v1195_v27 = vrot.slane %v1145_v18, %v3697_v43 }
 0x318   : > { %3036 = vmatprep.subr.bf16.mxu1 %v3035_v10 }
 0x31a   : > { %2910 = vmatpush1.bf16.msra.mxu0 %v2909_v32 }
 0x31b   : > { %3038 = vmatpush1.bf16.msra.mxu1 %v3037_v33  ;;  %2912 = vmatprep.subr.bf16.mxu0 %v2911_v25 }
 0x31c   : > { %3040 = vmatprep.subr.bf16.mxu1 %v3039_v36 }
 0x31e   : > { %2914 = vmatpush1.bf16.msra.mxu0 %v2913_v44 }
 0x31f   : > { %3042 = vmatpush1.bf16.msra.mxu1 %v3041_v45 }
 0x321   : > { %1912 = vmatmul.mubr.f32.vlgmr.msra.gmra.mrb[4].mxu0 %v3715_v12 }
 0x322   : > { %2054 = vmatmul.mubr.f32.vlgmr.msra.gmra.mrb[4].mxu1 %v3715_v12 }
 0x374   : > { %v1629_v54 = vpop.f32.mrb[2].mxu0 }
 0x375   : > { %v3047_v55 = vadd.f32 %v1629_v54, %v1167_v50  ;;  %v1771_v57 = vpop.f32.mrb[2].mxu1  ;;  %v1631_v12 = vpop.f32.mrb[3].mxu0 }
 0x376   : > { %v3049_v58 = vadd.f32 %v1771_v57, %v1175_v51  ;;  %v3048_v59 = vadd.f32 %v1631_v12, %v1171_v52  ;;  %v1773_v60 = vpop.f32.mrb[3].mxu1 }
 0x377   : > { %v2064_v61 = vmul.f32 256.0, %v3047_v55  ;;  %v3050_v62 = vadd.f32 %v1773_v60, %v1179_v53 }
 0x378   : > { %v2066_v63 = vmul.f32 256.0, %v3049_v58  ;;  %v2065_v3 = vmul.f32 256.0, %v3048_v59 }
 0x379   : > { %v3072_v38 = vround.rtne.f32 %v2064_v61  ;;  %v2067_v5 = vmul.f32 256.0, %v3050_v62 }
 0x37a   : > { %v3074_v6 = vround.rtne.f32 %v2066_v63  ;;  %v3073_v7 = vround.rtne.f32 %v2065_v3 }
 0x37b   : > { %v2088_v8 = vmax.f32 %v3072_v38, -32768.0  ;;  %v3075_v56 = vround.rtne.f32 %v2067_v5 }
 0x37c   : > { %v2090_v22 = vmax.f32 %v3074_v6, -32768.0  ;;  %v2089_v9 = vmax.f32 %v3073_v7, -32768.0 }
 0x37d   : > { %v2100_v24 = vmin.f32 %v2088_v8, 32767.0  ;;  %v2091_v21 = vmax.f32 %v3075_v56, -32768.0 }
 0x37e   : > { %v2102_v11 = vmin.f32 %v2090_v22, 32767.0  ;;  %v2101_v23 = vmin.f32 %v2089_v9, 32767.0 }
 0x37f   : > { %v2112_v13 = vmul.f32 0.00390625, %v2100_v24  ;;  %v2103_v14 = vmin.f32 %v2091_v21, 32767.0 }
 0x380   : > { %v2114_v15 = vmul.f32 0.00390625, %v2102_v11  ;;  %v2113_v16 = vmul.f32 0.00390625, %v2101_v23 }
 0x381   : > { %2124 = vst [vmem:[%s3754_s7 + $0x20] sm:$0xff] %v2112_v13  ;;  %v2115_v17 = vmul.f32 0.00390625, %v2103_v14 }
 0x382   : > { %2126 = vst [vmem:[%s3754_s7 + $0x30] sm:$0xff] %v2114_v15  ;;  %2125 = vst [vmem:[%s3754_s7 + $0x28] sm:$0xff] %v2113_v16 }
 0x383   : > { %2127 = vst [vmem:[%s3754_s7 + $0x38] sm:$0xff] %v2115_v17 }
 0x3f4   : > { %v1913_v0 = vpop.f32.mrb[4].mxu0 }
 0x3f5   : > { %v3051_v1 = vadd.f32 %v1913_v0, %v1183_v19  ;;  %v2055_v28 = vpop.f32.mrb[4].mxu1  ;;  %v1915_v10 = vpop.f32.mrb[5].mxu0 }
 0x3f6   : > { %v3053_v29 = vadd.f32 %v2055_v28, %v1191_v20  ;;  %v3052_v2 = vadd.f32 %v1915_v10, %v1187_v26  ;;  %v2057_v30 = vpop.f32.mrb[5].mxu1 }
 0x3f7   : > { %v2068_v4 = vmul.f32 256.0, %v3051_v1  ;;  %v3054_v31 = vadd.f32 %v2057_v30, %v1195_v27 }
 0x3f8   : > { %v2070_v32 = vmul.f32 256.0, %v3053_v29  ;;  %v2069_v33 = vmul.f32 256.0, %v3052_v2 }
 0x3f9   : > { %v3076_v40 = vround.rtne.f32 %v2068_v4  ;;  %v2071_v25 = vmul.f32 256.0, %v3054_v31 }
 0x3fa   : > { %v3078_v41 = vround.rtne.f32 %v2070_v32  ;;  %v3077_v39 = vround.rtne.f32 %v2069_v33 }
 0x3fb   : > { %v2092_v34 = vmax.f32 %v3076_v40, -32768.0  ;;  %v3079_v43 = vround.rtne.f32 %v2071_v25 }
 0x3fc   : > { %v2094_v35 = vmax.f32 %v3078_v41, -32768.0  ;;  %v2093_v36 = vmax.f32 %v3077_v39, -32768.0 }
 0x3fd   : > { %v2104_v37 = vmin.f32 %v2092_v34, 32767.0  ;;  %v2095_v42 = vmax.f32 %v3079_v43, -32768.0 }
 0x3fe   : > { %v2106_v44 = vmin.f32 %v2094_v35, 32767.0  ;;  %v2105_v45 = vmin.f32 %v2093_v36, 32767.0 }
 0x3ff   : > { %v2116_v46 = vmul.f32 0.00390625, %v2104_v37  ;;  %v2107_v47 = vmin.f32 %v2095_v42, 32767.0 }
 0x400   : > { %v2118_v48 = vmul.f32 0.00390625, %v2106_v44  ;;  %v2117_v49 = vmul.f32 0.00390625, %v2105_v45 }
 0x401   : > { %2128 = vst [vmem:[%s3754_s7 + $0x40] sm:$0xff] %v2116_v46  ;;  %v2119_v50 = vmul.f32 0.00390625, %v2107_v47 }
 0x402   : > { %2130 = vst [vmem:[%s3754_s7 + $0x50] sm:$0xff] %v2118_v48  ;;  %2129 = vst [vmem:[%s3754_s7 + $0x48] sm:$0xff] %v2117_v49 }
 0x403   : > { %2131 = vst [vmem:[%s3754_s7 + $0x58] sm:$0xff] %v2119_v50 }
 0x404   : > { %3327 = shalt.err (!%p3324_p1)
}
 0x405   : > { %s3328_s16 = scalar_lea.hbm %s3784_s6, 1536  ;;  %s3332_s29 = scalar_lea.hbm %s3836_s5, 3072 }
 0x406   : > { %p3329_p3 = scmp.ne.s32.totalorder %s3784_s6, %s3328_s16  ;;  %p3333_p0 = scmp.lt.u32.totalorder %s3784_s6, %s3836_s5 }
 0x407   : > { %p3334_p2 = scmp.lt.u32.totalorder %s3332_s29, %s3328_s16  ;;  %p3336_p6 = scmp.lt.u32.totalorder %s3328_s16, %s3784_s6 }
 0x408   : > { %p3330_p9 = pnand %p3329_p3, %p3854_p10 }
 0x409   : > { %p3335_p8 = por %p3334_p2, %p3333_p0 }
 0x40a   : > { %p3331_p13 = pneg %p3330_p9 }
 0x40b   : > { %p3337_p11 = por %p3336_p6, %p3335_p8 }
 0x40d   : > { %p3338_p12 = pnand %p3337_p11, %p3331_p13 }
 0x40f   : > { %3341 = shalt.err (!%p3338_p12)
}
 0x410   : > { %3099 = dma.vmem_to_hbm [thread:$0]  (%p3854_p10), %s3786_s30, 1536, %s3784_s6, %s2133_s24  }
 0x411 PF: > { %s2159_s7 = sand.u32 1, %s3376_s18   ;;  %p3855_p5 = scmp.ne.s32.totalorder %s3847_s9, 0 }
 0x412   : > { %p3856_p7 = scmp.ge.s32.totalorder %s3388_s21, 2  ;;  %s2160_s15 = scalar_lea.sflag [#allocation4], %s2159_s7 }
 0x414   : > { %p3119_p4 = pnand %p3856_p7, %p3855_p5 }
 0x416   : > { %3371 = dma.done.wait (!%p3119_p4), %s2160_s15, 1536  }
 0x417   : > { %3373 = vsyncadd (!%p3119_p4), %s2160_s15, 4294965760  ;;  %p20_p1 = scmp.ge.s32.totalorder %s3561_s28, 4   ;;  %s3857_s18 = smov %s3380_s19 }
 0x418   : > { %s3858_s19 = smov %s3384_s20  ;;  %s3859_s20 = smov %s3572_s27 }
 0x419   : > { %s3860_s21 = smov %s3561_s28  ;;  %22 = sbr.rel (!%p20_p1) target bundleno = 7 (0x7), region = 101 }
 0x420   :  { %2165 = vsyncpa [#allocation3], 1 }
 0x421   :  { %2167 = vsyncpa [#allocation3 + $0x1], 1 }
 0x422   :  { %2168 = vsyncpa [#allocation6], 1 }
 0x423   :  { %2169 = vsyncpa [#allocation9], 1 }
 0x424   :  { %2170 = vsyncpa [#allocation4], 1 }
 0x425   :  { %2172 = vsyncpa [#allocation4 + $0x1], 1 }

</bundles_post_ra>
